<compile_context>
chip_gen: v7x
topology: tpu7x:2x2x1
jax: 0.10.0
libtpu: 0.0.40
codegen_flags: <defaults>
</compile_context>

<pallas_src>
import functools
import math

import jax
import jax.numpy as jnp
from jax import lax
from jax.experimental import pallas as pl
from jax.experimental.pallas import tpu as pltpu

_LN_EPS = 1e-6  # VideoMAE configs use LayerNorm(eps=1e-6) (PyTorch default is 1e-5).
_VMEM_LIMIT = 64 * 1024 * 1024  # explicit scoped-VMEM budget (fits v7x physical VMEM)


def _pick_row_tile(m, target):
    """Largest row tile <= target that divides m (multiple of 8), else m."""
    if m <= target:
        return m
    for t in range(target - target % 8, 7, -8):
        if m % t == 0:
            return t
    return m


def _ln(x, g, b):
    mu = jnp.mean(x, axis=-1, keepdims=True)
    var = jnp.mean((x - mu) ** 2, axis=-1, keepdims=True)
    return (x - mu) * lax.rsqrt(var + _LN_EPS) * g + b


def _wspec(shape):
    """Grid-invariant weight block: resident in VMEM, single-buffered."""
    return pl.BlockSpec(shape, lambda b: (0, 0), pipeline_mode=pl.Buffered(1))


# ---------------- patch embed (Conv3d stride==kernel as GEMM) ----------------

def _patch_embed_kernel(x_ref, w_ref, b_ref, o_ref):
    acc = jnp.dot(x_ref[...], w_ref[...], preferred_element_type=jnp.float32)
    o_ref[...] = (acc + b_ref[...]).astype(o_ref.dtype)


def patch_embed(x, w, b, *, row_tile=512):
    M, K = x.shape
    D = w.shape[1]
    tm = _pick_row_tile(M, row_tile)
    return pl.pallas_call(
        _patch_embed_kernel,
        out_shape=jax.ShapeDtypeStruct((M, D), jnp.bfloat16),  # bf16 residual stream
        grid=(M // tm,),
        in_specs=[
            pl.BlockSpec((tm, K), lambda i: (i, 0)),
            _wspec((K, D)),
            _wspec((1, D)),
        ],
        out_specs=pl.BlockSpec((tm, D), lambda i: (i, 0)),
        compiler_params=pltpu.CompilerParams(
            dimension_semantics=("parallel",), vmem_limit_bytes=_VMEM_LIMIT),
    )(x, w, b.reshape(1, D))


# -------- fused transformer block: LN1+QKV+MHSA+proj+res + LN2+MLP+res --------

def _block_kernel(tok_ref, ln1g_ref, ln1b_ref, qkvw_ref, qkvb_ref, pw_ref, pb_ref,
                  ln2g_ref, ln2b_ref, w1_ref, b1_ref, w2_ref, b2_ref, o_ref,
                  *, heads, dhp, pool_output):
    x = tok_ref[...].astype(jnp.float32)                       # (N, D) residual, f32 math
    N, D = x.shape

    # ---- MHSA ----
    h = _ln(x, ln1g_ref[...], ln1b_ref[...])
    qkv = jnp.dot(h.astype(jnp.bfloat16), qkvw_ref[...],
                  preferred_element_type=jnp.float32) + qkvb_ref[...]  # (N, heads*3*dhp)

    attn = jnp.zeros((N, D), jnp.float32)
    # TODO(synk): flash-style KV tiling with online softmax for giant N~1568; the
    #             full (N,N) score matrix is fine at toy N and fits VMEM easily.
    for hd in range(heads):                                     # static head loop
        base = hd * 3 * dhp                                     # 128-aligned slices
        q = qkv[:, base:base + dhp].astype(jnp.bfloat16)        # scale pre-folded into Q
        k = qkv[:, base + dhp:base + 2 * dhp].astype(jnp.bfloat16)
        v = qkv[:, base + 2 * dhp:base + 3 * dhp].astype(jnp.bfloat16)
        s = lax.dot_general(q, k, (((1,), (1,)), ((), ())),
                            preferred_element_type=jnp.float32)  # (N, N) f32
        s = s - jnp.max(s, axis=-1, keepdims=True)
        p = jnp.exp(s)
        p = p * pl.reciprocal(jnp.sum(p, axis=-1, keepdims=True), approx=True)
        out_h = jnp.dot(p.astype(jnp.bfloat16), v,
                        preferred_element_type=jnp.float32)      # (N, dhp)
        # accumulate this head's projection directly (no concat / per-head buffers)
        attn = attn + jnp.dot(out_h.astype(jnp.bfloat16),
                              pw_ref[hd * dhp:(hd + 1) * dhp, :],
                              preferred_element_type=jnp.float32)
    x = x + attn + pb_ref[...]                                   # residual 1 (fused)

    # ---- MLP ----
    h2 = _ln(x, ln2g_ref[...], ln2b_ref[...])
    m = jnp.dot(h2.astype(jnp.bfloat16), w1_ref[...],
                preferred_element_type=jnp.float32) + b1_ref[...]
    # TODO(synk): PyTorch nn.GELU() default is exact erf; tanh approximation used here.
    m = jax.nn.gelu(m, approximate=True)
    m = jnp.dot(m.astype(jnp.bfloat16), w2_ref[...],
                preferred_element_type=jnp.float32) + b2_ref[...]
    y = x + m                                                    # residual 2 (fused)
    # drop_path (stochastic depth) is identity at inference.

    if pool_output:
        # fused mean-pool epilogue: emit the f32 token sum for this batch element
        o_ref[...] = jnp.sum(y, axis=0, keepdims=True).reshape(1, 1, D)
    else:
        o_ref[...] = y.astype(o_ref.dtype)                       # bf16 residual stream


def transformer_block(tok, pk, *, batch, seq, heads, dhp, pool_output):
    M, D = tok.shape
    mlp = pk["fc1_w"].shape[1]
    qkv_cols = heads * 3 * dhp

    if pool_output:
        out_shape = jax.ShapeDtypeStruct((batch, 1, D), jnp.float32)
        out_spec = pl.BlockSpec((1, 1, D), lambda b: (b, 0, 0))
    else:
        out_shape = jax.ShapeDtypeStruct((M, D), jnp.bfloat16)
        out_spec = pl.BlockSpec((seq, D), lambda b: (b, 0))

    # TODO(synk): on v7x (2 TCs) add a q-tile grid axis so B=1 inference still
    #             gets a >=2-step parallel dimension.
    return pl.pallas_call(
        functools.partial(_block_kernel, heads=heads, dhp=dhp, pool_output=pool_output),
        out_shape=out_shape,
        grid=(batch,),
        in_specs=[
            pl.BlockSpec((seq, D), lambda b: (b, 0)),   # this batch element's tokens
            _wspec((1, D)), _wspec((1, D)),             # ln1
            _wspec((D, qkv_cols)), _wspec((1, qkv_cols)),
            _wspec((heads * dhp, D)), _wspec((1, D)),   # proj
            _wspec((1, D)), _wspec((1, D)),             # ln2
            _wspec((D, mlp)), _wspec((1, mlp)),         # fc1
            _wspec((mlp, D)), _wspec((1, D)),           # fc2
        ],
        out_specs=out_spec,
        compiler_params=pltpu.CompilerParams(
            dimension_semantics=("parallel",), vmem_limit_bytes=_VMEM_LIMIT),
    )(tok, pk["ln1_g"], pk["ln1_b"], pk["qkv_w"], pk["qkv_b"],
      pk["proj_w"], pk["proj_b"], pk["ln2_g"], pk["ln2_b"],
      pk["fc1_w"], pk["fc1_b"], pk["fc2_w"], pk["fc2_b"])


# ---------------- head: fc_norm + dropout + classifier on pooled feats -------

def _head_kernel(pool_ref, g_ref, b_ref, w_ref, cb_ref, o_ref, *, n_tokens):
    pooled = pool_ref[...][:, 0, :] * (1.0 / n_tokens)           # (B, D) mean pool
    h = _ln(pooled, g_ref[...], b_ref[...])                      # fc_norm
    # nn.Dropout(0.1) is identity at inference.
    # TODO(synk): training-mode dropout mask (pltpu.prng_*) not implemented.
    o_ref[...] = jnp.dot(h, w_ref[...],
                         preferred_element_type=jnp.float32) + cb_ref[...]


def head(pooled_sum, g, b, w, cb, *, n_tokens):
    B, _, D = pooled_sum.shape
    C = w.shape[1]
    return pl.pallas_call(
        functools.partial(_head_kernel, n_tokens=n_tokens),
        out_shape=jax.ShapeDtypeStruct((B, C), jnp.float32),
        grid=(1,),
        in_specs=[
            pl.BlockSpec((B, 1, D), lambda i: (0, 0, 0)),
            pl.BlockSpec((1, D), lambda i: (0, 0)),
            pl.BlockSpec((1, D), lambda i: (0, 0)),
            pl.BlockSpec((D, C), lambda i: (0, 0)),
            pl.BlockSpec((1, C), lambda i: (0, 0)),
        ],
        out_specs=pl.BlockSpec((B, C), lambda i: (0, 0)),
        compiler_params=pltpu.CompilerParams(
            dimension_semantics=("arbitrary",), vmem_limit_bytes=_VMEM_LIMIT),
    )(pooled_sum, g.reshape(1, D), b.reshape(1, D), w, cb.reshape(1, C))


# ---------------- parameters (natural layout) + kernel packing ----------------

def init_params(key, *, in_ch=3, tubelet=2, patch=8, dim=128, depth=2,
                mlp=256, classes=2):
    keys = jax.random.split(key, 2 + depth)
    kin = in_ch * tubelet * patch * patch

    def w_init(k, shape):
        return 0.02 * jax.random.normal(k, shape, jnp.float32)

    params = {
        "patch_w": w_init(keys[0], (kin, dim)),
        "patch_b": jnp.zeros((dim,), jnp.float32),
        "fc_norm_g": jnp.ones((dim,), jnp.float32),
        "fc_norm_b": jnp.zeros((dim,), jnp.float32),
        "cls_w": w_init(keys[1], (dim, classes)),
        "cls_b": jnp.zeros((classes,), jnp.float32),
        "blocks": [],
    }
    for l in range(depth):
        k = jax.random.split(keys[2 + l], 4)
        params["blocks"].append({
            "ln1_g": jnp.ones((dim,), jnp.float32),
            "ln1_b": jnp.zeros((dim,), jnp.float32),
            "qkv_w": w_init(k[0], (dim, 3 * dim)),      # columns = [q | k | v]
            "qkv_b": jnp.zeros((3 * dim,), jnp.float32),
            "proj_w": w_init(k[1], (dim, dim)),
            "proj_b": jnp.zeros((dim,), jnp.float32),
            "ln2_g": jnp.ones((dim,), jnp.float32),
            "ln2_b": jnp.zeros((dim,), jnp.float32),
            "fc1_w": w_init(k[2], (dim, mlp)),
            "fc1_b": jnp.zeros((mlp,), jnp.float32),
            "fc2_w": w_init(k[3], (mlp, dim)),
            "fc2_b": jnp.zeros((dim,), jnp.float32),
        })
    return params


def _pack_block(blk, *, heads, dhp):
    """Head-major, 128-lane-padded bf16 QKV/proj layout with scale folded into Q."""
    D = blk["ln1_g"].shape[0]
    dh = D // heads
    scale = 1.0 / math.sqrt(dh)

    qw, kw, vw = jnp.split(blk["qkv_w"].astype(jnp.float32), 3, axis=1)   # (D, D) each
    qb, kb, vb = jnp.split(blk["qkv_b"].astype(jnp.float32), 3)           # (D,)  each
    qw = qw * scale
    qb = qb * scale

    def pad_w(w):                                    # (D, D) -> (D, heads, dhp)
        return jnp.pad(w.reshape(D, heads, dh), ((0, 0), (0, 0), (0, dhp - dh)))

    def pad_b(b):                                    # (D,) -> (heads, dhp)
        return jnp.pad(b.reshape(heads, dh), ((0, 0), (0, dhp - dh)))

    qkv_wp = jnp.stack([pad_w(qw), pad_w(kw), pad_w(vw)], axis=2)   # (D, heads, 3, dhp)
    qkv_wp = qkv_wp.reshape(D, heads * 3 * dhp).astype(jnp.bfloat16)
    qkv_bp = jnp.stack([pad_b(qb), pad_b(kb), pad_b(vb)], axis=1)   # (heads, 3, dhp)
    qkv_bp = qkv_bp.reshape(1, heads * 3 * dhp)

    proj_w = blk["proj_w"].astype(jnp.float32).reshape(heads, dh, D)
    proj_wp = jnp.pad(proj_w, ((0, 0), (0, dhp - dh), (0, 0)))
    proj_wp = proj_wp.reshape(heads * dhp, D).astype(jnp.bfloat16)

    mlp = blk["fc1_w"].shape[1]
    return {
        "ln1_g": blk["ln1_g"].reshape(1, D), "ln1_b": blk["ln1_b"].reshape(1, D),
        "qkv_w": qkv_wp, "qkv_b": qkv_bp,
        "proj_w": proj_wp, "proj_b": blk["proj_b"].reshape(1, D),
        "ln2_g": blk["ln2_g"].reshape(1, D), "ln2_b": blk["ln2_b"].reshape(1, D),
        "fc1_w": blk["fc1_w"].astype(jnp.bfloat16), "fc1_b": blk["fc1_b"].reshape(1, mlp),
        "fc2_w": blk["fc2_w"].astype(jnp.bfloat16), "fc2_b": blk["fc2_b"].reshape(1, D),
    }


# ---------------- forward ----------------

def videomae_classifier_forward(params, x, *, tubelet=2, patch=8, heads=4):
    # x: (B, T, C, H, W) from the DataLoader; matches x.permute(0, 2, 1, 3, 4).float()
    x = jnp.transpose(x, (0, 2, 1, 3, 4)).astype(jnp.float32)    # NCTHW
    B, C, T, H, W = x.shape
    nt, nh, nw = T // tubelet, H // patch, W // patch
    N = nt * nh * nw

    # tubelet patchify: Conv3d(kernel == stride) expressed as a GEMM (layout only),
    # fed to the kernel as bf16 (halves the largest activation read).
    patches = x.reshape(B, C, nt, tubelet, nh, patch, nw, patch)
    patches = jnp.transpose(patches, (0, 2, 4, 6, 1, 3, 5, 7))   # (B,nt,nh,nw,C,tt,P,P)
    patches = patches.reshape(B * N, C * tubelet * patch * patch).astype(jnp.bfloat16)

    tok = patch_embed(patches, params["patch_w"].astype(jnp.bfloat16),
                      params["patch_b"])                          # (B*N, D) bf16
    D = params["patch_w"].shape[1]
    dh = D // heads
    dhp = ((dh + 127) // 128) * 128                               # lane-padded head dim

    pooled = None
    n_blocks = len(params["blocks"])
    for li, blk in enumerate(params["blocks"]):
        pk = _pack_block(blk, heads=heads, dhp=dhp)
        last = (li == n_blocks - 1)
        out = transformer_block(tok, pk, batch=B, seq=N, heads=heads, dhp=dhp,
                                pool_output=last)
        if last:
            pooled = out                                          # (B, 1, D) token sums
        else:
            tok = out                                             # (B*N, D) bf16

    logits = head(pooled, params["fc_norm_g"], params["fc_norm_b"],
                  params["cls_w"], params["cls_b"], n_tokens=N)
    return logits                                                 # (B, num_classes=2)


if __name__ == "__main__":
    key = jax.random.PRNGKey(0)
    pkey, xkey = jax.random.split(key)
    params = init_params(pkey)

    # small shapes consistent with the module: (B, frames, 3, H, W)
    B, T, C, H, W = 2, 8, 3, 16, 16
    x = jax.random.uniform(xkey, (B, T, C, H, W), dtype=jnp.float32)

    logits = jax.jit(videomae_classifier_forward)(params, x)
    jax.block_until_ready(logits)
    assert logits.shape == (B, 2) and logits.dtype == jnp.float32
    assert bool(jnp.all(jnp.isfinite(logits)))
    print("KERNEL_OK")
</pallas_src>

<mosaic_0001>
module attributes {stable_mosaic.version = 11 : i64} {
  func.func @_patch_embed_kernel(%arg0: i32, %arg1: memref<32x384xbf16, #tpu.memory_space<vmem>>, %arg2: memref<384x128xbf16, #tpu.memory_space<vmem>>, %arg3: memref<1x128xf32, #tpu.memory_space<vmem>>, %arg4: memref<32x128xbf16, #tpu.memory_space<vmem>>) attributes {dimension_semantics = [#tpu.dimension_semantics<parallel>], iteration_bounds = array<i64: 1>, scalar_prefetch = 0 : i64, scratch_operands = 0 : i64, tpu.core_type = #tpu.core_type<tc>, window_params = [{transform_indices = @transform_0, window_bounds = array<i64: 32, 384>}, {pipeline_mode = #tpu.pipeline_mode<synchronous>, transform_indices = @transform_1, window_bounds = array<i64: 384, 128>}, {pipeline_mode = #tpu.pipeline_mode<synchronous>, transform_indices = @transform_2, window_bounds = array<i64: 1, 128>}, {transform_indices = @transform_3, window_bounds = array<i64: 32, 128>}]} {
    %c0 = arith.constant 0 : index
    %c0_0 = arith.constant 0 : index
    %0 = vector.load %arg1[%c0, %c0_0] : memref<32x384xbf16, #tpu.memory_space<vmem>>, vector<32x384xbf16>
    %c0_1 = arith.constant 0 : index
    %c0_2 = arith.constant 0 : index
    %1 = vector.load %arg2[%c0_1, %c0_2] : memref<384x128xbf16, #tpu.memory_space<vmem>>, vector<384x128xbf16>
    %cst = arith.constant dense<0.000000e+00> : vector<32x128xf32>
    %2 = tpu.matmul %0, %1, %cst {dimension_numbers = #tpu.dot_dimension_numbers<[1], [0], [0], [1], [0, 0, 1, 1], [], []>} : vector<32x384xbf16>, vector<384x128xbf16>, vector<32x128xf32> -> vector<32x128xf32>
    %c0_3 = arith.constant 0 : index
    %c0_4 = arith.constant 0 : index
    %3 = vector.load %arg3[%c0_3, %c0_4] : memref<1x128xf32, #tpu.memory_space<vmem>>, vector<1x128xf32>
    %4 = vector.broadcast %3 : vector<1x128xf32> to vector<32x128xf32>
    %5 = arith.addf %2, %4 : vector<32x128xf32>
    %6 = arith.truncf %5 : vector<32x128xf32> to vector<32x128xbf16>
    %c0_5 = arith.constant 0 : index
    %c0_6 = arith.constant 0 : index
    %7 = vector.load %arg4[%c0_5, %c0_6] : memref<32x128xbf16, #tpu.memory_space<vmem>>, vector<32x128xbf16>
    tpu.vector_store %arg4[%c0_5, %c0_6], %6 {strides = array<i32>} : memref<32x128xbf16, #tpu.memory_space<vmem>>, vector<32x128xbf16>,
    return
  }
  func.func @transform_0(%arg0: i32) -> (i32, i32) {
    %c0_i32 = arith.constant 0 : i32
    %c0_i32_0 = arith.constant 0 : i32
    return %arg0, %c0_i32 : i32, i32
  }
  func.func @transform_1(%arg0: i32) -> (i32, i32) {
    %c0_i32 = arith.constant 0 : i32
    %c0_i32_0 = arith.constant 0 : i32
    %c0_i32_1 = arith.constant 0 : i32
    return %c0_i32, %c0_i32_0 : i32, i32
  }
  func.func @transform_2(%arg0: i32) -> (i32, i32) {
    %c0_i32 = arith.constant 0 : i32
    %c0_i32_0 = arith.constant 0 : i32
    %c0_i32_1 = arith.constant 0 : i32
    return %c0_i32, %c0_i32_0 : i32, i32
  }
  func.func @transform_3(%arg0: i32) -> (i32, i32) {
    %c0_i32 = arith.constant 0 : i32
    %c0_i32_0 = arith.constant 0 : i32
    return %arg0, %c0_i32 : i32, i32
  }
}

module attributes {stable_mosaic.version = 11 : i64} {
  func.func @_block_kernel(%arg0: i32, %arg1: memref<16x128xbf16, #tpu.memory_space<vmem>>, %arg2: memref<1x128xf32, #tpu.memory_space<vmem>>, %arg3: memref<1x128xf32, #tpu.memory_space<vmem>>, %arg4: memref<128x1536xbf16, #tpu.memory_space<vmem>>, %arg5: memref<1x1536xf32, #tpu.memory_space<vmem>>, %arg6: memref<512x128xbf16, #tpu.memory_space<vmem>>, %arg7: memref<1x128xf32, #tpu.memory_space<vmem>>, %arg8: memref<1x128xf32, #tpu.memory_space<vmem>>, %arg9: memref<1x128xf32, #tpu.memory_space<vmem>>, %arg10: memref<128x256xbf16, #tpu.memory_space<vmem>>, %arg11: memref<1x256xf32, #tpu.memory_space<vmem>>, %arg12: memref<256x128xbf16, #tpu.memory_space<vmem>>, %arg13: memref<1x128xf32, #tpu.memory_space<vmem>>, %arg14: memref<16x128xbf16, #tpu.memory_space<vmem>>) attributes {dimension_semantics = [#tpu.dimension_semantics<parallel>], iteration_bounds = array<i64: 2>, scalar_prefetch = 0 : i64, scratch_operands = 0 : i64, tpu.core_type = #tpu.core_type<tc>, window_params = [{transform_indices = @transform_0, window_bounds = array<i64: 16, 128>}, {pipeline_mode = #tpu.pipeline_mode<synchronous>, transform_indices = @transform_1, window_bounds = array<i64: 1, 128>}, {pipeline_mode = #tpu.pipeline_mode<synchronous>, transform_indices = @transform_2, window_bounds = array<i64: 1, 128>}, {pipeline_mode = #tpu.pipeline_mode<synchronous>, transform_indices = @transform_3, window_bounds = array<i64: 128, 1536>}, {pipeline_mode = #tpu.pipeline_mode<synchronous>, transform_indices = @transform_4, window_bounds = array<i64: 1, 1536>}, {pipeline_mode = #tpu.pipeline_mode<synchronous>, transform_indices = @transform_5, window_bounds = array<i64: 512, 128>}, {pipeline_mode = #tpu.pipeline_mode<synchronous>, transform_indices = @transform_6, window_bounds = array<i64: 1, 128>}, {pipeline_mode = #tpu.pipeline_mode<synchronous>, transform_indices = @transform_7, window_bounds = array<i64: 1, 128>}, {pipeline_mode = #tpu.pipeline_mode<synchronous>, transform_indices = @transform_8, window_bounds = array<i64: 1, 128>}, {pipeline_mode = #tpu.pipeline_mode<synchronous>, transform_indices = @transform_9, window_bounds = array<i64: 128, 256>}, {pipeline_mode = #tpu.pipeline_mode<synchronous>, transform_indices = @transform_10, window_bounds = array<i64: 1, 256>}, {pipeline_mode = #tpu.pipeline_mode<synchronous>, transform_indices = @transform_11, window_bounds = array<i64: 256, 128>}, {pipeline_mode = #tpu.pipeline_mode<synchronous>, transform_indices = @transform_12, window_bounds = array<i64: 1, 128>}, {transform_indices = @transform_13, window_bounds = array<i64: 16, 128>}]} {
    %c0 = arith.constant 0 : index
    %c0_0 = arith.constant 0 : index
    %0 = vector.load %arg1[%c0, %c0_0] : memref<16x128xbf16, #tpu.memory_space<vmem>>, vector<16x128xbf16>
    %1 = arith.extf %0 : vector<16x128xbf16> to vector<16x128xf32>
    %c0_1 = arith.constant 0 : index
    %c0_2 = arith.constant 0 : index
    %2 = vector.load %arg2[%c0_1, %c0_2] : memref<1x128xf32, #tpu.memory_space<vmem>>, vector<1x128xf32>
    %c0_3 = arith.constant 0 : index
    %c0_4 = arith.constant 0 : index
    %3 = vector.load %arg3[%c0_3, %c0_4] : memref<1x128xf32, #tpu.memory_space<vmem>>, vector<1x128xf32>
    %cst = arith.constant dense<0.000000e+00> : vector<16xf32>
    %4 = vector.multi_reduction <add>, %1, %cst [1] : vector<16x128xf32> to vector<16xf32>
    %5 = vector.shape_cast %4 : vector<16xf32> to vector<16x1xf32>
    %cst_5 = arith.constant 1.280000e+02 : f32
    %6 = vector.broadcast %cst_5 : f32 to vector<16x1xf32>
    %7 = arith.divf %5, %6 : vector<16x1xf32>
    %8 = vector.broadcast %7 : vector<16x1xf32> to vector<16x128xf32>
    %9 = arith.subf %1, %8 : vector<16x128xf32>
    %10 = arith.mulf %9, %9 : vector<16x128xf32>
    %cst_6 = arith.constant dense<0.000000e+00> : vector<16xf32>
    %11 = vector.multi_reduction <add>, %10, %cst_6 [1] : vector<16x128xf32> to vector<16xf32>
    %12 = vector.shape_cast %11 : vector<16xf32> to vector<16x1xf32>
    %cst_7 = arith.constant 1.280000e+02 : f32
    %13 = vector.broadcast %cst_7 : f32 to vector<16x1xf32>
    %14 = arith.divf %12, %13 : vector<16x1xf32>
    %15 = vector.broadcast %7 : vector<16x1xf32> to vector<16x128xf32>
    %16 = arith.subf %1, %15 : vector<16x128xf32>
    %cst_8 = arith.constant 9.99999997E-7 : f32
    %17 = vector.broadcast %cst_8 : f32 to vector<16x1xf32>
    %18 = arith.addf %14, %17 : vector<16x1xf32>
    %19 = math.rsqrt %18 : vector<16x1xf32>
    %20 = vector.broadcast %19 : vector<16x1xf32> to vector<16x128xf32>
    %21 = arith.mulf %16, %20 : vector<16x128xf32>
    %22 = vector.broadcast %2 : vector<1x128xf32> to vector<16x128xf32>
    %23 = arith.mulf %21, %22 : vector<16x128xf32>
    %24 = vector.broadcast %3 : vector<1x128xf32> to vector<16x128xf32>
    %25 = arith.addf %23, %24 : vector<16x128xf32>
    %26 = arith.truncf %25 : vector<16x128xf32> to vector<16x128xbf16>
    %c0_9 = arith.constant 0 : index
    %c0_10 = arith.constant 0 : index
    %27 = vector.load %arg4[%c0_9, %c0_10] : memref<128x1536xbf16, #tpu.memory_space<vmem>>, vector<128x1536xbf16>
    %cst_11 = arith.constant dense<0.000000e+00> : vector<16x1536xf32>
    %28 = tpu.matmul %26, %27, %cst_11 {dimension_numbers = #tpu.dot_dimension_numbers<[1], [0], [0], [1], [0, 0, 1, 1], [], []>} : vector<16x128xbf16>, vector<128x1536xbf16>, vector<16x1536xf32> -> vector<16x1536xf32>
    %c0_12 = arith.constant 0 : index
    %c0_13 = arith.constant 0 : index
    %29 = vector.load %arg5[%c0_12, %c0_13] : memref<1x1536xf32, #tpu.memory_space<vmem>>, vector<1x1536xf32>
    %30 = vector.broadcast %29 : vector<1x1536xf32> to vector<16x1536xf32>
    %31 = arith.addf %28, %30 : vector<16x1536xf32>
    %cst_14 = arith.constant 0.000000e+00 : f32
    %32 = vector.broadcast %cst_14 : f32 to vector<16x128xf32>
    %33 = vector.extract_strided_slice %31 {offsets = [0, 0], sizes = [16, 128], strides = [1, 1]} : vector<16x1536xf32> to vector<16x128xf32>
    %34 = arith.truncf %33 : vector<16x128xf32> to vector<16x128xbf16>
    %35 = vector.extract_strided_slice %31 {offsets = [0, 128], sizes = [16, 128], strides = [1, 1]} : vector<16x1536xf32> to vector<16x128xf32>
    %36 = arith.truncf %35 : vector<16x128xf32> to vector<16x128xbf16>
    %37 = vector.extract_strided_slice %31 {offsets = [0, 256], sizes = [16, 128], strides = [1, 1]} : vector<16x1536xf32> to vector<16x128xf32>
    %38 = arith.truncf %37 : vector<16x128xf32> to vector<16x128xbf16>
    %cst_15 = arith.constant dense<0.000000e+00> : vector<16x16xf32>
    %39 = tpu.matmul %34, %36, %cst_15 {dimension_numbers = #tpu.dot_dimension_numbers<[1], [1], [0], [0], [0, 0, 1, 0], [], []>} : vector<16x128xbf16>, vector<16x128xbf16>, vector<16x16xf32> -> vector<16x16xf32>
    %cst_16 = arith.constant dense<0xFF800000> : vector<16xf32>
    %40 = vector.multi_reduction <maximumf>, %39, %cst_16 [1] : vector<16x16xf32> to vector<16xf32>
    %41 = vector.shape_cast %40 : vector<16xf32> to vector<16x1xf32>
    %42 = vector.broadcast %41 : vector<16x1xf32> to vector<16x16xf32>
    %43 = arith.subf %39, %42 : vector<16x16xf32>
    %44 = math.exp %43 : vector<16x16xf32>
    %cst_17 = arith.constant dense<0.000000e+00> : vector<16xf32>
    %45 = vector.multi_reduction <add>, %44, %cst_17 [1] : vector<16x16xf32> to vector<16xf32>
    %46 = vector.shape_cast %45 : vector<16xf32> to vector<16x1xf32>
    %47 = tpu.reciprocal %46 {approx = true} : vector<16x1xf32> -> vector<16x1xf32>
    %48 = vector.broadcast %47 : vector<16x1xf32> to vector<16x16xf32>
    %49 = arith.mulf %44, %48 : vector<16x16xf32>
    %50 = arith.truncf %49 : vector<16x16xf32> to vector<16x16xbf16>
    %cst_18 = arith.constant dense<0.000000e+00> : vector<16x128xf32>
    %51 = tpu.matmul %50, %38, %cst_18 {dimension_numbers = #tpu.dot_dimension_numbers<[1], [0], [0], [1], [0, 0, 1, 1], [], []>} : vector<16x16xbf16>, vector<16x128xbf16>, vector<16x128xf32> -> vector<16x128xf32>
    %52 = arith.truncf %51 : vector<16x128xf32> to vector<16x128xbf16>
    %c0_19 = arith.constant 0 : index
    %c0_20 = arith.constant 0 : index
    %53 = vector.load %arg6[%c0_19, %c0_20] : memref<512x128xbf16, #tpu.memory_space<vmem>>, vector<128x128xbf16>
    %cst_21 = arith.constant dense<0.000000e+00> : vector<16x128xf32>
    %54 = tpu.matmul %52, %53, %cst_21 {dimension_numbers = #tpu.dot_dimension_numbers<[1], [0], [0], [1], [0, 0, 1, 1], [], []>} : vector<16x128xbf16>, vector<128x128xbf16>, vector<16x128xf32> -> vector<16x128xf32>
    %55 = arith.addf %32, %54 : vector<16x128xf32>
    %56 = vector.extract_strided_slice %31 {offsets = [0, 384], sizes = [16, 128], strides = [1, 1]} : vector<16x1536xf32> to vector<16x128xf32>
    %57 = arith.truncf %56 : vector<16x128xf32> to vector<16x128xbf16>
    %58 = vector.extract_strided_slice %31 {offsets = [0, 512], sizes = [16, 128], strides = [1, 1]} : vector<16x1536xf32> to vector<16x128xf32>
    %59 = arith.truncf %58 : vector<16x128xf32> to vector<16x128xbf16>
    %60 = vector.extract_strided_slice %31 {offsets = [0, 640], sizes = [16, 128], strides = [1, 1]} : vector<16x1536xf32> to vector<16x128xf32>
    %61 = arith.truncf %60 : vector<16x128xf32> to vector<16x128xbf16>
    %cst_22 = arith.constant dense<0.000000e+00> : vector<16x16xf32>
    %62 = tpu.matmul %57, %59, %cst_22 {dimension_numbers = #tpu.dot_dimension_numbers<[1], [1], [0], [0], [0, 0, 1, 0], [], []>} : vector<16x128xbf16>, vector<16x128xbf16>, vector<16x16xf32> -> vector<16x16xf32>
    %cst_23 = arith.constant dense<0xFF800000> : vector<16xf32>
    %63 = vector.multi_reduction <maximumf>, %62, %cst_23 [1] : vector<16x16xf32> to vector<16xf32>
    %64 = vector.shape_cast %63 : vector<16xf32> to vector<16x1xf32>
    %65 = vector.broadcast %64 : vector<16x1xf32> to vector<16x16xf32>
    %66 = arith.subf %62, %65 : vector<16x16xf32>
    %67 = math.exp %66 : vector<16x16xf32>
    %cst_24 = arith.constant dense<0.000000e+00> : vector<16xf32>
    %68 = vector.multi_reduction <add>, %67, %cst_24 [1] : vector<16x16xf32> to vector<16xf32>
    %69 = vector.shape_cast %68 : vector<16xf32> to vector<16x1xf32>
    %70 = tpu.reciprocal %69 {approx = true} : vector<16x1xf32> -> vector<16x1xf32>
    %71 = vector.broadcast %70 : vector<16x1xf32> to vector<16x16xf32>
    %72 = arith.mulf %67, %71 : vector<16x16xf32>
    %73 = arith.truncf %72 : vector<16x16xf32> to vector<16x16xbf16>
    %cst_25 = arith.constant dense<0.000000e+00> : vector<16x128xf32>
    %74 = tpu.matmul %73, %61, %cst_25 {dimension_numbers = #tpu.dot_dimension_numbers<[1], [0], [0], [1], [0, 0, 1, 1], [], []>} : vector<16x16xbf16>, vector<16x128xbf16>, vector<16x128xf32> -> vector<16x128xf32>
    %75 = arith.truncf %74 : vector<16x128xf32> to vector<16x128xbf16>
    %c128 = arith.constant 128 : index
    %c0_26 = arith.constant 0 : index
    %76 = vector.load %arg6[%c128, %c0_26] : memref<512x128xbf16, #tpu.memory_space<vmem>>, vector<128x128xbf16>
    %cst_27 = arith.constant dense<0.000000e+00> : vector<16x128xf32>
    %77 = tpu.matmul %75, %76, %cst_27 {dimension_numbers = #tpu.dot_dimension_numbers<[1], [0], [0], [1], [0, 0, 1, 1], [], []>} : vector<16x128xbf16>, vector<128x128xbf16>, vector<16x128xf32> -> vector<16x128xf32>
    %78 = arith.addf %55, %77 : vector<16x128xf32>
    %79 = vector.extract_strided_slice %31 {offsets = [0, 768], sizes = [16, 128], strides = [1, 1]} : vector<16x1536xf32> to vector<16x128xf32>
    %80 = arith.truncf %79 : vector<16x128xf32> to vector<16x128xbf16>
    %81 = vector.extract_strided_slice %31 {offsets = [0, 896], sizes = [16, 128], strides = [1, 1]} : vector<16x1536xf32> to vector<16x128xf32>
    %82 = arith.truncf %81 : vector<16x128xf32> to vector<16x128xbf16>
    %83 = vector.extract_strided_slice %31 {offsets = [0, 1024], sizes = [16, 128], strides = [1, 1]} : vector<16x1536xf32> to vector<16x128xf32>
    %84 = arith.truncf %83 : vector<16x128xf32> to vector<16x128xbf16>
    %cst_28 = arith.constant dense<0.000000e+00> : vector<16x16xf32>
    %85 = tpu.matmul %80, %82, %cst_28 {dimension_numbers = #tpu.dot_dimension_numbers<[1], [1], [0], [0], [0, 0, 1, 0], [], []>} : vector<16x128xbf16>, vector<16x128xbf16>, vector<16x16xf32> -> vector<16x16xf32>
    %cst_29 = arith.constant dense<0xFF800000> : vector<16xf32>
    %86 = vector.multi_reduction <maximumf>, %85, %cst_29 [1] : vector<16x16xf32> to vector<16xf32>
    %87 = vector.shape_cast %86 : vector<16xf32> to vector<16x1xf32>
    %88 = vector.broadcast %87 : vector<16x1xf32> to vector<16x16xf32>
    %89 = arith.subf %85, %88 : vector<16x16xf32>
    %90 = math.exp %89 : vector<16x16xf32>
    %cst_30 = arith.constant dense<0.000000e+00> : vector<16xf32>
    %91 = vector.multi_reduction <add>, %90, %cst_30 [1] : vector<16x16xf32> to vector<16xf32>
    %92 = vector.shape_cast %91 : vector<16xf32> to vector<16x1xf32>
    %93 = tpu.reciprocal %92 {approx = true} : vector<16x1xf32> -> vector<16x1xf32>
    %94 = vector.broadcast %93 : vector<16x1xf32> to vector<16x16xf32>
    %95 = arith.mulf %90, %94 : vector<16x16xf32>
    %96 = arith.truncf %95 : vector<16x16xf32> to vector<16x16xbf16>
    %cst_31 = arith.constant dense<0.000000e+00> : vector<16x128xf32>
    %97 = tpu.matmul %96, %84, %cst_31 {dimension_numbers = #tpu.dot_dimension_numbers<[1], [0], [0], [1], [0, 0, 1, 1], [], []>} : vector<16x16xbf16>, vector<16x128xbf16>, vector<16x128xf32> -> vector<16x128xf32>
    %98 = arith.truncf %97 : vector<16x128xf32> to vector<16x128xbf16>
    %c256 = arith.constant 256 : index
    %c0_32 = arith.constant 0 : index
    %99 = vector.load %arg6[%c256, %c0_32] : memref<512x128xbf16, #tpu.memory_space<vmem>>, vector<128x128xbf16>
    %cst_33 = arith.constant dense<0.000000e+00> : vector<16x128xf32>
    %100 = tpu.matmul %98, %99, %cst_33 {dimension_numbers = #tpu.dot_dimension_numbers<[1], [0], [0], [1], [0, 0, 1, 1], [], []>} : vector<16x128xbf16>, vector<128x128xbf16>, vector<16x128xf32> -> vector<16x128xf32>
    %101 = arith.addf %78, %100 : vector<16x128xf32>
    %102 = vector.extract_strided_slice %31 {offsets = [0, 1152], sizes = [16, 128], strides = [1, 1]} : vector<16x1536xf32> to vector<16x128xf32>
    %103 = arith.truncf %102 : vector<16x128xf32> to vector<16x128xbf16>
    %104 = vector.extract_strided_slice %31 {offsets = [0, 1280], sizes = [16, 128], strides = [1, 1]} : vector<16x1536xf32> to vector<16x128xf32>
    %105 = arith.truncf %104 : vector<16x128xf32> to vector<16x128xbf16>
    %106 = vector.extract_strided_slice %31 {offsets = [0, 1408], sizes = [16, 128], strides = [1, 1]} : vector<16x1536xf32> to vector<16x128xf32>
    %107 = arith.truncf %106 : vector<16x128xf32> to vector<16x128xbf16>
    %cst_34 = arith.constant dense<0.000000e+00> : vector<16x16xf32>
    %108 = tpu.matmul %103, %105, %cst_34 {dimension_numbers = #tpu.dot_dimension_numbers<[1], [1], [0], [0], [0, 0, 1, 0], [], []>} : vector<16x128xbf16>, vector<16x128xbf16>, vector<16x16xf32> -> vector<16x16xf32>
    %cst_35 = arith.constant dense<0xFF800000> : vector<16xf32>
    %109 = vector.multi_reduction <maximumf>, %108, %cst_35 [1] : vector<16x16xf32> to vector<16xf32>
    %110 = vector.shape_cast %109 : vector<16xf32> to vector<16x1xf32>
    %111 = vector.broadcast %110 : vector<16x1xf32> to vector<16x16xf32>
    %112 = arith.subf %108, %111 : vector<16x16xf32>
    %113 = math.exp %112 : vector<16x16xf32>
    %cst_36 = arith.constant dense<0.000000e+00> : vector<16xf32>
    %114 = vector.multi_reduction <add>, %113, %cst_36 [1] : vector<16x16xf32> to vector<16xf32>
    %115 = vector.shape_cast %114 : vector<16xf32> to vector<16x1xf32>
    %116 = tpu.reciprocal %115 {approx = true} : vector<16x1xf32> -> vector<16x1xf32>
    %117 = vector.broadcast %116 : vector<16x1xf32> to vector<16x16xf32>
    %118 = arith.mulf %113, %117 : vector<16x16xf32>
    %119 = arith.truncf %118 : vector<16x16xf32> to vector<16x16xbf16>
    %cst_37 = arith.constant dense<0.000000e+00> : vector<16x128xf32>
    %120 = tpu.matmul %119, %107, %cst_37 {dimension_numbers = #tpu.dot_dimension_numbers<[1], [0], [0], [1], [0, 0, 1, 1], [], []>} : vector<16x16xbf16>, vector<16x128xbf16>, vector<16x128xf32> -> vector<16x128xf32>
    %121 = arith.truncf %120 : vector<16x128xf32> to vector<16x128xbf16>
    %c384 = arith.constant 384 : index
    %c0_38 = arith.constant 0 : index
    %122 = vector.load %arg6[%c384, %c0_38] : memref<512x128xbf16, #tpu.memory_space<vmem>>, vector<128x128xbf16>
    %cst_39 = arith.constant dense<0.000000e+00> : vector<16x128xf32>
    %123 = tpu.matmul %121, %122, %cst_39 {dimension_numbers = #tpu.dot_dimension_numbers<[1], [0], [0], [1], [0, 0, 1, 1], [], []>} : vector<16x128xbf16>, vector<128x128xbf16>, vector<16x128xf32> -> vector<16x128xf32>
    %124 = arith.addf %101, %123 : vector<16x128xf32>
    %125 = arith.addf %1, %124 : vector<16x128xf32>
    %c0_40 = arith.constant 0 : index
    %c0_41 = arith.constant 0 : index
    %126 = vector.load %arg7[%c0_40, %c0_41] : memref<1x128xf32, #tpu.memory_space<vmem>>, vector<1x128xf32>
    %127 = vector.broadcast %126 : vector<1x128xf32> to vector<16x128xf32>
    %128 = arith.addf %125, %127 : vector<16x128xf32>
    %c0_42 = arith.constant 0 : index
    %c0_43 = arith.constant 0 : index
    %129 = vector.load %arg8[%c0_42, %c0_43] : memref<1x128xf32, #tpu.memory_space<vmem>>, vector<1x128xf32>
    %c0_44 = arith.constant 0 : index
    %c0_45 = arith.constant 0 : index
    %130 = vector.load %arg9[%c0_44, %c0_45] : memref<1x128xf32, #tpu.memory_space<vmem>>, vector<1x128xf32>
    %cst_46 = arith.constant dense<0.000000e+00> : vector<16xf32>
    %131 = vector.multi_reduction <add>, %128, %cst_46 [1] : vector<16x128xf32> to vector<16xf32>
    %132 = vector.shape_cast %131 : vector<16xf32> to vector<16x1xf32>
    %cst_47 = arith.constant 1.280000e+02 : f32
    %133 = vector.broadcast %cst_47 : f32 to vector<16x1xf32>
    %134 = arith.divf %132, %133 : vector<16x1xf32>
    %135 = vector.broadcast %134 : vector<16x1xf32> to vector<16x128xf32>
    %136 = arith.subf %128, %135 : vector<16x128xf32>
    %137 = arith.mulf %136, %136 : vector<16x128xf32>
    %cst_48 = arith.constant dense<0.000000e+00> : vector<16xf32>
    %138 = vector.multi_reduction <add>, %137, %cst_48 [1] : vector<16x128xf32> to vector<16xf32>
    %139 = vector.shape_cast %138 : vector<16xf32> to vector<16x1xf32>
    %cst_49 = arith.constant 1.280000e+02 : f32
    %140 = vector.broadcast %cst_49 : f32 to vector<16x1xf32>
    %141 = arith.divf %139, %140 : vector<16x1xf32>
    %142 = vector.broadcast %134 : vector<16x1xf32> to vector<16x128xf32>
    %143 = arith.subf %128, %142 : vector<16x128xf32>
    %cst_50 = arith.constant 9.99999997E-7 : f32
    %144 = vector.broadcast %cst_50 : f32 to vector<16x1xf32>
    %145 = arith.addf %141, %144 : vector<16x1xf32>
    %146 = math.rsqrt %145 : vector<16x1xf32>
    %147 = vector.broadcast %146 : vector<16x1xf32> to vector<16x128xf32>
    %148 = arith.mulf %143, %147 : vector<16x128xf32>
    %149 = vector.broadcast %129 : vector<1x128xf32> to vector<16x128xf32>
    %150 = arith.mulf %148, %149 : vector<16x128xf32>
    %151 = vector.broadcast %130 : vector<1x128xf32> to vector<16x128xf32>
    %152 = arith.addf %150, %151 : vector<16x128xf32>
    %153 = arith.truncf %152 : vector<16x128xf32> to vector<16x128xbf16>
    %c0_51 = arith.constant 0 : index
    %c0_52 = arith.constant 0 : index
    %154 = vector.load %arg10[%c0_51, %c0_52] : memref<128x256xbf16, #tpu.memory_space<vmem>>, vector<128x256xbf16>
    %cst_53 = arith.constant dense<0.000000e+00> : vector<16x256xf32>
    %155 = tpu.matmul %153, %154, %cst_53 {dimension_numbers = #tpu.dot_dimension_numbers<[1], [0], [0], [1], [0, 0, 1, 1], [], []>} : vector<16x128xbf16>, vector<128x256xbf16>, vector<16x256xf32> -> vector<16x256xf32>
    %c0_54 = arith.constant 0 : index
    %c0_55 = arith.constant 0 : index
    %156 = vector.load %arg11[%c0_54, %c0_55] : memref<1x256xf32, #tpu.memory_space<vmem>>, vector<1x256xf32>
    %157 = vector.broadcast %156 : vector<1x256xf32> to vector<16x256xf32>
    %158 = arith.addf %155, %157 : vector<16x256xf32>
    %159 = arith.mulf %158, %158 : vector<16x256xf32>
    %160 = arith.mulf %158, %159 : vector<16x256xf32>
    %cst_56 = arith.constant 4.471500e-02 : f32
    %161 = vector.broadcast %cst_56 : f32 to vector<16x256xf32>
    %162 = arith.mulf %161, %160 : vector<16x256xf32>
    %163 = arith.addf %158, %162 : vector<16x256xf32>
    %cst_57 = arith.constant 0.797884583 : f32
    %164 = vector.broadcast %cst_57 : f32 to vector<16x256xf32>
    %165 = arith.mulf %164, %163 : vector<16x256xf32>
    %166 = math.tanh %165 : vector<16x256xf32>
    %cst_58 = arith.constant 1.000000e+00 : f32
    %167 = vector.broadcast %cst_58 : f32 to vector<16x256xf32>
    %168 = arith.addf %167, %166 : vector<16x256xf32>
    %cst_59 = arith.constant 5.000000e-01 : f32
    %169 = vector.broadcast %cst_59 : f32 to vector<16x256xf32>
    %170 = arith.mulf %169, %168 : vector<16x256xf32>
    %171 = arith.mulf %158, %170 : vector<16x256xf32>
    %172 = arith.truncf %171 : vector<16x256xf32> to vector<16x256xbf16>
    %c0_60 = arith.constant 0 : index
    %c0_61 = arith.constant 0 : index
    %173 = vector.load %arg12[%c0_60, %c0_61] : memref<256x128xbf16, #tpu.memory_space<vmem>>, vector<256x128xbf16>
    %cst_62 = arith.constant dense<0.000000e+00> : vector<16x128xf32>
    %174 = tpu.matmul %172, %173, %cst_62 {dimension_numbers = #tpu.dot_dimension_numbers<[1], [0], [0], [1], [0, 0, 1, 1], [], []>} : vector<16x256xbf16>, vector<256x128xbf16>, vector<16x128xf32> -> vector<16x128xf32>
    %c0_63 = arith.constant 0 : index
    %c0_64 = arith.constant 0 : index
    %175 = vector.load %arg13[%c0_63, %c0_64] : memref<1x128xf32, #tpu.memory_space<vmem>>, vector<1x128xf32>
    %176 = vector.broadcast %175 : vector<1x128xf32> to vector<16x128xf32>
    %177 = arith.addf %174, %176 : vector<16x128xf32>
    %178 = arith.addf %128, %177 : vector<16x128xf32>
    %179 = arith.truncf %178 : vector<16x128xf32> to vector<16x128xbf16>
    %c0_65 = arith.constant 0 : index
    %c0_66 = arith.constant 0 : index
    %180 = vector.load %arg14[%c0_65, %c0_66] : memref<16x128xbf16, #tpu.memory_space<vmem>>, vector<16x128xbf16>
    tpu.vector_store %arg14[%c0_65, %c0_66], %179 {strides = array<i32>} : memref<16x128xbf16, #tpu.memory_space<vmem>>, vector<16x128xbf16>,
    return
  }
  func.func @transform_0(%arg0: i32) -> (i32, i32) {
    %c0_i32 = arith.constant 0 : i32
    %c0_i32_0 = arith.constant 0 : i32
    return %arg0, %c0_i32 : i32, i32
  }
  func.func @transform_1(%arg0: i32) -> (i32, i32) {
    %c0_i32 = arith.constant 0 : i32
    %c0_i32_0 = arith.constant 0 : i32
    %c0_i32_1 = arith.constant 0 : i32
    return %c0_i32, %c0_i32_0 : i32, i32
  }
  func.func @transform_2(%arg0: i32) -> (i32, i32) {
    %c0_i32 = arith.constant 0 : i32
    %c0_i32_0 = arith.constant 0 : i32
    %c0_i32_1 = arith.constant 0 : i32
    return %c0_i32, %c0_i32_0 : i32, i32
  }
  func.func @transform_3(%arg0: i32) -> (i32, i32) {
    %c0_i32 = arith.constant 0 : i32
    %c0_i32_0 = arith.constant 0 : i32
    %c0_i32_1 = arith.constant 0 : i32
    return %c0_i32, %c0_i32_0 : i32, i32
  }
  func.func @transform_4(%arg0: i32) -> (i32, i32) {
    %c0_i32 = arith.constant 0 : i32
    %c0_i32_0 = arith.constant 0 : i32
    %c0_i32_1 = arith.constant 0 : i32
    return %c0_i32, %c0_i32_0 : i32, i32
  }
  func.func @transform_5(%arg0: i32) -> (i32, i32) {
    %c0_i32 = arith.constant 0 : i32
    %c0_i32_0 = arith.constant 0 : i32
    %c0_i32_1 = arith.constant 0 : i32
    return %c0_i32, %c0_i32_0 : i32, i32
  }
  func.func @transform_6(%arg0: i32) -> (i32, i32) {
    %c0_i32 = arith.constant 0 : i32
    %c0_i32_0 = arith.constant 0 : i32
    %c0_i32_1 = arith.constant 0 : i32
    return %c0_i32, %c0_i32_0 : i32, i32
  }
  func.func @transform_7(%arg0: i32) -> (i32, i32) {
    %c0_i32 = arith.constant 0 : i32
    %c0_i32_0 = arith.constant 0 : i32
    %c0_i32_1 = arith.constant 0 : i32
    return %c0_i32, %c0_i32_0 : i32, i32
  }
  func.func @transform_8(%arg0: i32) -> (i32, i32) {
    %c0_i32 = arith.constant 0 : i32
    %c0_i32_0 = arith.constant 0 : i32
    %c0_i32_1 = arith.constant 0 : i32
    return %c0_i32, %c0_i32_0 : i32, i32
  }
  func.func @transform_9(%arg0: i32) -> (i32, i32) {
    %c0_i32 = arith.constant 0 : i32
    %c0_i32_0 = arith.constant 0 : i32
    %c0_i32_1 = arith.constant 0 : i32
    return %c0_i32, %c0_i32_0 : i32, i32
  }
  func.func @transform_10(%arg0: i32) -> (i32, i32) {
    %c0_i32 = arith.constant 0 : i32
    %c0_i32_0 = arith.constant 0 : i32
    %c0_i32_1 = arith.constant 0 : i32
    return %c0_i32, %c0_i32_0 : i32, i32
  }
  func.func @transform_11(%arg0: i32) -> (i32, i32) {
    %c0_i32 = arith.constant 0 : i32
    %c0_i32_0 = arith.constant 0 : i32
    %c0_i32_1 = arith.constant 0 : i32
    return %c0_i32, %c0_i32_0 : i32, i32
  }
  func.func @transform_12(%arg0: i32) -> (i32, i32) {
    %c0_i32 = arith.constant 0 : i32
    %c0_i32_0 = arith.constant 0 : i32
    %c0_i32_1 = arith.constant 0 : i32
    return %c0_i32, %c0_i32_0 : i32, i32
  }
  func.func @transform_13(%arg0: i32) -> (i32, i32) {
    %c0_i32 = arith.constant 0 : i32
    %c0_i32_0 = arith.constant 0 : i32
    return %arg0, %c0_i32 : i32, i32
  }
}

module attributes {stable_mosaic.version = 11 : i64} {
  func.func @_block_kernel(%arg0: i32, %arg1: memref<16x128xbf16, #tpu.memory_space<vmem>>, %arg2: memref<1x128xf32, #tpu.memory_space<vmem>>, %arg3: memref<1x128xf32, #tpu.memory_space<vmem>>, %arg4: memref<128x1536xbf16, #tpu.memory_space<vmem>>, %arg5: memref<1x1536xf32, #tpu.memory_space<vmem>>, %arg6: memref<512x128xbf16, #tpu.memory_space<vmem>>, %arg7: memref<1x128xf32, #tpu.memory_space<vmem>>, %arg8: memref<1x128xf32, #tpu.memory_space<vmem>>, %arg9: memref<1x128xf32, #tpu.memory_space<vmem>>, %arg10: memref<128x256xbf16, #tpu.memory_space<vmem>>, %arg11: memref<1x256xf32, #tpu.memory_space<vmem>>, %arg12: memref<256x128xbf16, #tpu.memory_space<vmem>>, %arg13: memref<1x128xf32, #tpu.memory_space<vmem>>, %arg14: memref<1x1x128xf32, #tpu.memory_space<vmem>>) attributes {dimension_semantics = [#tpu.dimension_semantics<parallel>], iteration_bounds = array<i64: 2>, scalar_prefetch = 0 : i64, scratch_operands = 0 : i64, tpu.core_type = #tpu.core_type<tc>, window_params = [{transform_indices = @transform_0, window_bounds = array<i64: 16, 128>}, {pipeline_mode = #tpu.pipeline_mode<synchronous>, transform_indices = @transform_1, window_bounds = array<i64: 1, 128>}, {pipeline_mode = #tpu.pipeline_mode<synchronous>, transform_indices = @transform_2, window_bounds = array<i64: 1, 128>}, {pipeline_mode = #tpu.pipeline_mode<synchronous>, transform_indices = @transform_3, window_bounds = array<i64: 128, 1536>}, {pipeline_mode = #tpu.pipeline_mode<synchronous>, transform_indices = @transform_4, window_bounds = array<i64: 1, 1536>}, {pipeline_mode = #tpu.pipeline_mode<synchronous>, transform_indices = @transform_5, window_bounds = array<i64: 512, 128>}, {pipeline_mode = #tpu.pipeline_mode<synchronous>, transform_indices = @transform_6, window_bounds = array<i64: 1, 128>}, {pipeline_mode = #tpu.pipeline_mode<synchronous>, transform_indices = @transform_7, window_bounds = array<i64: 1, 128>}, {pipeline_mode = #tpu.pipeline_mode<synchronous>, transform_indices = @transform_8, window_bounds = array<i64: 1, 128>}, {pipeline_mode = #tpu.pipeline_mode<synchronous>, transform_indices = @transform_9, window_bounds = array<i64: 128, 256>}, {pipeline_mode = #tpu.pipeline_mode<synchronous>, transform_indices = @transform_10, window_bounds = array<i64: 1, 256>}, {pipeline_mode = #tpu.pipeline_mode<synchronous>, transform_indices = @transform_11, window_bounds = array<i64: 256, 128>}, {pipeline_mode = #tpu.pipeline_mode<synchronous>, transform_indices = @transform_12, window_bounds = array<i64: 1, 128>}, {transform_indices = @transform_13, window_bounds = array<i64: 1, 1, 128>}]} {
    %c0 = arith.constant 0 : index
    %c0_0 = arith.constant 0 : index
    %0 = vector.load %arg1[%c0, %c0_0] : memref<16x128xbf16, #tpu.memory_space<vmem>>, vector<16x128xbf16>
    %1 = arith.extf %0 : vector<16x128xbf16> to vector<16x128xf32>
    %c0_1 = arith.constant 0 : index
    %c0_2 = arith.constant 0 : index
    %2 = vector.load %arg2[%c0_1, %c0_2] : memref<1x128xf32, #tpu.memory_space<vmem>>, vector<1x128xf32>
    %c0_3 = arith.constant 0 : index
    %c0_4 = arith.constant 0 : index
    %3 = vector.load %arg3[%c0_3, %c0_4] : memref<1x128xf32, #tpu.memory_space<vmem>>, vector<1x128xf32>
    %cst = arith.constant dense<0.000000e+00> : vector<16xf32>
    %4 = vector.multi_reduction <add>, %1, %cst [1] : vector<16x128xf32> to vector<16xf32>
    %5 = vector.shape_cast %4 : vector<16xf32> to vector<16x1xf32>
    %cst_5 = arith.constant 1.280000e+02 : f32
    %6 = vector.broadcast %cst_5 : f32 to vector<16x1xf32>
    %7 = arith.divf %5, %6 : vector<16x1xf32>
    %8 = vector.broadcast %7 : vector<16x1xf32> to vector<16x128xf32>
    %9 = arith.subf %1, %8 : vector<16x128xf32>
    %10 = arith.mulf %9, %9 : vector<16x128xf32>
    %cst_6 = arith.constant dense<0.000000e+00> : vector<16xf32>
    %11 = vector.multi_reduction <add>, %10, %cst_6 [1] : vector<16x128xf32> to vector<16xf32>
    %12 = vector.shape_cast %11 : vector<16xf32> to vector<16x1xf32>
    %cst_7 = arith.constant 1.280000e+02 : f32
    %13 = vector.broadcast %cst_7 : f32 to vector<16x1xf32>
    %14 = arith.divf %12, %13 : vector<16x1xf32>
    %15 = vector.broadcast %7 : vector<16x1xf32> to vector<16x128xf32>
    %16 = arith.subf %1, %15 : vector<16x128xf32>
    %cst_8 = arith.constant 9.99999997E-7 : f32
    %17 = vector.broadcast %cst_8 : f32 to vector<16x1xf32>
    %18 = arith.addf %14, %17 : vector<16x1xf32>
    %19 = math.rsqrt %18 : vector<16x1xf32>
    %20 = vector.broadcast %19 : vector<16x1xf32> to vector<16x128xf32>
    %21 = arith.mulf %16, %20 : vector<16x128xf32>
    %22 = vector.broadcast %2 : vector<1x128xf32> to vector<16x128xf32>
    %23 = arith.mulf %21, %22 : vector<16x128xf32>
    %24 = vector.broadcast %3 : vector<1x128xf32> to vector<16x128xf32>
    %25 = arith.addf %23, %24 : vector<16x128xf32>
    %26 = arith.truncf %25 : vector<16x128xf32> to vector<16x128xbf16>
    %c0_9 = arith.constant 0 : index
    %c0_10 = arith.constant 0 : index
    %27 = vector.load %arg4[%c0_9, %c0_10] : memref<128x1536xbf16, #tpu.memory_space<vmem>>, vector<128x1536xbf16>
    %cst_11 = arith.constant dense<0.000000e+00> : vector<16x1536xf32>
    %28 = tpu.matmul %26, %27, %cst_11 {dimension_numbers = #tpu.dot_dimension_numbers<[1], [0], [0], [1], [0, 0, 1, 1], [], []>} : vector<16x128xbf16>, vector<128x1536xbf16>, vector<16x1536xf32> -> vector<16x1536xf32>
    %c0_12 = arith.constant 0 : index
    %c0_13 = arith.constant 0 : index
    %29 = vector.load %arg5[%c0_12, %c0_13] : memref<1x1536xf32, #tpu.memory_space<vmem>>, vector<1x1536xf32>
    %30 = vector.broadcast %29 : vector<1x1536xf32> to vector<16x1536xf32>
    %31 = arith.addf %28, %30 : vector<16x1536xf32>
    %cst_14 = arith.constant 0.000000e+00 : f32
    %32 = vector.broadcast %cst_14 : f32 to vector<16x128xf32>
    %33 = vector.extract_strided_slice %31 {offsets = [0, 0], sizes = [16, 128], strides = [1, 1]} : vector<16x1536xf32> to vector<16x128xf32>
    %34 = arith.truncf %33 : vector<16x128xf32> to vector<16x128xbf16>
    %35 = vector.extract_strided_slice %31 {offsets = [0, 128], sizes = [16, 128], strides = [1, 1]} : vector<16x1536xf32> to vector<16x128xf32>
    %36 = arith.truncf %35 : vector<16x128xf32> to vector<16x128xbf16>
    %37 = vector.extract_strided_slice %31 {offsets = [0, 256], sizes = [16, 128], strides = [1, 1]} : vector<16x1536xf32> to vector<16x128xf32>
    %38 = arith.truncf %37 : vector<16x128xf32> to vector<16x128xbf16>
    %cst_15 = arith.constant dense<0.000000e+00> : vector<16x16xf32>
    %39 = tpu.matmul %34, %36, %cst_15 {dimension_numbers = #tpu.dot_dimension_numbers<[1], [1], [0], [0], [0, 0, 1, 0], [], []>} : vector<16x128xbf16>, vector<16x128xbf16>, vector<16x16xf32> -> vector<16x16xf32>
    %cst_16 = arith.constant dense<0xFF800000> : vector<16xf32>
    %40 = vector.multi_reduction <maximumf>, %39, %cst_16 [1] : vector<16x16xf32> to vector<16xf32>
    %41 = vector.shape_cast %40 : vector<16xf32> to vector<16x1xf32>
    %42 = vector.broadcast %41 : vector<16x1xf32> to vector<16x16xf32>
    %43 = arith.subf %39, %42 : vector<16x16xf32>
    %44 = math.exp %43 : vector<16x16xf32>
    %cst_17 = arith.constant dense<0.000000e+00> : vector<16xf32>
    %45 = vector.multi_reduction <add>, %44, %cst_17 [1] : vector<16x16xf32> to vector<16xf32>
    %46 = vector.shape_cast %45 : vector<16xf32> to vector<16x1xf32>
    %47 = tpu.reciprocal %46 {approx = true} : vector<16x1xf32> -> vector<16x1xf32>
    %48 = vector.broadcast %47 : vector<16x1xf32> to vector<16x16xf32>
    %49 = arith.mulf %44, %48 : vector<16x16xf32>
    %50 = arith.truncf %49 : vector<16x16xf32> to vector<16x16xbf16>
    %cst_18 = arith.constant dense<0.000000e+00> : vector<16x128xf32>
    %51 = tpu.matmul %50, %38, %cst_18 {dimension_numbers = #tpu.dot_dimension_numbers<[1], [0], [0], [1], [0, 0, 1, 1], [], []>} : vector<16x16xbf16>, vector<16x128xbf16>, vector<16x128xf32> -> vector<16x128xf32>
    %52 = arith.truncf %51 : vector<16x128xf32> to vector<16x128xbf16>
    %c0_19 = arith.constant 0 : index
    %c0_20 = arith.constant 0 : index
    %53 = vector.load %arg6[%c0_19, %c0_20] : memref<512x128xbf16, #tpu.memory_space<vmem>>, vector<128x128xbf16>
    %cst_21 = arith.constant dense<0.000000e+00> : vector<16x128xf32>
    %54 = tpu.matmul %52, %53, %cst_21 {dimension_numbers = #tpu.dot_dimension_numbers<[1], [0], [0], [1], [0, 0, 1, 1], [], []>} : vector<16x128xbf16>, vector<128x128xbf16>, vector<16x128xf32> -> vector<16x128xf32>
    %55 = arith.addf %32, %54 : vector<16x128xf32>
    %56 = vector.extract_strided_slice %31 {offsets = [0, 384], sizes = [16, 128], strides = [1, 1]} : vector<16x1536xf32> to vector<16x128xf32>
    %57 = arith.truncf %56 : vector<16x128xf32> to vector<16x128xbf16>
    %58 = vector.extract_strided_slice %31 {offsets = [0, 512], sizes = [16, 128], strides = [1, 1]} : vector<16x1536xf32> to vector<16x128xf32>
    %59 = arith.truncf %58 : vector<16x128xf32> to vector<16x128xbf16>
    %60 = vector.extract_strided_slice %31 {offsets = [0, 640], sizes = [16, 128], strides = [1, 1]} : vector<16x1536xf32> to vector<16x128xf32>
    %61 = arith.truncf %60 : vector<16x128xf32> to vector<16x128xbf16>
    %cst_22 = arith.constant dense<0.000000e+00> : vector<16x16xf32>
    %62 = tpu.matmul %57, %59, %cst_22 {dimension_numbers = #tpu.dot_dimension_numbers<[1], [1], [0], [0], [0, 0, 1, 0], [], []>} : vector<16x128xbf16>, vector<16x128xbf16>, vector<16x16xf32> -> vector<16x16xf32>
    %cst_23 = arith.constant dense<0xFF800000> : vector<16xf32>
    %63 = vector.multi_reduction <maximumf>, %62, %cst_23 [1] : vector<16x16xf32> to vector<16xf32>
    %64 = vector.shape_cast %63 : vector<16xf32> to vector<16x1xf32>
    %65 = vector.broadcast %64 : vector<16x1xf32> to vector<16x16xf32>
    %66 = arith.subf %62, %65 : vector<16x16xf32>
    %67 = math.exp %66 : vector<16x16xf32>
    %cst_24 = arith.constant dense<0.000000e+00> : vector<16xf32>
    %68 = vector.multi_reduction <add>, %67, %cst_24 [1] : vector<16x16xf32> to vector<16xf32>
    %69 = vector.shape_cast %68 : vector<16xf32> to vector<16x1xf32>
    %70 = tpu.reciprocal %69 {approx = true} : vector<16x1xf32> -> vector<16x1xf32>
    %71 = vector.broadcast %70 : vector<16x1xf32> to vector<16x16xf32>
    %72 = arith.mulf %67, %71 : vector<16x16xf32>
    %73 = arith.truncf %72 : vector<16x16xf32> to vector<16x16xbf16>
    %cst_25 = arith.constant dense<0.000000e+00> : vector<16x128xf32>
    %74 = tpu.matmul %73, %61, %cst_25 {dimension_numbers = #tpu.dot_dimension_numbers<[1], [0], [0], [1], [0, 0, 1, 1], [], []>} : vector<16x16xbf16>, vector<16x128xbf16>, vector<16x128xf32> -> vector<16x128xf32>
    %75 = arith.truncf %74 : vector<16x128xf32> to vector<16x128xbf16>
    %c128 = arith.constant 128 : index
    %c0_26 = arith.constant 0 : index
    %76 = vector.load %arg6[%c128, %c0_26] : memref<512x128xbf16, #tpu.memory_space<vmem>>, vector<128x128xbf16>
    %cst_27 = arith.constant dense<0.000000e+00> : vector<16x128xf32>
    %77 = tpu.matmul %75, %76, %cst_27 {dimension_numbers = #tpu.dot_dimension_numbers<[1], [0], [0], [1], [0, 0, 1, 1], [], []>} : vector<16x128xbf16>, vector<128x128xbf16>, vector<16x128xf32> -> vector<16x128xf32>
    %78 = arith.addf %55, %77 : vector<16x128xf32>
    %79 = vector.extract_strided_slice %31 {offsets = [0, 768], sizes = [16, 128], strides = [1, 1]} : vector<16x1536xf32> to vector<16x128xf32>
    %80 = arith.truncf %79 : vector<16x128xf32> to vector<16x128xbf16>
    %81 = vector.extract_strided_slice %31 {offsets = [0, 896], sizes = [16, 128], strides = [1, 1]} : vector<16x1536xf32> to vector<16x128xf32>
    %82 = arith.truncf %81 : vector<16x128xf32> to vector<16x128xbf16>
    %83 = vector.extract_strided_slice %31 {offsets = [0, 1024], sizes = [16, 128], strides = [1, 1]} : vector<16x1536xf32> to vector<16x128xf32>
    %84 = arith.truncf %83 : vector<16x128xf32> to vector<16x128xbf16>
    %cst_28 = arith.constant dense<0.000000e+00> : vector<16x16xf32>
    %85 = tpu.matmul %80, %82, %cst_28 {dimension_numbers = #tpu.dot_dimension_numbers<[1], [1], [0], [0], [0, 0, 1, 0], [], []>} : vector<16x128xbf16>, vector<16x128xbf16>, vector<16x16xf32> -> vector<16x16xf32>
    %cst_29 = arith.constant dense<0xFF800000> : vector<16xf32>
    %86 = vector.multi_reduction <maximumf>, %85, %cst_29 [1] : vector<16x16xf32> to vector<16xf32>
    %87 = vector.shape_cast %86 : vector<16xf32> to vector<16x1xf32>
    %88 = vector.broadcast %87 : vector<16x1xf32> to vector<16x16xf32>
    %89 = arith.subf %85, %88 : vector<16x16xf32>
    %90 = math.exp %89 : vector<16x16xf32>
    %cst_30 = arith.constant dense<0.000000e+00> : vector<16xf32>
    %91 = vector.multi_reduction <add>, %90, %cst_30 [1] : vector<16x16xf32> to vector<16xf32>
    %92 = vector.shape_cast %91 : vector<16xf32> to vector<16x1xf32>
    %93 = tpu.reciprocal %92 {approx = true} : vector<16x1xf32> -> vector<16x1xf32>
    %94 = vector.broadcast %93 : vector<16x1xf32> to vector<16x16xf32>
    %95 = arith.mulf %90, %94 : vector<16x16xf32>
    %96 = arith.truncf %95 : vector<16x16xf32> to vector<16x16xbf16>
    %cst_31 = arith.constant dense<0.000000e+00> : vector<16x128xf32>
    %97 = tpu.matmul %96, %84, %cst_31 {dimension_numbers = #tpu.dot_dimension_numbers<[1], [0], [0], [1], [0, 0, 1, 1], [], []>} : vector<16x16xbf16>, vector<16x128xbf16>, vector<16x128xf32> -> vector<16x128xf32>
    %98 = arith.truncf %97 : vector<16x128xf32> to vector<16x128xbf16>
    %c256 = arith.constant 256 : index
    %c0_32 = arith.constant 0 : index
    %99 = vector.load %arg6[%c256, %c0_32] : memref<512x128xbf16, #tpu.memory_space<vmem>>, vector<128x128xbf16>
    %cst_33 = arith.constant dense<0.000000e+00> : vector<16x128xf32>
    %100 = tpu.matmul %98, %99, %cst_33 {dimension_numbers = #tpu.dot_dimension_numbers<[1], [0], [0], [1], [0, 0, 1, 1], [], []>} : vector<16x128xbf16>, vector<128x128xbf16>, vector<16x128xf32> -> vector<16x128xf32>
    %101 = arith.addf %78, %100 : vector<16x128xf32>
    %102 = vector.extract_strided_slice %31 {offsets = [0, 1152], sizes = [16, 128], strides = [1, 1]} : vector<16x1536xf32> to vector<16x128xf32>
    %103 = arith.truncf %102 : vector<16x128xf32> to vector<16x128xbf16>
    %104 = vector.extract_strided_slice %31 {offsets = [0, 1280], sizes = [16, 128], strides = [1, 1]} : vector<16x1536xf32> to vector<16x128xf32>
    %105 = arith.truncf %104 : vector<16x128xf32> to vector<16x128xbf16>
    %106 = vector.extract_strided_slice %31 {offsets = [0, 1408], sizes = [16, 128], strides = [1, 1]} : vector<16x1536xf32> to vector<16x128xf32>
    %107 = arith.truncf %106 : vector<16x128xf32> to vector<16x128xbf16>
    %cst_34 = arith.constant dense<0.000000e+00> : vector<16x16xf32>
    %108 = tpu.matmul %103, %105, %cst_34 {dimension_numbers = #tpu.dot_dimension_numbers<[1], [1], [0], [0], [0, 0, 1, 0], [], []>} : vector<16x128xbf16>, vector<16x128xbf16>, vector<16x16xf32> -> vector<16x16xf32>
    %cst_35 = arith.constant dense<0xFF800000> : vector<16xf32>
    %109 = vector.multi_reduction <maximumf>, %108, %cst_35 [1] : vector<16x16xf32> to vector<16xf32>
    %110 = vector.shape_cast %109 : vector<16xf32> to vector<16x1xf32>
    %111 = vector.broadcast %110 : vector<16x1xf32> to vector<16x16xf32>
    %112 = arith.subf %108, %111 : vector<16x16xf32>
    %113 = math.exp %112 : vector<16x16xf32>
    %cst_36 = arith.constant dense<0.000000e+00> : vector<16xf32>
    %114 = vector.multi_reduction <add>, %113, %cst_36 [1] : vector<16x16xf32> to vector<16xf32>
    %115 = vector.shape_cast %114 : vector<16xf32> to vector<16x1xf32>
    %116 = tpu.reciprocal %115 {approx = true} : vector<16x1xf32> -> vector<16x1xf32>
    %117 = vector.broadcast %116 : vector<16x1xf32> to vector<16x16xf32>
    %118 = arith.mulf %113, %117 : vector<16x16xf32>
    %119 = arith.truncf %118 : vector<16x16xf32> to vector<16x16xbf16>
    %cst_37 = arith.constant dense<0.000000e+00> : vector<16x128xf32>
    %120 = tpu.matmul %119, %107, %cst_37 {dimension_numbers = #tpu.dot_dimension_numbers<[1], [0], [0], [1], [0, 0, 1, 1], [], []>} : vector<16x16xbf16>, vector<16x128xbf16>, vector<16x128xf32> -> vector<16x128xf32>
    %121 = arith.truncf %120 : vector<16x128xf32> to vector<16x128xbf16>
    %c384 = arith.constant 384 : index
    %c0_38 = arith.constant 0 : index
    %122 = vector.load %arg6[%c384, %c0_38] : memref<512x128xbf16, #tpu.memory_space<vmem>>, vector<128x128xbf16>
    %cst_39 = arith.constant dense<0.000000e+00> : vector<16x128xf32>
    %123 = tpu.matmul %121, %122, %cst_39 {dimension_numbers = #tpu.dot_dimension_numbers<[1], [0], [0], [1], [0, 0, 1, 1], [], []>} : vector<16x128xbf16>, vector<128x128xbf16>, vector<16x128xf32> -> vector<16x128xf32>
    %124 = arith.addf %101, %123 : vector<16x128xf32>
    %125 = arith.addf %1, %124 : vector<16x128xf32>
    %c0_40 = arith.constant 0 : index
    %c0_41 = arith.constant 0 : index
    %126 = vector.load %arg7[%c0_40, %c0_41] : memref<1x128xf32, #tpu.memory_space<vmem>>, vector<1x128xf32>
    %127 = vector.broadcast %126 : vector<1x128xf32> to vector<16x128xf32>
    %128 = arith.addf %125, %127 : vector<16x128xf32>
    %c0_42 = arith.constant 0 : index
    %c0_43 = arith.constant 0 : index
    %129 = vector.load %arg8[%c0_42, %c0_43] : memref<1x128xf32, #tpu.memory_space<vmem>>, vector<1x128xf32>
    %c0_44 = arith.constant 0 : index
    %c0_45 = arith.constant 0 : index
    %130 = vector.load %arg9[%c0_44, %c0_45] : memref<1x128xf32, #tpu.memory_space<vmem>>, vector<1x128xf32>
    %cst_46 = arith.constant dense<0.000000e+00> : vector<16xf32>
    %131 = vector.multi_reduction <add>, %128, %cst_46 [1] : vector<16x128xf32> to vector<16xf32>
    %132 = vector.shape_cast %131 : vector<16xf32> to vector<16x1xf32>
    %cst_47 = arith.constant 1.280000e+02 : f32
    %133 = vector.broadcast %cst_47 : f32 to vector<16x1xf32>
    %134 = arith.divf %132, %133 : vector<16x1xf32>
    %135 = vector.broadcast %134 : vector<16x1xf32> to vector<16x128xf32>
    %136 = arith.subf %128, %135 : vector<16x128xf32>
    %137 = arith.mulf %136, %136 : vector<16x128xf32>
    %cst_48 = arith.constant dense<0.000000e+00> : vector<16xf32>
    %138 = vector.multi_reduction <add>, %137, %cst_48 [1] : vector<16x128xf32> to vector<16xf32>
    %139 = vector.shape_cast %138 : vector<16xf32> to vector<16x1xf32>
    %cst_49 = arith.constant 1.280000e+02 : f32
    %140 = vector.broadcast %cst_49 : f32 to vector<16x1xf32>
    %141 = arith.divf %139, %140 : vector<16x1xf32>
    %142 = vector.broadcast %134 : vector<16x1xf32> to vector<16x128xf32>
    %143 = arith.subf %128, %142 : vector<16x128xf32>
    %cst_50 = arith.constant 9.99999997E-7 : f32
    %144 = vector.broadcast %cst_50 : f32 to vector<16x1xf32>
    %145 = arith.addf %141, %144 : vector<16x1xf32>
    %146 = math.rsqrt %145 : vector<16x1xf32>
    %147 = vector.broadcast %146 : vector<16x1xf32> to vector<16x128xf32>
    %148 = arith.mulf %143, %147 : vector<16x128xf32>
    %149 = vector.broadcast %129 : vector<1x128xf32> to vector<16x128xf32>
    %150 = arith.mulf %148, %149 : vector<16x128xf32>
    %151 = vector.broadcast %130 : vector<1x128xf32> to vector<16x128xf32>
    %152 = arith.addf %150, %151 : vector<16x128xf32>
    %153 = arith.truncf %152 : vector<16x128xf32> to vector<16x128xbf16>
    %c0_51 = arith.constant 0 : index
    %c0_52 = arith.constant 0 : index
    %154 = vector.load %arg10[%c0_51, %c0_52] : memref<128x256xbf16, #tpu.memory_space<vmem>>, vector<128x256xbf16>
    %cst_53 = arith.constant dense<0.000000e+00> : vector<16x256xf32>
    %155 = tpu.matmul %153, %154, %cst_53 {dimension_numbers = #tpu.dot_dimension_numbers<[1], [0], [0], [1], [0, 0, 1, 1], [], []>} : vector<16x128xbf16>, vector<128x256xbf16>, vector<16x256xf32> -> vector<16x256xf32>
    %c0_54 = arith.constant 0 : index
    %c0_55 = arith.constant 0 : index
    %156 = vector.load %arg11[%c0_54, %c0_55] : memref<1x256xf32, #tpu.memory_space<vmem>>, vector<1x256xf32>
    %157 = vector.broadcast %156 : vector<1x256xf32> to vector<16x256xf32>
    %158 = arith.addf %155, %157 : vector<16x256xf32>
    %159 = arith.mulf %158, %158 : vector<16x256xf32>
    %160 = arith.mulf %158, %159 : vector<16x256xf32>
    %cst_56 = arith.constant 4.471500e-02 : f32
    %161 = vector.broadcast %cst_56 : f32 to vector<16x256xf32>
    %162 = arith.mulf %161, %160 : vector<16x256xf32>
    %163 = arith.addf %158, %162 : vector<16x256xf32>
    %cst_57 = arith.constant 0.797884583 : f32
    %164 = vector.broadcast %cst_57 : f32 to vector<16x256xf32>
    %165 = arith.mulf %164, %163 : vector<16x256xf32>
    %166 = math.tanh %165 : vector<16x256xf32>
    %cst_58 = arith.constant 1.000000e+00 : f32
    %167 = vector.broadcast %cst_58 : f32 to vector<16x256xf32>
    %168 = arith.addf %167, %166 : vector<16x256xf32>
    %cst_59 = arith.constant 5.000000e-01 : f32
    %169 = vector.broadcast %cst_59 : f32 to vector<16x256xf32>
    %170 = arith.mulf %169, %168 : vector<16x256xf32>
    %171 = arith.mulf %158, %170 : vector<16x256xf32>
    %172 = arith.truncf %171 : vector<16x256xf32> to vector<16x256xbf16>
    %c0_60 = arith.constant 0 : index
    %c0_61 = arith.constant 0 : index
    %173 = vector.load %arg12[%c0_60, %c0_61] : memref<256x128xbf16, #tpu.memory_space<vmem>>, vector<256x128xbf16>
    %cst_62 = arith.constant dense<0.000000e+00> : vector<16x128xf32>
    %174 = tpu.matmul %172, %173, %cst_62 {dimension_numbers = #tpu.dot_dimension_numbers<[1], [0], [0], [1], [0, 0, 1, 1], [], []>} : vector<16x256xbf16>, vector<256x128xbf16>, vector<16x128xf32> -> vector<16x128xf32>
    %c0_63 = arith.constant 0 : index
    %c0_64 = arith.constant 0 : index
    %175 = vector.load %arg13[%c0_63, %c0_64] : memref<1x128xf32, #tpu.memory_space<vmem>>, vector<1x128xf32>
    %176 = vector.broadcast %175 : vector<1x128xf32> to vector<16x128xf32>
    %177 = arith.addf %174, %176 : vector<16x128xf32>
    %178 = arith.addf %128, %177 : vector<16x128xf32>
    %cst_65 = arith.constant dense<0.000000e+00> : vector<128xf32>
    %179 = vector.multi_reduction <add>, %178, %cst_65 [0] : vector<16x128xf32> to vector<128xf32>
    %180 = vector.shape_cast %179 : vector<128xf32> to vector<1x128xf32>
    %181 = vector.shape_cast %180 : vector<1x128xf32> to vector<1x1x128xf32>
    %c0_66 = arith.constant 0 : index
    %c0_67 = arith.constant 0 : index
    %c0_68 = arith.constant 0 : index
    %182 = vector.load %arg14[%c0_66, %c0_67, %c0_68] : memref<1x1x128xf32, #tpu.memory_space<vmem>>, vector<1x1x128xf32>
    tpu.vector_store %arg14[%c0_66, %c0_67, %c0_68], %181 {strides = array<i32>} : memref<1x1x128xf32, #tpu.memory_space<vmem>>, vector<1x1x128xf32>,
    return
  }
  func.func @transform_0(%arg0: i32) -> (i32, i32) {
    %c0_i32 = arith.constant 0 : i32
    %c0_i32_0 = arith.constant 0 : i32
    return %arg0, %c0_i32 : i32, i32
  }
  func.func @transform_1(%arg0: i32) -> (i32, i32) {
    %c0_i32 = arith.constant 0 : i32
    %c0_i32_0 = arith.constant 0 : i32
    %c0_i32_1 = arith.constant 0 : i32
    return %c0_i32, %c0_i32_0 : i32, i32
  }
  func.func @transform_2(%arg0: i32) -> (i32, i32) {
    %c0_i32 = arith.constant 0 : i32
    %c0_i32_0 = arith.constant 0 : i32
    %c0_i32_1 = arith.constant 0 : i32
    return %c0_i32, %c0_i32_0 : i32, i32
  }
  func.func @transform_3(%arg0: i32) -> (i32, i32) {
    %c0_i32 = arith.constant 0 : i32
    %c0_i32_0 = arith.constant 0 : i32
    %c0_i32_1 = arith.constant 0 : i32
    return %c0_i32, %c0_i32_0 : i32, i32
  }
  func.func @transform_4(%arg0: i32) -> (i32, i32) {
    %c0_i32 = arith.constant 0 : i32
    %c0_i32_0 = arith.constant 0 : i32
    %c0_i32_1 = arith.constant 0 : i32
    return %c0_i32, %c0_i32_0 : i32, i32
  }
  func.func @transform_5(%arg0: i32) -> (i32, i32) {
    %c0_i32 = arith.constant 0 : i32
    %c0_i32_0 = arith.constant 0 : i32
    %c0_i32_1 = arith.constant 0 : i32
    return %c0_i32, %c0_i32_0 : i32, i32
  }
  func.func @transform_6(%arg0: i32) -> (i32, i32) {
    %c0_i32 = arith.constant 0 : i32
    %c0_i32_0 = arith.constant 0 : i32
    %c0_i32_1 = arith.constant 0 : i32
    return %c0_i32, %c0_i32_0 : i32, i32
  }
  func.func @transform_7(%arg0: i32) -> (i32, i32) {
    %c0_i32 = arith.constant 0 : i32
    %c0_i32_0 = arith.constant 0 : i32
    %c0_i32_1 = arith.constant 0 : i32
    return %c0_i32, %c0_i32_0 : i32, i32
  }
  func.func @transform_8(%arg0: i32) -> (i32, i32) {
    %c0_i32 = arith.constant 0 : i32
    %c0_i32_0 = arith.constant 0 : i32
    %c0_i32_1 = arith.constant 0 : i32
    return %c0_i32, %c0_i32_0 : i32, i32
  }
  func.func @transform_9(%arg0: i32) -> (i32, i32) {
    %c0_i32 = arith.constant 0 : i32
    %c0_i32_0 = arith.constant 0 : i32
    %c0_i32_1 = arith.constant 0 : i32
    return %c0_i32, %c0_i32_0 : i32, i32
  }
  func.func @transform_10(%arg0: i32) -> (i32, i32) {
    %c0_i32 = arith.constant 0 : i32
    %c0_i32_0 = arith.constant 0 : i32
    %c0_i32_1 = arith.constant 0 : i32
    return %c0_i32, %c0_i32_0 : i32, i32
  }
  func.func @transform_11(%arg0: i32) -> (i32, i32) {
    %c0_i32 = arith.constant 0 : i32
    %c0_i32_0 = arith.constant 0 : i32
    %c0_i32_1 = arith.constant 0 : i32
    return %c0_i32, %c0_i32_0 : i32, i32
  }
  func.func @transform_12(%arg0: i32) -> (i32, i32) {
    %c0_i32 = arith.constant 0 : i32
    %c0_i32_0 = arith.constant 0 : i32
    %c0_i32_1 = arith.constant 0 : i32
    return %c0_i32, %c0_i32_0 : i32, i32
  }
  func.func @transform_13(%arg0: i32) -> (i32, i32, i32) {
    %c0_i32 = arith.constant 0 : i32
    %c0_i32_0 = arith.constant 0 : i32
    %c0_i32_1 = arith.constant 0 : i32
    return %arg0, %c0_i32, %c0_i32_0 : i32, i32, i32
  }
}

module attributes {stable_mosaic.version = 11 : i64} {
  func.func @_head_kernel(%arg0: i32, %arg1: memref<2x1x128xf32, #tpu.memory_space<vmem>>, %arg2: memref<1x128xf32, #tpu.memory_space<vmem>>, %arg3: memref<1x128xf32, #tpu.memory_space<vmem>>, %arg4: memref<128x2xf32, #tpu.memory_space<vmem>>, %arg5: memref<1x2xf32, #tpu.memory_space<vmem>>, %arg6: memref<2x2xf32, #tpu.memory_space<vmem>>) attributes {dimension_semantics = [#tpu.dimension_semantics<arbitrary>], iteration_bounds = array<i64: 1>, scalar_prefetch = 0 : i64, scratch_operands = 0 : i64, tpu.core_type = #tpu.core_type<tc>, window_params = [{pipeline_mode = #tpu.pipeline_mode<synchronous>, transform_indices = @transform_0, window_bounds = array<i64: 2, 1, 128>}, {pipeline_mode = #tpu.pipeline_mode<synchronous>, transform_indices = @transform_1, window_bounds = array<i64: 1, 128>}, {pipeline_mode = #tpu.pipeline_mode<synchronous>, transform_indices = @transform_2, window_bounds = array<i64: 1, 128>}, {pipeline_mode = #tpu.pipeline_mode<synchronous>, transform_indices = @transform_3, window_bounds = array<i64: 128, 2>}, {pipeline_mode = #tpu.pipeline_mode<synchronous>, transform_indices = @transform_4, window_bounds = array<i64: 1, 2>}, {pipeline_mode = #tpu.pipeline_mode<synchronous>, transform_indices = @transform_5, window_bounds = array<i64: 2, 2>}]} {
    %c0 = arith.constant 0 : index
    %c0_0 = arith.constant 0 : index
    %c0_1 = arith.constant 0 : index
    %0 = vector.load %arg1[%c0, %c0_0, %c0_1] : memref<2x1x128xf32, #tpu.memory_space<vmem>>, vector<2x1x128xf32>
    %1 = vector.shape_cast %0 : vector<2x1x128xf32> to vector<2x128xf32>
    %cst = arith.constant 6.250000e-02 : f32
    %2 = vector.broadcast %cst : f32 to vector<2x128xf32>
    %3 = arith.mulf %1, %2 : vector<2x128xf32>
    %c0_2 = arith.constant 0 : index
    %c0_3 = arith.constant 0 : index
    %4 = vector.load %arg2[%c0_2, %c0_3] : memref<1x128xf32, #tpu.memory_space<vmem>>, vector<1x128xf32>
    %c0_4 = arith.constant 0 : index
    %c0_5 = arith.constant 0 : index
    %5 = vector.load %arg3[%c0_4, %c0_5] : memref<1x128xf32, #tpu.memory_space<vmem>>, vector<1x128xf32>
    %cst_6 = arith.constant dense<0.000000e+00> : vector<2xf32>
    %6 = vector.multi_reduction <add>, %3, %cst_6 [1] : vector<2x128xf32> to vector<2xf32>
    %7 = vector.shape_cast %6 : vector<2xf32> to vector<2x1xf32>
    %cst_7 = arith.constant 1.280000e+02 : f32
    %8 = vector.broadcast %cst_7 : f32 to vector<2x1xf32>
    %9 = arith.divf %7, %8 : vector<2x1xf32>
    %10 = vector.broadcast %9 : vector<2x1xf32> to vector<2x128xf32>
    %11 = arith.subf %3, %10 : vector<2x128xf32>
    %12 = arith.mulf %11, %11 : vector<2x128xf32>
    %cst_8 = arith.constant dense<0.000000e+00> : vector<2xf32>
    %13 = vector.multi_reduction <add>, %12, %cst_8 [1] : vector<2x128xf32> to vector<2xf32>
    %14 = vector.shape_cast %13 : vector<2xf32> to vector<2x1xf32>
    %cst_9 = arith.constant 1.280000e+02 : f32
    %15 = vector.broadcast %cst_9 : f32 to vector<2x1xf32>
    %16 = arith.divf %14, %15 : vector<2x1xf32>
    %17 = vector.broadcast %9 : vector<2x1xf32> to vector<2x128xf32>
    %18 = arith.subf %3, %17 : vector<2x128xf32>
    %cst_10 = arith.constant 9.99999997E-7 : f32
    %19 = vector.broadcast %cst_10 : f32 to vector<2x1xf32>
    %20 = arith.addf %16, %19 : vector<2x1xf32>
    %21 = math.rsqrt %20 : vector<2x1xf32>
    %22 = vector.broadcast %21 : vector<2x1xf32> to vector<2x128xf32>
    %23 = arith.mulf %18, %22 : vector<2x128xf32>
    %24 = vector.broadcast %4 : vector<1x128xf32> to vector<2x128xf32>
    %25 = arith.mulf %23, %24 : vector<2x128xf32>
    %26 = vector.broadcast %5 : vector<1x128xf32> to vector<2x128xf32>
    %27 = arith.addf %25, %26 : vector<2x128xf32>
    %c0_11 = arith.constant 0 : index
    %c0_12 = arith.constant 0 : index
    %28 = vector.load %arg4[%c0_11, %c0_12] : memref<128x2xf32, #tpu.memory_space<vmem>>, vector<128x2xf32>
    %cst_13 = arith.constant dense<0.000000e+00> : vector<2x2xf32>
    %29 = tpu.matmul %27, %28, %cst_13 {dimension_numbers = #tpu.dot_dimension_numbers<[1], [0], [0], [1], [0, 0, 1, 1], [], []>} : vector<2x128xf32>, vector<128x2xf32>, vector<2x2xf32> -> vector<2x2xf32>
    %c0_14 = arith.constant 0 : index
    %c0_15 = arith.constant 0 : index
    %30 = vector.load %arg5[%c0_14, %c0_15] : memref<1x2xf32, #tpu.memory_space<vmem>>, vector<1x2xf32>
    %31 = vector.broadcast %30 : vector<1x2xf32> to vector<2x2xf32>
    %32 = arith.addf %29, %31 : vector<2x2xf32>
    %c0_16 = arith.constant 0 : index
    %c0_17 = arith.constant 0 : index
    %33 = vector.load %arg6[%c0_16, %c0_17] : memref<2x2xf32, #tpu.memory_space<vmem>>, vector<2x2xf32>
    tpu.vector_store %arg6[%c0_16, %c0_17], %32 {strides = array<i32>} : memref<2x2xf32, #tpu.memory_space<vmem>>, vector<2x2xf32>,
    return
  }
  func.func @transform_0(%arg0: i32) -> (i32, i32, i32) {
    %c0_i32 = arith.constant 0 : i32
    %c0_i32_0 = arith.constant 0 : i32
    %c0_i32_1 = arith.constant 0 : i32
    %c0_i32_2 = arith.constant 0 : i32
    return %c0_i32, %c0_i32_0, %c0_i32_1 : i32, i32, i32
  }
  func.func @transform_1(%arg0: i32) -> (i32, i32) {
    %c0_i32 = arith.constant 0 : i32
    %c0_i32_0 = arith.constant 0 : i32
    %c0_i32_1 = arith.constant 0 : i32
    return %c0_i32, %c0_i32_0 : i32, i32
  }
  func.func @transform_2(%arg0: i32) -> (i32, i32) {
    %c0_i32 = arith.constant 0 : i32
    %c0_i32_0 = arith.constant 0 : i32
    %c0_i32_1 = arith.constant 0 : i32
    return %c0_i32, %c0_i32_0 : i32, i32
  }
  func.func @transform_3(%arg0: i32) -> (i32, i32) {
    %c0_i32 = arith.constant 0 : i32
    %c0_i32_0 = arith.constant 0 : i32
    %c0_i32_1 = arith.constant 0 : i32
    return %c0_i32, %c0_i32_0 : i32, i32
  }
  func.func @transform_4(%arg0: i32) -> (i32, i32) {
    %c0_i32 = arith.constant 0 : i32
    %c0_i32_0 = arith.constant 0 : i32
    %c0_i32_1 = arith.constant 0 : i32
    return %c0_i32, %c0_i32_0 : i32, i32
  }
  func.func @transform_5(%arg0: i32) -> (i32, i32) {
    %c0_i32 = arith.constant 0 : i32
    %c0_i32_0 = arith.constant 0 : i32
    %c0_i32_1 = arith.constant 0 : i32
    return %c0_i32, %c0_i32_0 : i32, i32
  }
}

</mosaic_0001>

<bundles_post_ra>
// kernel: videomae_classifier_forward.4
= control target key start
LH: loop header
LB: loop body
LE: loop exit
PB: predicated region body
PF: predicated region fallthrough
CT: control target
= control target key end

     0   :  { %8 = vsyncpa [#allocation3], 0  ;;  %s754_s0 = inlined_call_operand.hbm [shape: bf16[32,384], index: 0, kind: input, shape index: {}]   ;;  %s755_s1 = inlined_call_operand.hbm [shape: bf16[384,128], index: 1, kind: input, shape index: {}]   ;;  %s756_s2 = inlined_call_operand.hbm [shape: f32[1,128], index: 2, kind: input, shape index: {}]   ;;  %s757_s3 = inlined_call_operand.hbm [shape: bf16[32,128], index: 3, kind: output, shape index: {}]  }
   0x1   :  { %9 = vsyncpa [#allocation6], 0 }
   0x2   :  { %10 = vsyncpa [#allocation4], 0  ;;  %s672_s12 = smov [#allocation5]   ;;  %s578_s16 = scalar_lea.hbm %s755_s1, 3072 }
   0x3   :  { %s28_s13 = sshll.u32 %s672_s12, 4  ;;  %p579_p0 = scmp.ne.s32.totalorder %s755_s1, %s578_s16  ;;  %s29_s13 = int_to_ptr.vmem [resolvable:$true] %s28_s13 }
   0x4   :  { %p582_p1 = scmp.lt.u32.totalorder %s578_s16, %s755_s1 }
   0x6   :  { %p584_p2 = pnand %p582_p1, %p579_p0 }
   0x8   :  { %587 = shalt.err (!%p584_p2)
}
   0x9   :  { %s588_s21 = scalar_lea.vmem %s29_s13, 3072  ;;  %p593_p4 = scmp.lt.s32.totalorder %s29_s13, %s29_s13 }
   0xa   :  { %p589_p3 = scmp.ne.s32.totalorder %s29_s13, %s588_s21  ;;  %p594_p5 = scmp.lt.s32.totalorder %s588_s21, %s588_s21 }
   0xc   :  { %p595_p6 = por %p594_p5, %p593_p4 }
   0xe   :  { %p596_p7 = pnand %p595_p6, %p589_p3 }
  0x10   :  { %599 = shalt.err (!%p596_p7)
}
  0x11   :  { %s673_s22 = smov 64   ;;  %s674_s23 = smov 4  }
  0x12   :  { %34 = dma.hbm_to_vmem [thread:$0]  %s755_s1, 3072, %s29_s13, [#allocation6], %s673_s22, %s673_s22, %s674_s23  }
  0x13   :  { %s675_s26 = smov [#allocation2]   ;;  %s600_s30 = scalar_lea.hbm %s754_s0, 768 }
  0x14   :  { %s16_s27 = sshll.u32 %s675_s26, 4  ;;  %p601_p8 = scmp.ne.s32.totalorder %s754_s0, %s600_s30  ;;  %s17_s27 = int_to_ptr.vmem [resolvable:$true] %s16_s27 }
  0x15   :  { %p604_p9 = scmp.lt.u32.totalorder %s600_s30, %s754_s0 }
  0x17   :  { %p606_p10 = pnand %p604_p9, %p601_p8 }
  0x19   :  { %609 = shalt.err (!%p606_p10)
}
  0x1a   :  { %s610_s8 = scalar_lea.vmem %s17_s27, 768  ;;  %p615_p12 = scmp.lt.s32.totalorder %s17_s27, %s17_s27 }
  0x1b   :  { %p611_p11 = scmp.ne.s32.totalorder %s17_s27, %s610_s8  ;;  %p616_p13 = scmp.lt.s32.totalorder %s610_s8, %s610_s8 }
  0x1d   :  { %p617_p0 = por %p616_p13, %p615_p12 }
  0x1f   :  { %p618_p1 = pnand %p617_p0, %p611_p11 }
  0x21   :  { %621 = shalt.err (!%p618_p1)
}
  0x22   :  { %s676_s1 = smov 192   ;;  %s677_s9 = smov 12  }
  0x23   :  { %22 = dma.hbm_to_vmem [thread:$0]  %s754_s0, 768, %s17_s27, [#allocation3], %s676_s1, %s676_s1, %s677_s9  }
  0x24   :  { %s678_s12 = smov [#allocation7]   ;;  %s622_s16 = scalar_lea.hbm %s756_s2, 16 }
  0x25   :  { %s41_s13 = sshll.u32 %s678_s12, 4  ;;  %p623_p2 = scmp.ne.s32.totalorder %s756_s2, %s622_s16  ;;  %s42_s13 = int_to_ptr.vmem [resolvable:$true] %s41_s13 }
  0x26   :  { %p626_p3 = scmp.lt.u32.totalorder %s622_s16, %s756_s2 }
  0x28   :  { %p628_p4 = pnand %p626_p3, %p623_p2 }
  0x2a   :  { %631 = shalt.err (!%p628_p4)
}
  0x2b   :  { %s632_s21 = scalar_lea.vmem %s42_s13, 16  ;;  %s636_s0 = scalar_lea.vmem %s42_s13, 32 }
  0x2c   :  { %p633_p5 = scmp.ne.s32.totalorder %s42_s13, %s632_s21  ;;  %p637_p6 = scmp.lt.s32.totalorder %s42_s13, %s42_s13 }
  0x2d   :  { %p638_p7 = scmp.lt.s32.totalorder %s636_s0, %s632_s21 }
  0x2f   :  { %p639_p8 = por %p638_p7, %p637_p6 }
  0x31   :  { %p640_p9 = pnand %p639_p8, %p633_p5 }
  0x33   :  { %643 = shalt.err (!%p640_p9)
}
  0x34   :  { %44 = dma.hbm_to_vmem [thread:$0]  %s756_s2, 16, %s42_s13, [#allocation6]  }
  0x35   :  { %666 = dma.done.wait [#allocation3], 768  }
  0x36   :  { %667 = vsyncadd [#allocation3], 4294966528 }
  0x37   :  { %668 = dma.done.wait [#allocation6], 3088  }
  0x38   :  { %669 = vsyncadd [#allocation6], 4294964208  ;;  %v546_v0 = vld [vmem:[#allocation5 + $0x40] sm:$0xff]   ;;  %v548_v2 = vld [vmem:[#allocation5 + $0x48] sm:$0xff]   ;;  %s679_s2 = smov [#allocation8]  }
  0x39   :  { %v547_v1 = vld [vmem:[#allocation5] sm:$0xff]   ;;  %480 = vmatprep.subr.bf16.mxu0 %v546_v0  ;;  %v550_v4 = vld [vmem:[#allocation5 + $0x8] sm:$0xff]   ;;  %v551_v5 = vld [vmem:[#allocation5 + $0x50] sm:$0xff]   ;;  %s417_s26 = sshll.u32 %s679_s2, 4  ;;  %s418_s26 = int_to_ptr.vmem [resolvable:$true] %s417_s26 }
  0x3a   :  { %481 = vmatpush3.bf16.msra.mxu0 %v547_v1  ;;  %v549_v3 = vld [vmem:[#allocation5 + $0x80] sm:$0xff]   ;;  %v552_v6 = vld [vmem:[#allocation5 + $0x88] sm:$0xff]   ;;  %v553_v7 = vld [vmem:[#allocation5 + $0x10] sm:$0xff]   ;;  %s644_s27 = scalar_lea.vmem %s418_s26, 256  ;;  %p649_p11 = scmp.lt.s32.totalorder %s418_s26, %s418_s26 }
  0x3b   :  { %482 = vmatprep.subr.bf16.mxu0 %v548_v2  ;;  %518 = vmatprep.subr.bf16.mxu1 %v549_v3  ;;  %v554_v8 = vld [vmem:[#allocation5 + $0x58] sm:$0xff]   ;;  %v555_v9 = vld [vmem:[#allocation5 + $0x90] sm:$0xff]   ;;  %v557_v11 = vld [vmem:[#allocation5 + $0x60] sm:$0xff]   ;;  %p645_p10 = scmp.ne.s32.totalorder %s418_s26, %s644_s27  ;;  %p650_p12 = scmp.lt.s32.totalorder %s644_s27, %s644_s27 }
  0x3c   :  { %519 = vmatpush3.bf16.msra.mxu1 %v549_v3  ;;  %v556_v10 = vld [vmem:[#allocation5 + $0x18] sm:$0xff]   ;;  %v559_v13 = vld [vmem:[#allocation5 + $0x20] sm:$0xff]   ;;  %v560_v15 = vld [vmem:[#allocation5 + $0x68] sm:$0xff]  }
  0x3d   :  { %520 = vmatprep.subr.bf16.mxu1 %v552_v6  ;;  %v558_v12 = vld [vmem:[#allocation5 + $0x98] sm:$0xff]   ;;  %v561_v14 = vld [vmem:[#allocation5 + $0xa0] sm:$0xff]   ;;  %v562_v16 = vld [vmem:[#allocation5 + $0x28] sm:$0xff]   ;;  %p651_p13 = por %p650_p12, %p649_p11 }
  0x3e   :  { %483 = vmatpush3.bf16.msra.mxu0 %v550_v4  ;;  %v564_v17 = vld [vmem:[#allocation5 + $0xa8] sm:$0xff]   ;;  %v563_v18 = vld [vmem:[#allocation5 + $0x70] sm:$0xff]   ;;  %v566_v20 = vld [vmem:[#allocation5 + $0x78] sm:$0xff]  }
  0x3f   :  { %484 = vmatprep.subr.bf16.mxu0 %v551_v5  ;;  %v565_v19 = vld [vmem:[#allocation5 + $0x30] sm:$0xff]   ;;  %v568_v23 = vld [vmem:[#allocation5 + $0x38] sm:$0xff]   ;;  %v430_v32 = vld [vmem:[#allocation7] ss:$0 sm:$0xff]  ;;  %p652_p0 = pnand %p651_p13, %p645_p10 }
  0x40   :  { %521 = vmatpush3.bf16.msra.mxu1 %v552_v6  ;;  %v567_v21 = vld [vmem:[#allocation5 + $0xb0] sm:$0xff]   ;;  %v573_v24 = vld [vmem:[#allocation2 + $0x8] ss:$12 sps:$4 sm:$0xff]  }
  0x41   :  { %522 = vmatprep.subr.bf16.mxu1 %v555_v9  ;;  %v571_v22 = vld [vmem:[#allocation2 + $0x4] ss:$12 sps:$4 sm:$0xff]   ;;  %v572_v25 = vld [vmem:[#allocation5 + $0xb8] sm:$0xff]   ;;  %534 = vmatprep.mubr.bf16.mxu1 %v573_v24 }
  0x42   :  { %485 = vmatpush3.bf16.msra.mxu0 %v553_v7  ;;  %326 = vmatprep.mubr.bf16.mxu0 %v571_v22  ;;  %v569_v26 = vld [vmem:[#allocation2] ss:$12 sps:$4 sm:$0xff]   ;;  %v575_v27 = vld [vmem:[#allocation2 + $0x1c] ss:$12 sps:$4 sm:$0xff]   ;;  %v577_v29 = vld [vmem:[#allocation2 + $0x18] ss:$12 sps:$4 sm:$0xff]  }
  0x43   :  { %486 = vmatprep.subr.bf16.mxu0 %v554_v8  ;;  %v574_v28 = vld [vmem:[#allocation2 + $0x20] ss:$12 sps:$4 sm:$0xff]  }
  0x44   :  { %523 = vmatpush3.bf16.msra.mxu1 %v555_v9 }
  0x45   :  { %524 = vmatprep.subr.bf16.mxu1 %v558_v12 }
  0x46   :  { %487 = vmatpush3.bf16.msra.mxu0 %v556_v10 }
  0x47   :  { %488 = vmatprep.subr.bf16.mxu0 %v557_v11 }
  0x48   :  { %525 = vmatpush3.bf16.msra.mxu1 %v558_v12 }
  0x49   :  { %526 = vmatprep.subr.bf16.mxu1 %v561_v14 }
  0x4a   :  { %489 = vmatpush3.bf16.msra.mxu0 %v559_v13 }
  0x4b   :  { %490 = vmatprep.subr.bf16.mxu0 %v560_v15 }
  0x4c   :  { %527 = vmatpush3.bf16.msra.mxu1 %v561_v14 }
  0x4d   :  { %528 = vmatprep.subr.bf16.mxu1 %v564_v17 }
  0x4e   :  { %491 = vmatpush3.bf16.msra.mxu0 %v562_v16 }
  0x4f   :  { %492 = vmatprep.subr.bf16.mxu0 %v563_v18 }
  0x50   :  { %529 = vmatpush3.bf16.msra.mxu1 %v564_v17 }
  0x51   :  { %530 = vmatprep.subr.bf16.mxu1 %v567_v21 }
  0x52   :  { %493 = vmatpush3.bf16.msra.mxu0 %v565_v19 }
  0x53   :  { %494 = vmatprep.subr.bf16.mxu0 %v566_v20 }
  0x54   :  { %531 = vmatpush3.bf16.msra.mxu1 %v567_v21 }
  0x55   :  { %532 = vmatprep.subr.bf16.mxu1 %v572_v25 }
  0x56   :  { %495 = vmatpush3.bf16.msra.mxu0 %v568_v23 }
  0x58   :  { %533 = vmatpush3.bf16.msra.mxu1 %v572_v25 }
  0x59   :  { %327 = vmatmul.mubr.bf16.vlgmr.msra.gmra.mrb[0].mxu0 %v569_v26 }
  0x5a   :  { %334 = vmatprep.mubr.bf16.mxu0 %v575_v27 }
  0x5b   :  { %535 = vmatmul.mubr.bf16.vlgmr.msra.gmra.mrb[0].mxu1 %v574_v28 }
  0x61   :  { %335 = vmatmul.mubr.bf16.gmra.mrb[4].mxu0 %v577_v29 }
 0x12c   :  { %v496_v30 = vpop.f32.mrb[0].mxu0 }
 0x12d   :  { %v497_v31 = vpop.f32.mrb[1].mxu0 }
 0x12e   :  { %v498_v33 = vadd.f32 %v497_v31, %v496_v30  ;;  %v499_v34 = vpop.f32.mrb[2].mxu0  ;;  %v536_v36 = vpop.f32.mrb[0].mxu1 }
 0x12f   :  { %v500_v35 = vpop.f32.mrb[3].mxu0  ;;  %v377_v39 = vpop.f32.mrb[1].mxu1 }
 0x130   :  { %v501_v37 = vadd.f32 %v500_v35, %v499_v34  ;;  %v329_v38 = vadd.f32 %v498_v33, %v430_v32  ;;  %v537_v40 = vpop.f32.mrb[2].mxu1 }
 0x131   :  { %v380_v43 = vpop.f32.mrb[3].mxu1 }
 0x132   :  { %v378_v41 = vadd.f32 %v377_v39, %v329_v38  ;;  %v332_v42 = vadd.f32 %v501_v37, %v430_v32 }
 0x134   :  { %v381_v44 = vadd.f32 %v380_v43, %v332_v42  ;;  %v502_v45 = vpop.f32.mrb[4].mxu0 }
 0x135   :  { %v503_v46 = vpop.f32.mrb[5].mxu0 }
 0x136   :  { %v472_v47 = vpack.c.bf16 %v381_v44, %v378_v41  ;;  %v504_v48 = vadd.f32 %v503_v46, %v502_v45  ;;  %v505_v49 = vpop.f32.mrb[6].mxu0 }
 0x137   :  { %v506_v50 = vpop.f32.mrb[7].mxu0 }
 0x138   :  { %473 = vst [vmem:[#allocation8] sm:$0xff] %v472_v47   ;;  %v337_v51 = vadd.f32 %v504_v48, %v430_v32  ;;  %v507_v52 = vadd.f32 %v506_v50, %v505_v49 }
 0x13a   :  { %v386_v53 = vadd.f32 %v536_v36, %v337_v51  ;;  %v340_v54 = vadd.f32 %v507_v52, %v430_v32 }
 0x13c   :  { %v389_v55 = vadd.f32 %v537_v40, %v340_v54 }
 0x13e   :  { %v477_v56 = vpack.c.bf16 %v389_v55, %v386_v53 }
 0x140   :  { %479 = vst [vmem:[#allocation8 + $0x8] sm:$0xff] %v477_v56  }
 0x141   :  { %655 = shalt.err (!%p652_p0)
}
 0x142   :  { %s656_s30 = scalar_lea.hbm %s757_s3, 256 }
 0x143   :  { %p657_p1 = scmp.ne.s32.totalorder %s757_s3, %s656_s30  ;;  %p660_p2 = scmp.lt.u32.totalorder %s656_s30, %s757_s3 }
 0x145   :  { %p662_p3 = pnand %p660_p2, %p657_p1 }
 0x147   :  { %665 = shalt.err (!%p662_p3)
}
 0x148   :  { %423 = dma.vmem_to_hbm [thread:$0]  %s418_s26, 256, %s757_s3, [#allocation4], %s673_s22, %s673_s22, %s674_s23  }
 0x149   :  { %670 = dma.done.wait [#allocation4], 256  }
 0x14a   :  { %671 = vsyncadd [#allocation4], 4294967040 }
 0x14b   :  { %427 = vsyncpa [#allocation3], 1 }
 0x14c   :  { %428 = vsyncpa [#allocation6], 1 }
 0x14d   :  { %429 = vsyncpa [#allocation4], 1 }

// kernel: videomae_classifier_forward.7
= control target key start
LH: loop header
LB: loop body
LE: loop exit
PB: predicated region body
PF: predicated region fallthrough
CT: control target
= control target key end

     0   :  { %10 = vsyncpa [#allocation3], 0  ;;  %s744_s0 = inlined_call_operand.hbm [shape: f32[2,1,128], index: 0, kind: input, shape index: {}]   ;;  %s745_s1 = inlined_call_operand.hbm [shape: f32[1,128], index: 1, kind: input, shape index: {}]   ;;  %s746_s2 = inlined_call_operand.hbm [shape: f32[1,128], index: 2, kind: input, shape index: {}]   ;;  %s747_s3 = inlined_call_operand.hbm [shape: f32[128,2], index: 3, kind: input, shape index: {}]   ;;  %s748_s4 = inlined_call_operand.hbm [shape: f32[1,2], index: 4, kind: input, shape index: {}]   ;;  %s749_s5 = inlined_call_operand.hbm [shape: f32[2,2], index: 5, kind: output, shape index: {}]  }
   0x1   :  { %11 = vsyncpa [#allocation6], 0 }
   0x2   :  { %12 = vsyncpa [#allocation9], 0 }
   0x3   :  { %13 = vsyncpa [#allocation4], 0  ;;  %s592_s18 = smov [#allocation5]   ;;  %s593_s20 = smov [#allocation8]  }
   0x4   :  { %s32_s19 = sshll.u32 %s592_s18, 4  ;;  %s51_s21 = sshll.u32 %s593_s20, 4  ;;  %s33_s19 = int_to_ptr.vmem [resolvable:$true] %s32_s19  ;;  %s636_s21 = int_to_ptr.vmem [resolvable:$true] %s51_s21 }
   0x5   :  { %s452_s24 = scalar_lea.hbm %s745_s1, 16 }
   0x6   :  { %p453_p0 = scmp.ne.s32.totalorder %s745_s1, %s452_s24  ;;  %p456_p1 = scmp.lt.u32.totalorder %s452_s24, %s745_s1 }
   0x8   :  { %p458_p2 = pnand %p456_p1, %p453_p0 }
   0xa   :  { %461 = shalt.err (!%p458_p2)
}
   0xb   :  { %s462_s29 = scalar_lea.vmem %s33_s19, 16  ;;  %s466_s30 = scalar_lea.vmem %s33_s19, 32 }
   0xc   :  { %p463_p3 = scmp.ne.s32.totalorder %s33_s19, %s462_s29  ;;  %p467_p4 = scmp.lt.s32.totalorder %s33_s19, %s33_s19 }
   0xd   :  { %p468_p5 = scmp.lt.s32.totalorder %s466_s30, %s462_s29 }
   0xf   :  { %p469_p6 = por %p468_p5, %p467_p4 }
  0x11   :  { %p470_p7 = pnand %p469_p6, %p463_p3 }
  0x13   :  { %473 = shalt.err (!%p470_p7)
}
  0x14   :  { %35 = dma.hbm_to_vmem [thread:$0]  %s745_s1, 16, %s33_s19, [#allocation6]  }
  0x15   :  { %s474_s10 = scalar_lea.hbm %s747_s3, 2048 }
  0x16   :  { %p475_p8 = scmp.ne.s32.totalorder %s747_s3, %s474_s10  ;;  %p478_p9 = scmp.lt.u32.totalorder %s474_s10, %s747_s3 }
  0x18   :  { %p480_p10 = pnand %p478_p9, %p475_p8 }
  0x1a   :  { %483 = shalt.err (!%p480_p10)
}
  0x1b   :  { %s484_s15 = scalar_lea.vmem %s636_s21, 2048  ;;  %p489_p12 = scmp.lt.s32.totalorder %s636_s21, %s636_s21 }
  0x1c   :  { %p485_p11 = scmp.ne.s32.totalorder %s636_s21, %s484_s15  ;;  %p490_p13 = scmp.lt.s32.totalorder %s484_s15, %s484_s15 }
  0x1e   :  { %p491_p0 = por %p490_p13, %p489_p12 }
  0x20   :  { %p492_p1 = pnand %p491_p0, %p485_p11 }
  0x22   :  { %495 = shalt.err (!%p492_p1)
}
  0x23   :  { %s594_s1 = smov 128   ;;  %s595_s16 = smov 8  }
  0x24   :  { %57 = dma.hbm_to_vmem [thread:$0]  %s747_s3, 2048, %s636_s21, [#allocation9], %s594_s1, %s594_s1, %s595_s16  }
  0x25   :  { %s596_s19 = smov [#allocation2]   ;;  %s496_s24 = scalar_lea.hbm %s744_s0, 32 }
  0x26   :  { %s19_s20 = sshll.u32 %s596_s19, 4  ;;  %p497_p2 = scmp.ne.s32.totalorder %s744_s0, %s496_s24  ;;  %s20_s20 = int_to_ptr.vmem [resolvable:$true] %s19_s20 }
  0x27   :  { %p500_p3 = scmp.lt.u32.totalorder %s496_s24, %s744_s0 }
  0x29   :  { %p502_p4 = pnand %p500_p3, %p497_p2 }
  0x2b   :  { %505 = shalt.err (!%p502_p4)
}
  0x2c   :  { %s506_s29 = scalar_lea.vmem %s20_s20, 32  ;;  %p511_p6 = scmp.lt.s32.totalorder %s20_s20, %s20_s20 }
  0x2d   :  { %p507_p5 = scmp.ne.s32.totalorder %s20_s20, %s506_s29  ;;  %p512_p7 = scmp.lt.s32.totalorder %s506_s29, %s506_s29 }
  0x2f   :  { %p513_p8 = por %p512_p7, %p511_p6 }
  0x31   :  { %p514_p9 = pnand %p513_p8, %p507_p5 }
  0x33   :  { %517 = shalt.err (!%p514_p9)
}
  0x34   :  { %s597_s3 = smov 16   ;;  %s598_s21 = smov 1  }
  0x35   :  { %25 = dma.hbm_to_vmem [thread:$0]  %s744_s0, 32, %s20_s20, [#allocation3], %s597_s3, %s597_s3, %s598_s21  }
  0x36   :  { %s599_s7 = smov [#allocation7]   ;;  %s600_s9 = smov [#allocation10]  }
  0x37   :  { %s42_s8 = sshll.u32 %s599_s7, 4  ;;  %s64_s10 = sshll.u32 %s600_s9, 4  ;;  %s43_s8 = int_to_ptr.vmem [resolvable:$true] %s42_s8  ;;  %s65_s10 = int_to_ptr.vmem [resolvable:$true] %s64_s10 }
  0x38   :  { %s518_s13 = scalar_lea.hbm %s746_s2, 16 }
  0x39   :  { %p519_p10 = scmp.ne.s32.totalorder %s746_s2, %s518_s13  ;;  %p522_p11 = scmp.lt.u32.totalorder %s518_s13, %s746_s2 }
  0x3b   :  { %p524_p12 = pnand %p522_p11, %p519_p10 }
  0x3d   :  { %527 = shalt.err (!%p524_p12)
}
  0x3e   :  { %s528_s0 = scalar_lea.vmem %s43_s8, 16  ;;  %s532_s17 = scalar_lea.vmem %s43_s8, 32 }
  0x3f   :  { %p529_p13 = scmp.ne.s32.totalorder %s43_s8, %s528_s0  ;;  %p533_p0 = scmp.lt.s32.totalorder %s43_s8, %s43_s8 }
  0x40   :  { %p534_p1 = scmp.lt.s32.totalorder %s532_s17, %s528_s0 }
  0x42   :  { %p535_p2 = por %p534_p1, %p533_p0 }
  0x44   :  { %p536_p3 = pnand %p535_p2, %p529_p13 }
  0x46   :  { %539 = shalt.err (!%p536_p3)
}
  0x47   :  { %45 = dma.hbm_to_vmem [thread:$0]  %s746_s2, 16, %s43_s8, [#allocation6]  }
  0x48   :  { %s540_s23 = scalar_lea.hbm %s748_s4, 16 }
  0x49   :  { %p541_p4 = scmp.ne.s32.totalorder %s748_s4, %s540_s23  ;;  %p544_p5 = scmp.lt.u32.totalorder %s540_s23, %s748_s4 }
  0x4b   :  { %p546_p6 = pnand %p544_p5, %p541_p4 }
  0x4d   :  { %549 = shalt.err (!%p546_p6)
}
  0x4e   :  { %s550_s28 = scalar_lea.vmem %s65_s10, 16  ;;  %s554_s29 = scalar_lea.vmem %s65_s10, 32 }
  0x4f   :  { %p551_p7 = scmp.ne.s32.totalorder %s65_s10, %s550_s28  ;;  %p555_p8 = scmp.lt.s32.totalorder %s65_s10, %s65_s10 }
  0x50   :  { %p556_p9 = scmp.lt.s32.totalorder %s554_s29, %s550_s28 }
  0x52   :  { %p557_p10 = por %p556_p9, %p555_p8 }
  0x54   :  { %p558_p11 = pnand %p557_p10, %p551_p7 }
  0x56   :  { %561 = shalt.err (!%p558_p11)
}
  0x57   :  { %67 = dma.hbm_to_vmem [thread:$0]  %s748_s4, 16, %s65_s10, [#allocation9]  }
  0x58   :  { %584 = dma.done.wait [#allocation3], 32  }
  0x59   :  { %585 = vsyncadd [#allocation3], 4294967264 }
  0x5a   :  { %586 = dma.done.wait [#allocation6], 32  }
  0x5b   :  { %587 = vsyncadd [#allocation6], 4294967264 }
  0x5c   :  { %588 = dma.done.wait [#allocation9], 2064  }
  0x5d   :  { %589 = vsyncadd [#allocation9], 4294965232  ;;  %v95_v0 = vlaneseq  ;;  %v601_v1 = vmov 1966171168   ;;  %v83_v5 = vld [vmem:[#allocation2] sm:$0x1] }
  0x5e   :  { %v93_v2 = vunpack.c.l.s4 %v601_v1  ;;  %v84_v6 = vld [vmem:[#allocation2 + $0x1] sm:$0x1]  ;;  %v85_v7 = vmul.f32 0.0625, %v83_v5  ;;  %vm107_vm0 = vcmask 1041408   ;;  %v227_v14 = vld [vmem:[#allocation8] sm:$0xff]  ;;  %v228_v15 = vld [vmem:[#allocation8 + $0x8] sm:$0xff] }
  0x5f   :  { %v703_v4 = vshrl.u32 %v95_v0, 7  ;;  %v86_v8 = vmul.f32 0.0625, %v84_v6  ;;  %v602_v16 = vmov 0.0|0.0   ;;  %v413_v17 = vpack.c.bf16 %v228_v15, %v227_v14  ;;  %v229_v32 = vld [vmem:[#allocation8 + $0x10] sm:$0xff]  ;;  %v230_v33 = vld [vmem:[#allocation8 + $0x18] sm:$0xff]  ;;  %v231_v35 = vld [vmem:[#allocation8 + $0x20] sm:$0xff] }
  0x60   :  { %v94_v3 = vunpack.c.0.s8 %v93_v2  ;;  %412 = vmatprep.subr.bf16.mxu0 %v602_v16  ;;  %v416_v34 = vpack.c.bf16 %v230_v33, %v229_v32  ;;  %v232_v36 = vld [vmem:[#allocation8 + $0x28] sm:$0xff]  ;;  %v233_v38 = vld [vmem:[#allocation8 + $0x30] sm:$0xff]  ;;  %v234_v39 = vld [vmem:[#allocation8 + $0x38] sm:$0xff]  ;;  %vm603_vm1 = vmmov 0   ;;  %v604_v50 = vmov 0.0   ;;  %s605_s4 = smov [#allocation11]  }
  0x61   :  { %v91_v10 = vcombine.low %v85_v7, %v86_v8  ;;  %414 = vmatpush3.bf16.msra.mxu0 %v413_v17  ;;  %v116_v18 = vsub.s32 0, %v703_v4  ;;  %v120_v19 = vsub.s32 1, %v703_v4  ;;  %v419_v37 = vpack.c.bf16 %v232_v36, %v231_v35  ;;  %v235_v41 = vld [vmem:[#allocation8 + $0x40] sm:$0xff]  ;;  %v236_v42 = vld [vmem:[#allocation8 + $0x48] sm:$0xff]  ;;  %v237_v44 = vld [vmem:[#allocation8 + $0x50] sm:$0xff]  ;;  %409 = vmatprep.mubr.msk.f32.mxu0 %vm603_vm1, %v604_v50  ;;  %s346_s21 = sshll.u32 %s605_s4, 4  ;;  %s347_s21 = int_to_ptr.vmem [resolvable:$true] %s346_s21 }
  0x62   :  { %v706_v9 = vsub.s32 %v94_v3, %v703_v4  ;;  %415 = vmatprep.subr.bf16.mxu0 %v602_v16  ;;  %v422_v40 = vpack.c.bf16 %v234_v39, %v233_v38  ;;  %v425_v43 = vpack.c.bf16 %v236_v42, %v235_v41  ;;  %v238_v45 = vld [vmem:[#allocation8 + $0x58] sm:$0xff]  ;;  %v239_v47 = vld [vmem:[#allocation8 + $0x60] sm:$0xff]  ;;  %v240_v48 = vld [vmem:[#allocation8 + $0x68] sm:$0xff]  ;;  %vm338_vm2 = vcmask 9216   ;;  %s562_s30 = scalar_lea.vmem %s347_s21, 32  ;;  %p567_p13 = scmp.lt.s32.totalorder %s347_s21, %s347_s21 }
  0x63   :  { %v428_v46 = vpack.c.bf16 %v238_v45, %v237_v44  ;;  %v431_v49 = vpack.c.bf16 %v240_v48, %v239_v47  ;;  %v241_v51 = vld [vmem:[#allocation8 + $0x70] sm:$0xff]  ;;  %v242_v52 = vld [vmem:[#allocation8 + $0x78] sm:$0xff]  ;;  %p563_p12 = scmp.ne.s32.totalorder %s347_s21, %s562_s30  ;;  %p568_p0 = scmp.lt.s32.totalorder %s562_s30, %s562_s30 }
  0x64   :  { %v98_v11 = vrot.slane %v91_v10, %v706_v9  ;;  %v434_v53 = vpack.c.bf16 %v242_v52, %v241_v51  ;;  %v357_v57 = vld [vmem:[#allocation5] ss:$0 sm:$0xff]  ;;  %v358_v58 = vld [vmem:[#allocation7] ss:$0 sm:$0xff] }
  0x65   :  { %417 = vmatpush3.bf16.msra.mxu0 %v416_v34  ;;  %v176_v59 = vrot.slane %v357_v57, %v706_v9  ;;  %v207_v60 = vrot.slane %v358_v58, %v706_v9  ;;  %p569_p1 = por %p568_p0, %p567_p13 }
  0x66   :  { %v105_v12 = vrot.slane %v98_v11, %v706_v9  ;;  %418 = vmatprep.subr.bf16.mxu0 %v602_v16 }
  0x67   :  { %v177_v61 = vcombine.high %v176_v59, %v176_v59  ;;  %v208_v62 = vcombine.high %v207_v60, %v207_v60  ;;  %v184_v2 = vrot.slane %v176_v59, %v706_v9  ;;  %p570_p2 = pnand %p569_p1, %p563_p12 }
  0x68   :  { %v108_v13 = vsel %vm107_vm0, %v105_v12, 0.0 }
  0x69   :  { %109 = vadd.xlane.f32.xlu0 %v108_v13  ;;  %420 = vmatpush3.bf16.msra.mxu0 %v419_v37  ;;  %v191_v3 = vrot.slane %v177_v61, %v706_v9 }
  0x6a   :  { %421 = vmatprep.subr.bf16.mxu0 %v602_v16 }
  0x6d   :  { %423 = vmatpush3.bf16.msra.mxu0 %v422_v40 }
  0x6e   :  { %424 = vmatprep.subr.bf16.mxu0 %v602_v16 }
  0x71   :  { %426 = vmatpush3.bf16.msra.mxu0 %v425_v43 }
  0x72   :  { %427 = vmatprep.subr.bf16.mxu0 %v602_v16 }
  0x75   :  { %429 = vmatpush3.bf16.msra.mxu0 %v428_v46 }
  0x76   :  { %430 = vmatprep.subr.bf16.mxu0 %v602_v16 }
  0x79   :  { %432 = vmatpush3.bf16.msra.mxu0 %v431_v49 }
  0x7a   :  { %433 = vmatprep.subr.bf16.mxu0 %v602_v16  ;;  %v359_v16 = vld [vmem:[#allocation10] ss:$0 sm:$0xff] }
  0x7d   :  { %435 = vmatpush3.bf16.msra.mxu0 %v434_v53 }
  0xf6   :  { %v110_v20 = vpop.xlane.xlu0 %109 }
  0xf7   :  { %v112_v21 = vmul.f32 0.0078125, %v110_v20 }
  0xf9   :  { %v117_v22 = vrot.slane %v112_v21, %v116_v18  ;;  %v121_v23 = vrot.slane %v112_v21, %v120_v19 }
  0xfb   :  { %v124_v24 = vsub.f32 %v85_v7, %v117_v22  ;;  %v125_v25 = vsub.f32 %v86_v8, %v121_v23  ;;  %v215_v7 = vrot.slane %v207_v60, %v706_v9  ;;  %v222_v8 = vrot.slane %v208_v62, %v706_v9 }
  0xfd   :  { %v126_v26 = vmul.f32 %v124_v24, %v124_v24  ;;  %v127_v27 = vmul.f32 %v125_v25, %v125_v25 }
  0xff   :  { %v130_v28 = vcombine.low %v126_v26, %v127_v27 }
 0x101   :  { %v137_v29 = vrot.slane %v130_v28, %v706_v9 }
 0x103   :  { %v144_v30 = vrot.slane %v137_v29, %v706_v9 }
 0x105   :  { %v146_v31 = vsel %vm107_vm0, %v144_v30, 0.0 }
 0x106   :  { %147 = vadd.xlane.f32.xlu0 %v146_v31 }
 0x193   :  { %v148_v54 = vpop.xlane.xlu0 %147 }
 0x194   :  { %v149_v55 = vmul.f32 0.0078125, %v148_v54 }
 0x196   :  { %v150_v56 = vadd.f32 1e-06, %v149_v55 }
 0x198   :  { %450 = vrsqrt.f32 %v150_v56 }
 0x1a2   :  { %v451_v63 = vpop.eup %450 }
 0x1a3   :  { %v156_v0 = vrot.slane %v451_v63, %v116_v18  ;;  %v160_v1 = vrot.slane %v451_v63, %v120_v19 }
 0x1a5   :  { %v163_v5 = vmul.f32 %v156_v0, %v124_v24  ;;  %v164_v6 = vmul.f32 %v160_v1, %v125_v25 }
 0x1a7   :  { %v194_v10 = vmul.f32 %v184_v2, %v163_v5  ;;  %v195_v11 = vmul.f32 %v191_v3, %v164_v6 }
 0x1a9   :  { %v225_v12 = vadd.f32 %v215_v7, %v194_v10  ;;  %v226_v13 = vadd.f32 %v222_v8, %v195_v11 }
 0x1ab   :  { %v252_v14 = vcombine.low %v225_v12, %v226_v13 }
 0x1ad   :  { %v259_v15 = vrot.slane %v252_v14, %v706_v9 }
 0x1af   :  { %v266_v4 = vrot.slane %v259_v15, %v706_v9 }
 0x1b1   :  { %410 = vmatmul.mubr.f32.vlgmr.msra.gmra.mrb[0].mxu0 %v266_v4 }
 0x284   :  { %v334_v17 = vpop.f32.mrb[0].mxu0 }
 0x285   :  { %v335_v18 = vadd.f32 %v359_v16, %v334_v17  ;;  %v411_v19 = vpop.f32.mrb[1].mxu0 }
 0x287   :  { %339 = vst.msk [vmem:[#allocation11] sm:$0x3] %vm338_vm2, %v335_v18 }
 0x288   :  { %573 = shalt.err (!%p570_p2)
}
 0x289   :  { %s574_s8 = scalar_lea.hbm %s749_s5, 32 }
 0x28a   :  { %p575_p3 = scmp.ne.s32.totalorder %s749_s5, %s574_s8  ;;  %p578_p4 = scmp.lt.u32.totalorder %s574_s8, %s749_s5 }
 0x28c   :  { %p580_p5 = pnand %p578_p4, %p575_p3 }
 0x28e   :  { %583 = shalt.err (!%p580_p5)
}
 0x28f   :  { %349 = dma.vmem_to_hbm [thread:$0]  %s347_s21, 32, %s749_s5, [#allocation4]  }
 0x290   :  { %590 = dma.done.wait [#allocation4], 32  }
 0x291   :  { %591 = vsyncadd [#allocation4], 4294967264 }
 0x292   :  { %353 = vsyncpa [#allocation3], 1 }
 0x293   :  { %354 = vsyncpa [#allocation6], 1 }
 0x294   :  { %355 = vsyncpa [#allocation9], 1 }
 0x295   :  { %356 = vsyncpa [#allocation4], 1 }

// kernel: videomae_classifier_forward.6
= control target key start
LH: loop header
LB: loop body
LE: loop exit
PB: predicated region body
PF: predicated region fallthrough
CT: control target
= control target key end

     0   :  { %s5149_s0 = inlined_call_operand.hbm [shape: bf16[32,128], index: 0, kind: input, shape index: {}]   ;;  %s5150_s1 = inlined_call_operand.hbm [shape: f32[1,128], index: 1, kind: input, shape index: {}]   ;;  %s5151_s2 = inlined_call_operand.hbm [shape: f32[1,128], index: 2, kind: input, shape index: {}]   ;;  %s5152_s3 = inlined_call_operand.hbm [shape: bf16[128,1536], index: 3, kind: input, shape index: {}]   ;;  %s5153_s4 = inlined_call_operand.hbm [shape: f32[1,1536], index: 4, kind: input, shape index: {}]   ;;  %s5154_s5 = inlined_call_operand.hbm [shape: bf16[512,128], index: 5, kind: input, shape index: {}]   ;;  %s5155_s6 = inlined_call_operand.hbm [shape: f32[1,128], index: 6, kind: input, shape index: {}]   ;;  %s5156_s7 = inlined_call_operand.hbm [shape: f32[1,128], index: 7, kind: input, shape index: {}]   ;;  %s5157_s8 = inlined_call_operand.hbm [shape: f32[1,128], index: 8, kind: input, shape index: {}]   ;;  %s5158_s9 = inlined_call_operand.hbm [shape: bf16[128,256], index: 9, kind: input, shape index: {}]   ;;  %s5159_s10 = inlined_call_operand.hbm [shape: f32[1,256], index: 10, kind: input, shape index: {}]   ;;  %s5160_s11 = inlined_call_operand.hbm [shape: bf16[256,128], index: 11, kind: input, shape index: {}]   ;;  %s5161_s12 = inlined_call_operand.hbm [shape: f32[1,128], index: 12, kind: input, shape index: {}]   ;;  %s5162_s13 = inlined_call_operand.hbm [shape: f32[2,1,128], index: 13, kind: output, shape index: {}]  }
   0x1   :  { %5176 = sst [smem:[#allocation35_spill]] %s5149_s0 }
   0x2   :  { %5177 = sst [smem:[#allocation36_spill]] %s5150_s1 }
   0x3   :  { %5178 = sst [smem:[#allocation37_spill]] %s5151_s2 }
   0x4   :  { %5179 = sst [smem:[#allocation38_spill]] %s5152_s3 }
   0x5   :  { %5180 = sst [smem:[#allocation39_spill]] %s5162_s13 }
   0x6   :  { %18 = vsyncpa [#allocation3], 0 }
   0x7   :  { %20 = vsyncpa [#allocation3 + $0x1], 0 }
   0x8   :  { %21 = vsyncpa [#allocation6], 0 }
   0x9   :  { %22 = vsyncpa [#allocation9], 0 }
   0xa   :  { %23 = vsyncpa [#allocation12], 0 }
   0xb   :  { %24 = vsyncpa [#allocation15], 0 }
   0xc   :  { %25 = vsyncpa [#allocation18], 0 }
   0xd   :  { %26 = vsyncpa [#allocation21], 0 }
   0xe   :  { %27 = vsyncpa [#allocation4], 0 }
   0xf   :  { %29 = vsyncpa [#allocation4 + $0x1], 0  ;;  %s4458_s25 = smov 0   ;;  %s4460_s26 = smov 0  }
  0x10   :  { %s4462_s27 = smov 0   ;;  %s4464_s28 = smov 0  }
  0x11 LB: > { %5181 = sst [smem:[#allocation32_spill]] %s4351_s25  ;;  %s4365_s29 = smov [#allocation5]   ;;  %s4363_s28 = sphi %s4464_s28, %s5225_s28   ;;  %s4359_s27 = sphi %s4462_s27, %s5224_s27   ;;  %s4355_s26 = sphi %s4460_s26, %s5223_s26   ;;  %s4351_s25 = sphi %s4458_s25, %s5222_s25  }
  0x12   : > { %s357_s30 = sshll.u32 %s4365_s29, 4  ;;  %s4479_s14 = sadd.s32 4294967295, %s4363_s28   ;;  %s4484_s30 = int_to_ptr.vmem [resolvable:$true] %s357_s30 }
  0x13   : > { %5182 = sst [smem:[#allocation33_spill]] %s4479_s14  ;;  %p3056_p0 = scmp.ge.s32.totalorder %s4363_s28, 1 }
  0x14   : > { %p5169_p1 = scmp.eq.s32.totalorder %s4479_s14, 0  ;;  %p344_p2 = scmp.lt.s32.totalorder %s4363_s28, 3 }
  0x15   : > { %s4366_s16 = smov [#allocation8]   ;;  %s4367_s19 = smov [#allocation11]  }
  0x16   : > { %p4486_p3 = pnand %p3056_p0, %p344_p2  ;;  %s378_s17 = sshll.u32 %s4366_s16, 4  ;;  %s4493_s17 = int_to_ptr.vmem [resolvable:$true] %s378_s17 }
  0x17   : > { %s402_s20 = sshll.u32 %s4367_s19, 4  ;;  %s5186_s1 = sld [smem:[#allocation36_spill]]  ;;  %s4501_s20 = int_to_ptr.vmem [resolvable:$true] %s402_s20 }
  0x18   : > { %s5183_s15 = scalar_select %p4486_p3, 1, 0 }
  0x19   : > { %p3519_p5 = pneg %p4486_p3 }
  0x1a   : > { %5184 = sst [smem:[#allocation34_spill]] %s5183_s15 }
  0x1b   : > { %p4497_p6 = pnand %p3519_p5, %p5169_p1 }
  0x1d   : > { %s3907_s23 = scalar_lea.hbm %s5186_s1, 16  ;;  %p4511_p8 = pneg %p4497_p6 }
  0x1e   : > { %p3908_p7 = scmp.ne.s32.totalorder %s5186_s1, %s3907_s23  ;;  %p3914_p11 = scmp.lt.u32.totalorder %s3907_s23, %s5186_s1 }
  0x20   : > { %p3910_p9 = pnand %p4511_p8, %p3908_p7 }
  0x22   : > { %p3911_p10 = pneg %p3910_p9 }
  0x24   : > { %p3916_p12 = pnand %p3914_p11, %p3911_p10 }
  0x26   : > { %3919 = shalt.err (!%p3916_p12)
}
  0x27   : > { %s3920_s21 = scalar_lea.vmem %s4484_s30, 16  ;;  %s3927_s22 = scalar_lea.vmem %s4484_s30, 32 }
  0x28   : > { %p3921_p13 = scmp.ne.s32.totalorder %s4484_s30, %s3920_s21  ;;  %p3928_p5 = scmp.lt.s32.totalorder %s4484_s30, %s4484_s30 }
  0x29   : > { %p3929_p7 = scmp.lt.s32.totalorder %s3927_s22, %s3920_s21 }
  0x2a   : > { %p3923_p0 = pnand %p3921_p13, %p4511_p8 }
  0x2b   : > { %p3930_p9 = por %p3929_p7, %p3928_p5 }
  0x2c   : > { %p3924_p2 = pneg %p3923_p0 }
  0x2e   : > { %p3931_p4 = pnand %p3930_p9, %p3924_p2 }
  0x30   : > { %3934 = shalt.err (!%p3931_p4)
}
  0x31   : > { %3522 = dma.hbm_to_vmem [thread:$0]  (!%p4497_p6), %s5186_s1, 16, %s4484_s30, [#allocation6]  }
  0x32   : > { %s5188_s3 = sld [smem:[#allocation38_spill]] }
  0x38   : > { %s3935_s19 = scalar_lea.hbm %s5188_s3, 12288 }
  0x39   : > { %p3936_p10 = scmp.ne.s32.totalorder %s5188_s3, %s3935_s19  ;;  %p3942_p4 = scmp.lt.u32.totalorder %s3935_s19, %s5188_s3 }
  0x3b   : > { %p3938_p11 = pnand %p3936_p10, %p4511_p8 }
  0x3d   : > { %p3939_p12 = pneg %p3938_p11 }
  0x3f   : > { %p3944_p13 = pnand %p3942_p4, %p3939_p12 }
  0x41   : > { %3947 = shalt.err (!%p3944_p13)
}
  0x42   : > { %s3948_s30 = scalar_lea.vmem %s4493_s17, 12288  ;;  %p3956_p7 = scmp.lt.s32.totalorder %s4493_s17, %s4493_s17 }
  0x43   : > { %p3949_p0 = scmp.ne.s32.totalorder %s4493_s17, %s3948_s30  ;;  %p3957_p9 = scmp.lt.s32.totalorder %s3948_s30, %s3948_s30 }
  0x45   : > { %p3951_p2 = pnand %p3949_p0, %p4511_p8  ;;  %p3958_p10 = por %p3957_p9, %p3956_p7 }
  0x47   : > { %p3952_p5 = pneg %p3951_p2 }
  0x49   : > { %p3959_p11 = pnand %p3958_p10, %p3952_p5 }
  0x4b   : > { %3962 = shalt.err (!%p3959_p11)
}
  0x4c   : > { %s4368_s0 = smov 768   ;;  %s4369_s15 = smov 48  }
  0x4d   : > { %3528 = dma.hbm_to_vmem [thread:$0]  (!%p4497_p6), %s5188_s3, 12288, %s4493_s17, [#allocation9], %s4368_s0, %s4368_s0, %s4369_s15  }
  0x4e   : > { %s3963_s19 = scalar_lea.hbm %s5154_s5, 4096 }
  0x4f   : > { %p3964_p12 = scmp.ne.s32.totalorder %s5154_s5, %s3963_s19  ;;  %p3970_p0 = scmp.lt.u32.totalorder %s3963_s19, %s5154_s5 }
  0x51   : > { %p3966_p4 = pnand %p3964_p12, %p4511_p8 }
  0x53   : > { %p3967_p13 = pneg %p3966_p4 }
  0x55   : > { %p3972_p2 = pnand %p3970_p0, %p3967_p13 }
  0x57   : > { %3975 = shalt.err (!%p3972_p2)
}
  0x58   : > { %s3976_s17 = scalar_lea.vmem %s4501_s20, 4096  ;;  %p3984_p10 = scmp.lt.s32.totalorder %s4501_s20, %s4501_s20 }
  0x59   : > { %p3977_p5 = scmp.ne.s32.totalorder %s4501_s20, %s3976_s17  ;;  %p3985_p11 = scmp.lt.s32.totalorder %s3976_s17, %s3976_s17 }
  0x5b   : > { %p3979_p7 = pnand %p3977_p5, %p4511_p8  ;;  %p3986_p12 = por %p3985_p11, %p3984_p10 }
  0x5d   : > { %p3980_p9 = pneg %p3979_p7 }
  0x5f   : > { %p3987_p4 = pnand %p3986_p12, %p3980_p9 }
  0x61   : > { %3990 = shalt.err (!%p3987_p4)
}
  0x62   : > { %s5171_s0 = smov 64   ;;  %s5173_s1 = smov 4  }
  0x63   : > { %3534 = dma.hbm_to_vmem [thread:$0]  (!%p4497_p6), %s5154_s5, 4096, %s4501_s20, [#allocation12], %s5171_s0, %s5171_s0, %s5173_s1  }
  0x64   : > { %s4372_s23 = smov [#allocation14]   ;;  %s4373_s29 = smov [#allocation17]  }
  0x65   : > { %s427_s24 = sshll.u32 %s4372_s23, 4  ;;  %s448_s19 = sshll.u32 %s4373_s29, 4  ;;  %s428_s24 = int_to_ptr.vmem [resolvable:$true] %s427_s24  ;;  %s449_s19 = int_to_ptr.vmem [resolvable:$true] %s448_s19 }
  0x66   : > { %s3991_s30 = scalar_lea.hbm %s5156_s7, 16 }
  0x67   : > { %p3992_p13 = scmp.ne.s32.totalorder %s5156_s7, %s3991_s30  ;;  %p3998_p5 = scmp.lt.u32.totalorder %s3991_s30, %s5156_s7 }
  0x69   : > { %p3994_p0 = pnand %p3992_p13, %p4511_p8 }
  0x6b   : > { %p3995_p2 = pneg %p3994_p0 }
  0x6d   : > { %p4000_p7 = pnand %p3998_p5, %p3995_p2 }
  0x6f   : > { %4003 = shalt.err (!%p4000_p7)
}
  0x70   : > { %s4004_s20 = scalar_lea.vmem %s428_s24, 16  ;;  %s4011_s15 = scalar_lea.vmem %s428_s24, 32 }
  0x71   : > { %p4005_p9 = scmp.ne.s32.totalorder %s428_s24, %s4004_s20  ;;  %p4012_p12 = scmp.lt.s32.totalorder %s428_s24, %s428_s24 }
  0x72   : > { %p4013_p4 = scmp.lt.s32.totalorder %s4011_s15, %s4004_s20 }
  0x73   : > { %p4007_p10 = pnand %p4005_p9, %p4511_p8 }
  0x74   : > { %p4014_p1 = por %p4013_p4, %p4012_p12 }
  0x75   : > { %p4008_p11 = pneg %p4007_p10 }
  0x77   : > { %p4015_p3 = pnand %p4014_p1, %p4008_p11 }
  0x79   : > { %4018 = shalt.err (!%p4015_p3)
}
  0x7a   : > { %3540 = dma.hbm_to_vmem [thread:$0]  (!%p4497_p6), %s5156_s7, 16, %s428_s24, [#allocation15]  }
  0x7b   : > { %s4019_s23 = scalar_lea.hbm %s5158_s9, 2048 }
  0x7c   : > { %p4020_p13 = scmp.ne.s32.totalorder %s5158_s9, %s4019_s23  ;;  %p4026_p3 = scmp.lt.u32.totalorder %s4019_s23, %s5158_s9 }
  0x7e   : > { %p4022_p0 = pnand %p4020_p13, %p4511_p8 }
  0x80   : > { %p4023_p1 = pneg %p4022_p0 }
  0x82   : > { %p4028_p2 = pnand %p4026_p3, %p4023_p1 }
  0x84   : > { %4031 = shalt.err (!%p4028_p2)
}
  0x85   : > { %s4032_s17 = scalar_lea.vmem %s449_s19, 2048  ;;  %p4040_p10 = scmp.lt.s32.totalorder %s449_s19, %s449_s19 }
  0x86   : > { %p4033_p5 = scmp.ne.s32.totalorder %s449_s19, %s4032_s17  ;;  %p4041_p11 = scmp.lt.s32.totalorder %s4032_s17, %s4032_s17 }
  0x88   : > { %p4035_p7 = pnand %p4033_p5, %p4511_p8  ;;  %p4042_p12 = por %p4041_p11, %p4040_p10 }
  0x8a   : > { %p4036_p9 = pneg %p4035_p7 }
  0x8c   : > { %p4043_p4 = pnand %p4042_p12, %p4036_p9 }
  0x8e   : > { %4046 = shalt.err (!%p4043_p4)
}
  0x8f   : > { %s4374_s24 = smov 128   ;;  %s4375_s20 = smov 8  }
  0x90   : > { %3546 = dma.hbm_to_vmem [thread:$0]  (!%p4497_p6), %s5158_s9, 2048, %s449_s19, [#allocation18], %s4374_s24, %s4374_s24, %s4375_s20  }
  0x91   : > { %s4376_s13 = smov [#allocation20]   ;;  %s4377_s14 = smov [#allocation7]  }
  0x92   : > { %s472_s25 = sshll.u32 %s4376_s13, 4  ;;  %s368_s23 = sshll.u32 %s4377_s14, 4  ;;  %s473_s25 = int_to_ptr.vmem [resolvable:$true] %s472_s25  ;;  %s369_s23 = int_to_ptr.vmem [resolvable:$true] %s368_s23 }
  0x93   : > { %s4047_s22 = scalar_lea.hbm %s5160_s11, 2048 }
  0x94   : > { %p4048_p13 = scmp.ne.s32.totalorder %s5160_s11, %s4047_s22  ;;  %p4054_p3 = scmp.lt.u32.totalorder %s4047_s22, %s5160_s11 }
  0x96   : > { %p4050_p0 = pnand %p4048_p13, %p4511_p8 }
  0x98   : > { %p4051_p1 = pneg %p4050_p0 }
  0x9a   : > { %p4056_p2 = pnand %p4054_p3, %p4051_p1 }
  0x9c   : > { %4059 = shalt.err (!%p4056_p2)
}
  0x9d   : > { %s4060_s19 = scalar_lea.vmem %s473_s25, 2048  ;;  %p4068_p10 = scmp.lt.s32.totalorder %s473_s25, %s473_s25 }
  0x9e   : > { %p4061_p5 = scmp.ne.s32.totalorder %s473_s25, %s4060_s19  ;;  %p4069_p11 = scmp.lt.s32.totalorder %s4060_s19, %s4060_s19 }
  0xa0   : > { %p4063_p7 = pnand %p4061_p5, %p4511_p8  ;;  %p4070_p12 = por %p4069_p11, %p4068_p10 }
  0xa2   : > { %p4064_p9 = pneg %p4063_p7 }
  0xa4   : > { %p4071_p4 = pnand %p4070_p12, %p4064_p9 }
  0xa6   : > { %4074 = shalt.err (!%p4071_p4)
}
  0xa7   : > { %s5189_s24 = smov 4   ;;  %s5190_s20 = smov 64  }
  0xa8   : > { %3552 = dma.hbm_to_vmem [thread:$0]  (!%p4497_p6), %s5160_s11, 2048, %s473_s25, [#allocation21], %s5190_s20, %s5190_s20, %s5189_s24  }
  0xa9   : > { %s5191_s2 = sld [smem:[#allocation37_spill]] }
  0xaf   : > { %s4075_s13 = scalar_lea.hbm %s5191_s2, 16 }
  0xb0   : > { %p4076_p13 = scmp.ne.s32.totalorder %s5191_s2, %s4075_s13  ;;  %p4082_p3 = scmp.lt.u32.totalorder %s4075_s13, %s5191_s2 }
  0xb2   : > { %p4078_p0 = pnand %p4076_p13, %p4511_p8 }
  0xb4   : > { %p4079_p1 = pneg %p4078_p0 }
  0xb6   : > { %p4084_p2 = pnand %p4082_p3, %p4079_p1 }
  0xb8   : > { %4087 = shalt.err (!%p4084_p2)
}
  0xb9   : > { %s4088_s30 = scalar_lea.vmem %s369_s23, 16  ;;  %s4095_s25 = scalar_lea.vmem %s369_s23, 32 }
  0xba   : > { %p4089_p5 = scmp.ne.s32.totalorder %s369_s23, %s4088_s30  ;;  %p4096_p10 = scmp.lt.s32.totalorder %s369_s23, %s369_s23 }
  0xbb   : > { %p4097_p11 = scmp.lt.s32.totalorder %s4095_s25, %s4088_s30 }
  0xbc   : > { %p4091_p7 = pnand %p4089_p5, %p4511_p8 }
  0xbd   : > { %p4098_p12 = por %p4097_p11, %p4096_p10 }
  0xbe   : > { %p4092_p9 = pneg %p4091_p7 }
  0xc0   : > { %p4099_p4 = pnand %p4098_p12, %p4092_p9 }
  0xc2   : > { %4102 = shalt.err (!%p4099_p4)
}
  0xc3   : > { %3525 = dma.hbm_to_vmem [thread:$0]  (!%p4497_p6), %s5191_s2, 16, %s369_s23, [#allocation6]  }
  0xc4   : > { %s4378_s0 = smov [#allocation10]   ;;  %s4379_s15 = smov [#allocation13]  }
  0xc5   : > { %s392_s1 = sshll.u32 %s4378_s0, 4  ;;  %s416_s3 = sshll.u32 %s4379_s15, 4  ;;  %s393_s1 = int_to_ptr.vmem [resolvable:$true] %s392_s1  ;;  %s417_s3 = int_to_ptr.vmem [resolvable:$true] %s416_s3 }
  0xc6   : > { %s4103_s29 = scalar_lea.hbm %s5153_s4, 192 }
  0xc7   : > { %p4104_p13 = scmp.ne.s32.totalorder %s5153_s4, %s4103_s29  ;;  %p4110_p3 = scmp.lt.u32.totalorder %s4103_s29, %s5153_s4 }
  0xc9   : > { %p4106_p0 = pnand %p4104_p13, %p4511_p8 }
  0xcb   : > { %p4107_p1 = pneg %p4106_p0 }
  0xcd   : > { %p4112_p2 = pnand %p4110_p3, %p4107_p1 }
  0xcf   : > { %4115 = shalt.err (!%p4112_p2)
}
  0xd0   : > { %s4116_s23 = scalar_lea.vmem %s393_s1, 192  ;;  %p4124_p10 = scmp.lt.s32.totalorder %s393_s1, %s393_s1 }
  0xd1   : > { %p4117_p5 = scmp.ne.s32.totalorder %s393_s1, %s4116_s23  ;;  %p4125_p11 = scmp.lt.s32.totalorder %s4116_s23, %s4116_s23 }
  0xd3   : > { %p4119_p7 = pnand %p4117_p5, %p4511_p8  ;;  %p4126_p12 = por %p4125_p11, %p4124_p10 }
  0xd5   : > { %p4120_p9 = pneg %p4119_p7 }
  0xd7   : > { %p4127_p4 = pnand %p4126_p12, %p4120_p9 }
  0xd9   : > { %4130 = shalt.err (!%p4127_p4)
}
  0xda   : > { %3531 = dma.hbm_to_vmem [thread:$0]  (!%p4497_p6), %s5153_s4, 192, %s393_s1, [#allocation9]  }
  0xdb   : > { %s4131_s13 = scalar_lea.hbm %s5155_s6, 16 }
  0xdc   : > { %p4132_p13 = scmp.ne.s32.totalorder %s5155_s6, %s4131_s13  ;;  %p4138_p3 = scmp.lt.u32.totalorder %s4131_s13, %s5155_s6 }
  0xde   : > { %p4134_p0 = pnand %p4132_p13, %p4511_p8 }
  0xe0   : > { %p4135_p1 = pneg %p4134_p0 }
  0xe2   : > { %p4140_p2 = pnand %p4138_p3, %p4135_p1 }
  0xe4   : > { %4143 = shalt.err (!%p4140_p2)
}
  0xe5   : > { %s4144_s30 = scalar_lea.vmem %s417_s3, 16  ;;  %s4151_s1 = scalar_lea.vmem %s417_s3, 32 }
  0xe6   : > { %p4145_p5 = scmp.ne.s32.totalorder %s417_s3, %s4144_s30  ;;  %p4152_p10 = scmp.lt.s32.totalorder %s417_s3, %s417_s3 }
  0xe7   : > { %p4153_p11 = scmp.lt.s32.totalorder %s4151_s1, %s4144_s30 }
  0xe8   : > { %p4147_p7 = pnand %p4145_p5, %p4511_p8 }
  0xe9   : > { %p4154_p12 = por %p4153_p11, %p4152_p10 }
  0xea   : > { %p4148_p9 = pneg %p4147_p7 }
  0xec   : > { %p4155_p4 = pnand %p4154_p12, %p4148_p9 }
  0xee   : > { %4158 = shalt.err (!%p4155_p4)
}
  0xef   : > { %3537 = dma.hbm_to_vmem [thread:$0]  (!%p4497_p6), %s5155_s6, 16, %s417_s3, [#allocation12]  }
  0xf0   : > { %s4380_s17 = smov [#allocation16]   ;;  %s4381_s0 = smov [#allocation19]  }
  0xf1   : > { %s438_s19 = sshll.u32 %s4380_s17, 4  ;;  %s462_s15 = sshll.u32 %s4381_s0, 4  ;;  %s439_s19 = int_to_ptr.vmem [resolvable:$true] %s438_s19  ;;  %s463_s15 = int_to_ptr.vmem [resolvable:$true] %s462_s15 }
  0xf2   : > { %s4159_s29 = scalar_lea.hbm %s5157_s8, 16 }
  0xf3   : > { %p4160_p13 = scmp.ne.s32.totalorder %s5157_s8, %s4159_s29  ;;  %p4166_p3 = scmp.lt.u32.totalorder %s4159_s29, %s5157_s8 }
  0xf5   : > { %p4162_p0 = pnand %p4160_p13, %p4511_p8 }
  0xf7   : > { %p4163_p1 = pneg %p4162_p0 }
  0xf9   : > { %p4168_p2 = pnand %p4166_p3, %p4163_p1 }
  0xfb   : > { %4171 = shalt.err (!%p4168_p2)
}
  0xfc   : > { %s4172_s3 = scalar_lea.vmem %s439_s19, 16  ;;  %s4179_s25 = scalar_lea.vmem %s439_s19, 32 }
  0xfd   : > { %p4173_p5 = scmp.ne.s32.totalorder %s439_s19, %s4172_s3  ;;  %p4180_p10 = scmp.lt.s32.totalorder %s439_s19, %s439_s19 }
  0xfe   : > { %p4181_p11 = scmp.lt.s32.totalorder %s4179_s25, %s4172_s3 }
  0xff   : > { %p4175_p7 = pnand %p4173_p5, %p4511_p8 }
 0x100   : > { %p4182_p12 = por %p4181_p11, %p4180_p10 }
 0x101   : > { %p4176_p9 = pneg %p4175_p7 }
 0x103   : > { %p4183_p4 = pnand %p4182_p12, %p4176_p9 }
 0x105   : > { %4186 = shalt.err (!%p4183_p4)
}
 0x106   : > { %3543 = dma.hbm_to_vmem [thread:$0]  (!%p4497_p6), %s5157_s8, 16, %s439_s19, [#allocation15]  }
 0x107   : > { %s4187_s14 = scalar_lea.hbm %s5159_s10, 32 }
 0x108   : > { %p4188_p13 = scmp.ne.s32.totalorder %s5159_s10, %s4187_s14  ;;  %p4194_p3 = scmp.lt.u32.totalorder %s4187_s14, %s5159_s10 }
 0x10a   : > { %p4190_p0 = pnand %p4188_p13, %p4511_p8 }
 0x10c   : > { %p4191_p1 = pneg %p4190_p0 }
 0x10e   : > { %p4196_p2 = pnand %p4194_p3, %p4191_p1 }
 0x110   : > { %4199 = shalt.err (!%p4196_p2)
}
 0x111   : > { %s4200_s1 = scalar_lea.vmem %s463_s15, 32  ;;  %p4208_p10 = scmp.lt.s32.totalorder %s463_s15, %s463_s15 }
 0x112   : > { %p4201_p5 = scmp.ne.s32.totalorder %s463_s15, %s4200_s1  ;;  %p4209_p11 = scmp.lt.s32.totalorder %s4200_s1, %s4200_s1 }
 0x114   : > { %p4203_p7 = pnand %p4201_p5, %p4511_p8  ;;  %p4210_p12 = por %p4209_p11, %p4208_p10 }
 0x116   : > { %p4204_p9 = pneg %p4203_p7 }
 0x118   : > { %p4211_p4 = pnand %p4210_p12, %p4204_p9 }
 0x11a   : > { %4214 = shalt.err (!%p4211_p4)
}
 0x11b   : > { %3549 = dma.hbm_to_vmem [thread:$0]  (!%p4497_p6), %s5159_s10, 32, %s463_s15, [#allocation18]  }
 0x11c   : > { %s4382_s25 = smov [#allocation22]   ;;  %s4215_s13 = scalar_lea.hbm %s5161_s12, 16 }
 0x11d   : > { %s486_s23 = sshll.u32 %s4382_s25, 4  ;;  %p4216_p13 = scmp.ne.s32.totalorder %s5161_s12, %s4215_s13  ;;  %s487_s23 = int_to_ptr.vmem [resolvable:$true] %s486_s23 }
 0x11e   : > { %p4222_p3 = scmp.lt.u32.totalorder %s4215_s13, %s5161_s12 }
 0x11f   : > { %p4218_p0 = pnand %p4216_p13, %p4511_p8 }
 0x121   : > { %p4219_p1 = pneg %p4218_p0 }
 0x123   : > { %p4224_p2 = pnand %p4222_p3, %p4219_p1 }
 0x125   : > { %4227 = shalt.err (!%p4224_p2)
}
 0x126   : > { %s4228_s15 = scalar_lea.vmem %s487_s23, 16  ;;  %s4235_s30 = scalar_lea.vmem %s487_s23, 32 }
 0x127   : > { %p4229_p5 = scmp.ne.s32.totalorder %s487_s23, %s4228_s15  ;;  %p4236_p10 = scmp.lt.s32.totalorder %s487_s23, %s487_s23 }
 0x128   : > { %p4237_p11 = scmp.lt.s32.totalorder %s4235_s30, %s4228_s15 }
 0x129   : > { %p4231_p7 = pnand %p4229_p5, %p4511_p8 }
 0x12a   : > { %p4238_p12 = por %p4237_p11, %p4236_p10 }
 0x12b   : > { %p4232_p9 = pneg %p4231_p7 }
 0x12d   : > { %p4239_p4 = pnand %p4238_p12, %p4232_p9 }
 0x12f   : > { %4242 = shalt.err (!%p4239_p4)
}
 0x130   : > { %s5192_s16 = sld [smem:[#allocation32_spill]]  ;;  %s5193_s3 = sld [smem:[#allocation33_spill]] }
 0x131   : > { %3555 = dma.hbm_to_vmem [thread:$0]  (!%p4497_p6), %s5161_s12, 16, %s487_s23, [#allocation21]  }
 0x132   : > { %s3055_s25 = sadd.s32 4294967294, %s4363_s28   ;;  %s4749_s18 = sadd.s32 1, %s4363_s28  }
 0x133   : > { %s39_s17 = ssub.s32 %s4363_s28, %s4749_s18  ;;  %s42_s0 = sadd.s32 1, %s4359_s27 }
 0x134   : > { %p40_p8 = scmp.eq.s32.totalorder %s39_s17, 0  ;;  %p49_p13 = scmp.ne.s32.totalorder %s4359_s27, %s4355_s26 }
 0x135   : > { %p50_p0 = scmp.eq.s32.totalorder %s4363_s28, 0  ;;  %p337_p7 = scmp.eq.s32.totalorder %s3055_s25, 1 }
 0x136   : > { %p55_p1 = scmp.ne.s32.totalorder %s4355_s26, %s5192_s16  ;;  %p5195_p2 = scmp.eq.s32.totalorder %s5193_s3, 0 }
 0x137   : > { %s4760_s13 = scalar_select %p40_p8, %s4359_s27, %s42_s0  }
 0x138   : > { %p4762_p3 = por %p50_p0, %p49_p13  ;;  %p4768_p6 = por %p5195_p2, %p55_p1 }
 0x139   : > { %p331_p5 = scmp.eq.s32.totalorder %s5193_s3, 1  ;;  %p3576_p9 = scmp.lt.s32.totalorder %s4363_s28, 2 }
 0x13a   : > { %s497_s29 = sand.u32 1, %s4359_s27   ;;  %p4779_p11 = por %p337_p7, %p55_p1 }
 0x13b   : > { %p4775_p10 = por %p331_p5, %p49_p13  ;;  %s3070_s15 = sshll.u32 %s497_s29, 3 }
 0x13c   : > { %s5198_s22 = scalar_select %p4779_p11, 1, 0 }
 0x13d   : > { %s5197_s21 = scalar_select %p4775_p10, 1, 0 }
 0x13e   : > { %s3260_s30 = sshll.u32 %s4363_s28, 7  ;;  %s5199_s16 = sld [smem:[#allocation35_spill]] }
 0x13f   : > { %s501_s3 = scalar_lea.vmem [#allocation2], %s3070_s15  ;;  %p4793_p12 = pnand %p3576_p9, %p4762_p3 }
 0x140   : > { %s508_s25 = sshll.u32 %s501_s3, 4  ;;  %s4797_s2 = scalar_lea.sflag [#allocation3], %s497_s29  ;;  %s4789_s25 = int_to_ptr.vmem [resolvable:$true] %s508_s25 }
 0x141   : > { %p4245_p8 = pneg %p4793_p12 }
 0x144   : > { %s4787_s17 = scalar_lea.hbm %s5199_s16, %s3260_s30  ;;  %s4248_s14 = scalar_lea.hbm %s5199_s16, 256 }
 0x145   : > { %s4243_s1 = scalar_lea.hbm %s4787_s17, 128  ;;  %p4249_p1 = scmp.lt.u32.totalorder %s4787_s17, %s5199_s16 }
 0x146   : > { %p4244_p4 = scmp.ne.s32.totalorder %s4787_s17, %s4243_s1  ;;  %p4250_p3 = scmp.lt.u32.totalorder %s4248_s14, %s4243_s1 }
 0x147   : > { %p4252_p5 = scmp.lt.u32.totalorder %s4243_s1, %s4787_s17 }
 0x148   : > { %p4246_p13 = pnand %p4245_p8, %p4244_p4  ;;  %p4251_p2 = por %p4250_p3, %p4249_p1 }
 0x14a   : > { %p4247_p0 = pneg %p4246_p13  ;;  %p4253_p7 = por %p4252_p5, %p4251_p2 }
 0x14c   : > { %p4254_p9 = pnand %p4253_p7, %p4247_p0 }
 0x14e   : > { %4257 = shalt.err (!%p4254_p9)
}
 0x14f   : > { %s4258_s29 = scalar_lea.vmem %s4789_s25, 128  ;;  %s4383_s15 = smov [#allocation2]  }
 0x150   : > { %p4259_p4 = scmp.ne.s32.totalorder %s4789_s25, %s4258_s29  ;;  %s4263_s30 = sshll.u32 %s4383_s15, 4  ;;  %s4264_s30 = int_to_ptr.vmem [resolvable:$false] %s4263_s30 }
 0x151   : > { %s4265_s19 = scalar_lea.vmem %s4264_s30, 256  ;;  %p4266_p10 = scmp.lt.s32.totalorder %s4789_s25, %s4264_s30 }
 0x152   : > { %p4261_p13 = pnand %p4259_p4, %p4245_p8  ;;  %p4267_p1 = scmp.lt.s32.totalorder %s4265_s19, %s4258_s29 }
 0x154   : > { %p4262_p11 = pneg %p4261_p13  ;;  %p4268_p3 = por %p4267_p1, %p4266_p10 }
 0x156   : > { %p4269_p2 = pnand %p4268_p3, %p4262_p11 }
 0x158   : > { %4272 = shalt.err (!%p4269_p2)
}
 0x159   : > { %3559 = dma.hbm_to_vmem [thread:$0]  (!%p4793_p12), %s4787_s17, 128, %s4789_s25, %s4797_s2, %s5190_s20, %s5190_s20, %s5189_s24  }
 0x15a   : > { %s5201_s1 = sld [smem:[#allocation34_spill]] }
 0x160   : > { %p5202_p8 = scmp.ne.s32.totalorder %s5201_s1, 0 }
 0x161   : > { %s4831_s14 = sand.u32 (!%p5202_p8), 1, %s4355_s26  }
 0x162   : > { %520 = sbr.rel (%p5202_p8) target bundleno = 4538 (0x11ba), region = 72  ;;  %s3074_s3 = sshll.u32 (!%p5202_p8), %s4831_s14, 3 }
 0x163   : > { %s523_s29 = scalar_lea.sflag (!%p5202_p8), [#allocation3], %s4831_s14  ;;  %s526_s15 = scalar_lea.vmem (!%p5202_p8), [#allocation2], %s3074_s3 }
 0x169   : > { %4318 = dma.done.wait (%p4768_p6), %s523_s29, 128  }
 0x16a   : > { %4320 = vsyncadd (%p4768_p6), %s523_s29, 4294967168  ;;  %s5203_s0 = sld [smem:[#allocation33_spill]] }
 0x170   : > { %p5204_p10 = scmp.eq.s32.totalorder %s5203_s0, 0 }
 0x172   : > { %4322 = dma.done.wait (%p5204_p10), [#allocation6], 32   ;;  %p5205_p11 = pmov %p5204_p10 }
 0x173   : > { %p5206_p12 = pmov %p5204_p10 }
 0x174   : > { %4324 = vsyncadd (%p5205_p11), [#allocation6], 4294967264 }
 0x175   : > { %4326 = dma.done.wait (%p5206_p12), [#allocation9], 12480   ;;  %p5207_p0 = pmov %p5204_p10 }
 0x177   : > { %4328 = vsyncadd (%p5207_p0), [#allocation9], 4294954816  ;;  %p5208_p5 = pmov %p5207_p0 }
 0x178   : > { %p5209_p7 = pmov %p5207_p0 }
 0x179   : > { %4330 = dma.done.wait (%p5208_p5), [#allocation12], 4112  }
 0x17a   : > { %4332 = vsyncadd (%p5209_p7), [#allocation12], 4294963184  ;;  %p5210_p6 = pmov %p5207_p0 }
 0x17b   : > { %p5211_p9 = pmov %p5207_p0 }
 0x17c   : > { %4334 = dma.done.wait (%p5210_p6), [#allocation15], 32  }
 0x17d   : > { %4336 = vsyncadd (%p5211_p9), [#allocation15], 4294967264  ;;  %p5212_p4 = pmov %p5207_p0 }
 0x17e   : > { %p5213_p13 = pmov %p5207_p0 }
 0x17f   : > { %4338 = dma.done.wait (%p5212_p4), [#allocation18], 2080  }
 0x180   : > { %4340 = vsyncadd (%p5213_p13), [#allocation18], 4294965216  ;;  %p5214_p1 = pmov %p5207_p0 }
 0x181   : > { %p5215_p3 = pmov %p5207_p0 }
 0x182   : > { %4342 = dma.done.wait (%p5214_p1), [#allocation21], 2064  }
 0x183   : > { %4344 = vsyncadd (%p5215_p3), [#allocation21], 4294965232  ;;  %v3262_v0 = vld [vmem:[%s526_s15] sm:$0xff]   ;;  %v4384_v44 = vmov 0   ;;  %v3087_v54 = vld [vmem:[#allocation5] ss:$0 sm:$0xff] }
 0x184   : > { %v4863_v1 = vunpack.c.l.bf16 %v3262_v0  ;;  %v4866_v2 = vunpack.c.h.bf16 %v3262_v0  ;;  %v3643_v3 = vld [vmem:[#allocation8 + $0x4] ss:$48 sps:$4 sm:$0xff]   ;;  %v3645_v4 = vld [vmem:[#allocation8 + $0xc] ss:$48 sps:$4 sm:$0xff]   ;;  %v3647_v5 = vld [vmem:[#allocation8] ss:$48 sps:$4 sm:$0xff]   ;;  %1336 = vmatprep.mubr.bf16.mxu0 %v4384_v44  ;;  %1379 = vmatprep.mubr.bf16.mxu1 %v4384_v44 }
 0x185   : > { %v3648_v6 = vld [vmem:[#allocation8 + $0x8] ss:$48 sps:$4 sm:$0xff]   ;;  %v3649_v7 = vld [vmem:[#allocation8 + $0x64] ss:$48 sps:$4 sm:$0xff]   ;;  %v3651_v8 = vld [vmem:[#allocation8 + $0x6c] ss:$48 sps:$4 sm:$0xff]   ;;  %1304 = vmatprep.subr.bf16.mxu0 %v3643_v3  ;;  %1347 = vmatprep.subr.bf16.mxu1 %v3645_v4 }
 0x186   : > { %624 = vadd.xlane.f32.xlu0 %v4863_v1  ;;  %v3653_v9 = vld [vmem:[#allocation8 + $0x60] ss:$48 sps:$4 sm:$0xff]   ;;  %1305 = vmatpush1.bf16.msra.mxu0 %v3647_v5  ;;  %v3654_v10 = vld [vmem:[#allocation8 + $0x68] ss:$48 sps:$4 sm:$0xff]   ;;  %v3655_v19 = vld [vmem:[#allocation8 + $0xc4] ss:$48 sps:$4 sm:$0xff]  }
 0x187   : > { %1348 = vmatpush1.bf16.msra.mxu1 %v3648_v6  ;;  %1306 = vmatprep.subr.bf16.mxu0 %v3649_v7  ;;  %v3657_v20 = vld [vmem:[#allocation8 + $0xcc] ss:$48 sps:$4 sm:$0xff]   ;;  %v3659_v21 = vld [vmem:[#allocation8 + $0xc0] ss:$48 sps:$4 sm:$0xff]   ;;  %v3660_v22 = vld [vmem:[#allocation8 + $0xc8] ss:$48 sps:$4 sm:$0xff]  }
 0x188   : > { %1349 = vmatprep.subr.bf16.mxu1 %v3651_v8  ;;  %v3661_v23 = vld [vmem:[#allocation8 + $0x124] ss:$48 sps:$4 sm:$0xff]   ;;  %v3663_v24 = vld [vmem:[#allocation8 + $0x12c] ss:$48 sps:$4 sm:$0xff]   ;;  %v3665_v25 = vld [vmem:[#allocation8 + $0x120] ss:$48 sps:$4 sm:$0xff]  }
 0x189   : > { %v3666_v26 = vld [vmem:[#allocation8 + $0x128] ss:$48 sps:$4 sm:$0xff]   ;;  %v3667_v27 = vld [vmem:[#allocation8 + $0x184] ss:$48 sps:$4 sm:$0xff]   ;;  %v3669_v28 = vld [vmem:[#allocation8 + $0x18c] ss:$48 sps:$4 sm:$0xff]  }
 0x18a   : > { %626 = vadd.xlane.f32.xlu0 %v4866_v2  ;;  %1307 = vmatpush1.bf16.msra.mxu0 %v3653_v9  ;;  %v3671_v29 = vld [vmem:[#allocation8 + $0x180] ss:$48 sps:$4 sm:$0xff]   ;;  %v3672_v30 = vld [vmem:[#allocation8 + $0x188] ss:$48 sps:$4 sm:$0xff]   ;;  %v3673_v31 = vld [vmem:[#allocation8 + $0x1e4] ss:$48 sps:$4 sm:$0xff]  }
 0x18b   : > { %1350 = vmatpush1.bf16.msra.mxu1 %v3654_v10  ;;  %1308 = vmatprep.subr.bf16.mxu0 %v3655_v19  ;;  %v3675_v32 = vld [vmem:[#allocation8 + $0x1ec] ss:$48 sps:$4 sm:$0xff]   ;;  %v3677_v33 = vld [vmem:[#allocation8 + $0x1e0] ss:$48 sps:$4 sm:$0xff]   ;;  %v3678_v34 = vld [vmem:[#allocation8 + $0x1e8] ss:$48 sps:$4 sm:$0xff]  }
 0x18c   : > { %1351 = vmatprep.subr.bf16.mxu1 %v3657_v20  ;;  %v3679_v35 = vld [vmem:[#allocation8 + $0x244] ss:$48 sps:$4 sm:$0xff]   ;;  %v3681_v36 = vld [vmem:[#allocation8 + $0x24c] ss:$48 sps:$4 sm:$0xff]   ;;  %v3683_v37 = vld [vmem:[#allocation8 + $0x240] ss:$48 sps:$4 sm:$0xff]  }
 0x18d   : > { %v3684_v38 = vld [vmem:[#allocation8 + $0x248] ss:$48 sps:$4 sm:$0xff]   ;;  %v3685_v39 = vld [vmem:[#allocation8 + $0x2a4] ss:$48 sps:$4 sm:$0xff]   ;;  %v3687_v40 = vld [vmem:[#allocation8 + $0x2ac] ss:$48 sps:$4 sm:$0xff]  }
 0x18e   : > { %1309 = vmatpush1.bf16.msra.mxu0 %v3659_v21  ;;  %v3689_v41 = vld [vmem:[#allocation8 + $0x2a0] ss:$48 sps:$4 sm:$0xff]   ;;  %v3690_v42 = vld [vmem:[#allocation8 + $0x2a8] ss:$48 sps:$4 sm:$0xff]   ;;  %v3693_v43 = vld [vmem:[#allocation8 + $0x14] ss:$48 sps:$4 sm:$0xff]  }
 0x18f   : > { %1352 = vmatpush1.bf16.msra.mxu1 %v3660_v22  ;;  %1310 = vmatprep.subr.bf16.mxu0 %v3661_v23  ;;  %v3696_v45 = vld [vmem:[#allocation8 + $0x1c] ss:$48 sps:$4 sm:$0xff]   ;;  %v3691_v62 = vld [vmem:[#allocation8 + $0x10] ss:$48 sps:$4 sm:$0xff]   ;;  %v3694_v63 = vld [vmem:[#allocation8 + $0x18] ss:$48 sps:$4 sm:$0xff]  }
 0x190   : > { %1353 = vmatprep.subr.bf16.mxu1 %v3663_v24  ;;  %v3088_v58 = vld [vmem:[#allocation7] ss:$0 sm:$0xff]  ;;  %v3699_v3 = vld [vmem:[#allocation8 + $0x74] ss:$48 sps:$4 sm:$0xff]   ;;  %v3697_v5 = vld [vmem:[#allocation8 + $0x70] ss:$48 sps:$4 sm:$0xff]  }
 0x191   : > { %v3702_v4 = vld [vmem:[#allocation8 + $0x7c] ss:$48 sps:$4 sm:$0xff]   ;;  %v3700_v6 = vld [vmem:[#allocation8 + $0x78] ss:$48 sps:$4 sm:$0xff]   ;;  %v3705_v7 = vld [vmem:[#allocation8 + $0xd4] ss:$48 sps:$4 sm:$0xff]  }
 0x192   : > { %1311 = vmatpush1.bf16.msra.mxu0 %v3665_v25  ;;  %v3708_v8 = vld [vmem:[#allocation8 + $0xdc] ss:$48 sps:$4 sm:$0xff]   ;;  %v3703_v9 = vld [vmem:[#allocation8 + $0xd0] ss:$48 sps:$4 sm:$0xff]   ;;  %v3706_v10 = vld [vmem:[#allocation8 + $0xd8] ss:$48 sps:$4 sm:$0xff]  }
 0x193   : > { %1354 = vmatpush1.bf16.msra.mxu1 %v3666_v26  ;;  %1312 = vmatprep.subr.bf16.mxu0 %v3667_v27  ;;  %v3723_v19 = vld [vmem:[#allocation8 + $0x1f4] ss:$48 sps:$4 sm:$0xff]   ;;  %v3726_v20 = vld [vmem:[#allocation8 + $0x1fc] ss:$48 sps:$4 sm:$0xff]   ;;  %v3721_v21 = vld [vmem:[#allocation8 + $0x1f0] ss:$48 sps:$4 sm:$0xff]  }
 0x194   : > { %1355 = vmatprep.subr.bf16.mxu1 %v3669_v28  ;;  %v3724_v22 = vld [vmem:[#allocation8 + $0x1f8] ss:$48 sps:$4 sm:$0xff]   ;;  %v3729_v23 = vld [vmem:[#allocation8 + $0x254] ss:$48 sps:$4 sm:$0xff]   ;;  %v3732_v24 = vld [vmem:[#allocation8 + $0x25c] ss:$48 sps:$4 sm:$0xff]  }
 0x195   : > { %v3727_v25 = vld [vmem:[#allocation8 + $0x250] ss:$48 sps:$4 sm:$0xff]   ;;  %v3730_v26 = vld [vmem:[#allocation8 + $0x258] ss:$48 sps:$4 sm:$0xff]   ;;  %v3735_v27 = vld [vmem:[#allocation8 + $0x2b4] ss:$48 sps:$4 sm:$0xff]  }
 0x196   : > { %1313 = vmatpush1.bf16.msra.mxu0 %v3671_v29  ;;  %v3738_v28 = vld [vmem:[#allocation8 + $0x2bc] ss:$48 sps:$4 sm:$0xff]   ;;  %v3733_v29 = vld [vmem:[#allocation8 + $0x2b0] ss:$48 sps:$4 sm:$0xff]   ;;  %vm4386_vm0 = vmmov 0   ;;  %vm1606_vm1 = vcmask 130048  }
 0x197   : > { %1356 = vmatpush1.bf16.msra.mxu1 %v3672_v30  ;;  %1314 = vmatprep.subr.bf16.mxu0 %v3673_v31  ;;  %v3736_v30 = vld [vmem:[#allocation8 + $0x2b8] ss:$48 sps:$4 sm:$0xff]   ;;  %v3741_v31 = vld [vmem:[#allocation8 + $0x24] ss:$48 sps:$4 sm:$0xff]   ;;  %s3257_s2 = sshll.u32 %s5203_s0, 4  ;;  %s615_s24 = scalar_lea.vmem [#allocation23], %s4831_s14 }
 0x198   : > { %1357 = vmatprep.subr.bf16.mxu1 %v3675_v32  ;;  %v3744_v32 = vld [vmem:[#allocation8 + $0x2c] ss:$48 sps:$4 sm:$0xff]   ;;  %s2875_s20 = sshll.u32 %s615_s24, 4  ;;  %s5216_s25 = sld [smem:[#allocation39_spill]]  ;;  %s5107_s20 = int_to_ptr.vmem [resolvable:$true] %s2875_s20 }
 0x199   : > { %s2863_s1 = scalar_lea.sflag [#allocation4], %s4831_s14  ;;  %s4273_s3 = scalar_lea.vmem %s5107_s20, 16 }
 0x19a   : > { %1315 = vmatpush1.bf16.msra.mxu0 %v3677_v33  ;;  %v3739_v33 = vld [vmem:[#allocation8 + $0x20] ss:$48 sps:$4 sm:$0xff]   ;;  %p4274_p2 = scmp.ne.s32.totalorder %s5107_s20, %s4273_s3  ;;  %p5218_p8 = scmp.ne.s32.totalorder %s5197_s21, 0 }
 0x19b   : > { %1358 = vmatpush1.bf16.msra.mxu1 %v3678_v34  ;;  %1316 = vmatprep.subr.bf16.mxu0 %v3679_v35  ;;  %v3742_v34 = vld [vmem:[#allocation8 + $0x28] ss:$48 sps:$4 sm:$0xff]   ;;  %v3747_v35 = vld [vmem:[#allocation8 + $0x84] ss:$48 sps:$4 sm:$0xff]   ;;  %s4387_s29 = smov [#allocation23]  }
 0x19c   : > { %1359 = vmatprep.subr.bf16.mxu1 %v3681_v36  ;;  %v3750_v36 = vld [vmem:[#allocation8 + $0x8c] ss:$48 sps:$4 sm:$0xff]   ;;  %p4275_p10 = pnand %p4274_p2, %p5218_p8  ;;  %s4277_s15 = sshll.u32 %s4387_s29, 4  ;;  %s4278_s15 = int_to_ptr.vmem [resolvable:$false] %s4277_s15 }
 0x19d   : > { %s4279_s0 = scalar_lea.vmem %s4278_s15, 32  ;;  %p4280_p12 = scmp.lt.s32.totalorder %s5107_s20, %s4278_s15 }
 0x19e   : > { %1317 = vmatpush1.bf16.msra.mxu0 %v3683_v37  ;;  %v3745_v37 = vld [vmem:[#allocation8 + $0x80] ss:$48 sps:$4 sm:$0xff]   ;;  %s5217_s30 = smov %s5216_s25  ;;  %s5105_s19 = scalar_lea.hbm %s5216_s25, %s3257_s2 }
 0x19f   : > { %1360 = vmatpush1.bf16.msra.mxu1 %v3684_v38  ;;  %1318 = vmatprep.subr.bf16.mxu0 %v3685_v39  ;;  %v3748_v38 = vld [vmem:[#allocation8 + $0x88] ss:$48 sps:$4 sm:$0xff]   ;;  %v3753_v39 = vld [vmem:[#allocation8 + $0xe4] ss:$48 sps:$4 sm:$0xff]   ;;  %p4276_p11 = pneg %p4275_p10  ;;  %p4281_p0 = scmp.lt.s32.totalorder %s4279_s0, %s4273_s3 }
 0x1a0   : > { %1361 = vmatprep.subr.bf16.mxu1 %v3687_v40  ;;  %v3756_v40 = vld [vmem:[#allocation8 + $0xec] ss:$48 sps:$4 sm:$0xff]  }
 0x1a1   : > { %p4282_p5 = por %p4281_p0, %p4280_p12 }
 0x1a2   : > { %1319 = vmatpush1.bf16.msra.mxu0 %v3689_v41  ;;  %v3751_v41 = vld [vmem:[#allocation8 + $0xe0] ss:$48 sps:$4 sm:$0xff]  }
 0x1a3   : > { %1362 = vmatpush1.bf16.msra.mxu1 %v3690_v42  ;;  %1390 = vmatprep.subr.bf16.mxu0 %v3693_v43  ;;  %v3754_v42 = vld [vmem:[#allocation8 + $0xe8] ss:$48 sps:$4 sm:$0xff]   ;;  %v3759_v43 = vld [vmem:[#allocation8 + $0x144] ss:$48 sps:$4 sm:$0xff]   ;;  %p4283_p7 = pnand %p4282_p5, %p4276_p11 }
 0x1a4   : > { %1433 = vmatprep.subr.bf16.mxu1 %v3696_v45  ;;  %v3762_v45 = vld [vmem:[#allocation8 + $0x14c] ss:$48 sps:$4 sm:$0xff]  }
 0x213   : > { %v625_v11 = vpop.xlane.xlu0 %624 }
 0x214   : > { %v629_v12 = vmul.f32 0.0078125, %v625_v11  ;;  %v3711_v11 = vld [vmem:[#allocation8 + $0x134] ss:$48 sps:$4 sm:$0xff]  }
 0x216   : > { %v4870_v13 = vsub.f32 %v4863_v1, %v629_v12  ;;  %v3714_v12 = vld [vmem:[#allocation8 + $0x13c] ss:$48 sps:$4 sm:$0xff]  }
 0x217   : > { %v627_v14 = vpop.xlane.xlu0 %626 }
 0x218   : > { %v630_v15 = vmul.f32 0.0078125, %v627_v14  ;;  %v633_v16 = vmul.f32 %v4870_v13, %v4870_v13  ;;  %v3712_v14 = vld [vmem:[#allocation8 + $0x138] ss:$48 sps:$4 sm:$0xff]  }
 0x21a   : > { %v4875_v17 = vsub.f32 %v4866_v2, %v630_v15  ;;  %635 = vadd.xlane.f32.xlu1 %v633_v16  ;;  %v3717_v15 = vld [vmem:[#allocation8 + $0x194] ss:$48 sps:$4 sm:$0xff]   ;;  %v3720_v16 = vld [vmem:[#allocation8 + $0x19c] ss:$48 sps:$4 sm:$0xff]  }
 0x21c   : > { %v634_v18 = vmul.f32 %v4875_v17, %v4875_v17 }
 0x21e   : > { %637 = vadd.xlane.f32.xlu1 %v634_v18  ;;  %v3718_v18 = vld [vmem:[#allocation8 + $0x198] ss:$48 sps:$4 sm:$0xff]  }
 0x2a7   : > { %v636_v46 = vpop.xlane.xlu1 %635 }
 0x2a8   : > { %v639_v47 = vmul.f32 0.0078125, %v636_v46  ;;  %v3757_v46 = vld [vmem:[#allocation8 + $0x140] ss:$48 sps:$4 sm:$0xff]  }
 0x2aa   : > { %v641_v48 = vadd.f32 1e-06, %v639_v47  ;;  %v3760_v47 = vld [vmem:[#allocation8 + $0x148] ss:$48 sps:$4 sm:$0xff]  }
 0x2ab   : > { %v638_v49 = vpop.xlane.xlu1 %637 }
 0x2ac   : > { %3859 = vrsqrt.f32 %v641_v48  ;;  %v640_v50 = vmul.f32 0.0078125, %v638_v49  ;;  %v3765_v48 = vld [vmem:[#allocation8 + $0x1a4] ss:$48 sps:$4 sm:$0xff]   ;;  %v3768_v49 = vld [vmem:[#allocation8 + $0x1ac] ss:$48 sps:$4 sm:$0xff]  }
 0x2ae   : > { %v642_v51 = vadd.f32 1e-06, %v640_v50  ;;  %v3763_v50 = vld [vmem:[#allocation8 + $0x1a0] ss:$48 sps:$4 sm:$0xff]  }
 0x2b0   : > { %3861 = vrsqrt.f32 %v642_v51  ;;  %v3766_v51 = vld [vmem:[#allocation8 + $0x1a8] ss:$48 sps:$4 sm:$0xff]  }
 0x2b6   : > { %v3860_v52 = vpop.eup %3859 }
 0x2b7   : > { %v645_v53 = vmul.f32 %v3860_v52, %v4870_v13  ;;  %v3709_v13 = vld [vmem:[#allocation8 + $0x130] ss:$48 sps:$4 sm:$0xff]   ;;  %v3771_v52 = vld [vmem:[#allocation8 + $0x204] ss:$48 sps:$4 sm:$0xff]  }
 0x2b9   : > { %v653_v56 = vmul.f32 %v3087_v54, %v645_v53  ;;  %v3774_v53 = vld [vmem:[#allocation8 + $0x20c] ss:$48 sps:$4 sm:$0xff]  }
 0x2ba   : > { %v3862_v55 = vpop.eup %3861 }
 0x2bb   : > { %v646_v57 = vmul.f32 %v3862_v55, %v4875_v17  ;;  %v661_v60 = vadd.f32 %v3088_v58, %v653_v56  ;;  %v3715_v17 = vld [vmem:[#allocation8 + $0x190] ss:$48 sps:$4 sm:$0xff]   ;;  %v3772_v55 = vld [vmem:[#allocation8 + $0x208] ss:$48 sps:$4 sm:$0xff]   ;;  %v3777_v56 = vld [vmem:[#allocation8 + $0x264] ss:$48 sps:$4 sm:$0xff]  }
 0x2bd   : > { %v654_v59 = vmul.f32 %v3087_v54, %v646_v57  ;;  %v3769_v54 = vld [vmem:[#allocation8 + $0x200] ss:$48 sps:$4 sm:$0xff]   ;;  %v3780_v57 = vld [vmem:[#allocation8 + $0x26c] ss:$48 sps:$4 sm:$0xff]  }
 0x2bf   : > { %v662_v61 = vadd.f32 %v3088_v58, %v654_v59  ;;  %v3775_v58 = vld [vmem:[#allocation8 + $0x260] ss:$48 sps:$4 sm:$0xff]   ;;  %v3778_v59 = vld [vmem:[#allocation8 + $0x268] ss:$48 sps:$4 sm:$0xff]  }
 0x2c1   : > { %v4883_v0 = vpack.c.bf16 %v662_v61, %v661_v60  ;;  %v3783_v60 = vld [vmem:[#allocation8 + $0x2c4] ss:$48 sps:$4 sm:$0xff]   ;;  %v3786_v61 = vld [vmem:[#allocation8 + $0x2cc] ss:$48 sps:$4 sm:$0xff]  }
 0x2c3   : > { %1337 = vmatmul.mubr.bf16.vlgmr.msra.gmra.mrb[0].mxu0 %v4883_v0  ;;  %1380 = vmatmul.mubr.bf16.vlgmr.msra.gmra.mrb[0].mxu1 %v4883_v0 }
 0x2c4   : > { %1391 = vmatpush1.bf16.msra.mxu0 %v3691_v62  ;;  %1434 = vmatpush1.bf16.msra.mxu1 %v3694_v63  ;;  %v3781_v62 = vld [vmem:[#allocation8 + $0x2c0] ss:$48 sps:$4 sm:$0xff]   ;;  %v3784_v63 = vld [vmem:[#allocation8 + $0x2c8] ss:$48 sps:$4 sm:$0xff]  }
 0x2c5   : > { %1392 = vmatprep.subr.bf16.mxu0 %v3699_v3  ;;  %1435 = vmatprep.subr.bf16.mxu1 %v3702_v4  ;;  %v4385_v3 = vmov 0.0   ;;  %v764_v4 = vlaneseq }
 0x2c6   : > { %1422 = vmatprep.mubr.bf16.mxu0 %v4384_v44  ;;  %1465 = vmatprep.mubr.bf16.mxu1 %v4384_v44 }
 0x2c8   : > { %1393 = vmatpush1.bf16.msra.mxu0 %v3697_v5  ;;  %1436 = vmatpush1.bf16.msra.mxu1 %v3700_v6  ;;  %v765_v5 = vshrl.u32 %v764_v4, 7  ;;  %v4901_v6 = vld [vmem:[#allocation10 + $0x8] sm:$0xf] }
 0x2c9   : > { %1394 = vmatprep.subr.bf16.mxu0 %v3705_v7  ;;  %1437 = vmatprep.subr.bf16.mxu1 %v3708_v8 }
 0x2ca   : > { %v774_v7 = vsub.s32 2, %v765_v5  ;;  %v778_v8 = vsub.s32 3, %v765_v5 }
 0x2cc   : > { %1395 = vmatpush1.bf16.msra.mxu0 %v3703_v9  ;;  %1438 = vmatpush1.bf16.msra.mxu1 %v3706_v10  ;;  %v4907_v9 = vrot.slane %v4901_v6, %v778_v8  ;;  %v4909_v10 = vsub.s32 0, %v765_v5 }
 0x2cd   : > { %1396 = vmatprep.subr.bf16.mxu0 %v3711_v11  ;;  %1439 = vmatprep.subr.bf16.mxu1 %v3714_v12  ;;  %v760_v11 = vld [vmem:[#allocation10] sm:$0xff]  ;;  %v4911_v12 = vsub.s32 1, %v765_v5 }
 0x2d0   : > { %1397 = vmatpush1.bf16.msra.mxu0 %v3709_v13  ;;  %1440 = vmatpush1.bf16.msra.mxu1 %v3712_v14  ;;  %v767_v13 = vrot.slane %v760_v11, %v4909_v10  ;;  %v775_v14 = vrot.slane %v760_v11, %v774_v7 }
 0x2d1   : > { %1398 = vmatprep.subr.bf16.mxu0 %v3717_v15  ;;  %1441 = vmatprep.subr.bf16.mxu1 %v3720_v16 }
 0x2d4   : > { %1399 = vmatpush1.bf16.msra.mxu0 %v3715_v17  ;;  %1442 = vmatpush1.bf16.msra.mxu1 %v3718_v18  ;;  %v771_v17 = vrot.slane %v760_v11, %v4911_v12  ;;  %v779_v18 = vrot.slane %v760_v11, %v778_v8  ;;  %v799_v8 = vrot.slane %v4901_v6, %v4909_v10 }
 0x2d5   : > { %1400 = vmatprep.subr.bf16.mxu0 %v3723_v19  ;;  %1443 = vmatprep.subr.bf16.mxu1 %v3726_v20 }
 0x2d8   : > { %1401 = vmatpush1.bf16.msra.mxu0 %v3721_v21  ;;  %1444 = vmatpush1.bf16.msra.mxu1 %v3724_v22 }
 0x2d9   : > { %1402 = vmatprep.subr.bf16.mxu0 %v3729_v23  ;;  %1445 = vmatprep.subr.bf16.mxu1 %v3732_v24 }
 0x2dc   : > { %1403 = vmatpush1.bf16.msra.mxu0 %v3727_v25  ;;  %1446 = vmatpush1.bf16.msra.mxu1 %v3730_v26 }
 0x2dd   : > { %1404 = vmatprep.subr.bf16.mxu0 %v3735_v27  ;;  %1447 = vmatprep.subr.bf16.mxu1 %v3738_v28 }
 0x2e0   : > { %1405 = vmatpush1.bf16.msra.mxu0 %v3733_v29  ;;  %1448 = vmatpush1.bf16.msra.mxu1 %v3736_v30 }
 0x2e1   : > { %1476 = vmatprep.subr.bf16.mxu0 %v3741_v31  ;;  %1519 = vmatprep.subr.bf16.mxu1 %v3744_v32 }
 0x2e3   : > { %1423 = vmatmul.mubr.bf16.vlgmr.msra.gmra.mrb[4].mxu0 %v4883_v0  ;;  %1466 = vmatmul.mubr.bf16.vlgmr.msra.gmra.mrb[4].mxu1 %v4883_v0 }
 0x2e4   : > { %1477 = vmatpush1.bf16.msra.mxu0 %v3739_v33  ;;  %1520 = vmatpush1.bf16.msra.mxu1 %v3742_v34 }
 0x2e5   : > { %1478 = vmatprep.subr.bf16.mxu0 %v3747_v35  ;;  %1521 = vmatprep.subr.bf16.mxu1 %v3750_v36 }
 0x2e6   : > { %1508 = vmatprep.mubr.bf16.mxu0 %v4384_v44  ;;  %1551 = vmatprep.mubr.bf16.mxu1 %v4384_v44 }
 0x2e8   : > { %1479 = vmatpush1.bf16.msra.mxu0 %v3745_v37  ;;  %1522 = vmatpush1.bf16.msra.mxu1 %v3748_v38  ;;  %v782_v37 = vsub.s32 4, %v765_v5  ;;  %v790_v38 = vsub.s32 6, %v765_v5 }
 0x2e9   : > { %1480 = vmatprep.subr.bf16.mxu0 %v3753_v39  ;;  %1523 = vmatprep.subr.bf16.mxu1 %v3756_v40  ;;  %v786_v39 = vsub.s32 5, %v765_v5  ;;  %v794_v40 = vsub.s32 7, %v765_v5 }
 0x2ec   : > { %1481 = vmatpush1.bf16.msra.mxu0 %v3751_v41  ;;  %1524 = vmatpush1.bf16.msra.mxu1 %v3754_v42  ;;  %v783_v41 = vrot.slane %v760_v11, %v782_v37  ;;  %v791_v42 = vrot.slane %v760_v11, %v790_v38 }
 0x2ed   : > { %1482 = vmatprep.subr.bf16.mxu0 %v3759_v43  ;;  %1525 = vmatprep.subr.bf16.mxu1 %v3762_v45 }
 0x2f0   : > { %1483 = vmatpush1.bf16.msra.mxu0 %v3757_v46  ;;  %1526 = vmatpush1.bf16.msra.mxu1 %v3760_v47  ;;  %v787_v46 = vrot.slane %v760_v11, %v786_v39  ;;  %v795_v47 = vrot.slane %v760_v11, %v794_v40 }
 0x2f1   : > { %1484 = vmatprep.subr.bf16.mxu0 %v3765_v48  ;;  %1527 = vmatprep.subr.bf16.mxu1 %v3768_v49 }
 0x2f4   : > { %1485 = vmatpush1.bf16.msra.mxu0 %v3763_v50  ;;  %1528 = vmatpush1.bf16.msra.mxu1 %v3766_v51 }
 0x2f5   : > { %1486 = vmatprep.subr.bf16.mxu0 %v3771_v52  ;;  %1529 = vmatprep.subr.bf16.mxu1 %v3774_v53 }
 0x2f8   : > { %1487 = vmatpush1.bf16.msra.mxu0 %v3769_v54  ;;  %1530 = vmatpush1.bf16.msra.mxu1 %v3772_v55 }
 0x2f9   : > { %1488 = vmatprep.subr.bf16.mxu0 %v3777_v56  ;;  %1531 = vmatprep.subr.bf16.mxu1 %v3780_v57 }
 0x2fc   : > { %1489 = vmatpush1.bf16.msra.mxu0 %v3775_v58  ;;  %1532 = vmatpush1.bf16.msra.mxu1 %v3778_v59 }
 0x2fd   : > { %1490 = vmatprep.subr.bf16.mxu0 %v3783_v60  ;;  %1533 = vmatprep.subr.bf16.mxu1 %v3786_v61 }
 0x300   : > { %1491 = vmatpush1.bf16.msra.mxu0 %v3781_v62  ;;  %1534 = vmatpush1.bf16.msra.mxu1 %v3784_v63 }
 0x301   : > { %3339 = vmatprep.subr.bf16.mxu0 %v4385_v3  ;;  %3357 = vmatprep.subr.bf16.mxu1 %v4385_v3 }
 0x303   : > { %1509 = vmatmul.mubr.bf16.vlgmr.msra.gmra.mrb[8].mxu0 %v4883_v0  ;;  %1552 = vmatmul.mubr.bf16.vlgmr.msra.gmra.mrb[8].mxu1 %v4883_v0  ;;  %v4904_v0 = vrot.slane %v4901_v6, %v774_v7  ;;  %v803_v7 = vrot.slane %v4901_v6, %v4911_v12 }
 0x304   : > { %3341 = vmatprep.mubr.msk.bf16.mxu0 %vm4386_vm0, %v4385_v3  ;;  %3359 = vmatprep.mubr.msk.bf16.mxu1 %vm4386_vm0, %v4385_v3 }
 0x396   : > { %v1338_v15 = vpop.f32.mrb[0].mxu0  ;;  %v1381_v16 = vpop.f32.mrb[0].mxu1 }
 0x397   : > { %v1340_v19 = vpop.f32.mrb[1].mxu0  ;;  %v1383_v20 = vpop.f32.mrb[1].mxu1  ;;  %v1339_v23 = vadd.f32 %v1338_v15, %v767_v13  ;;  %v1382_v24 = vadd.f32 %v1381_v16, %v775_v14 }
 0x398   : > { %v1342_v21 = vpop.f32.mrb[2].mxu0  ;;  %v1385_v22 = vpop.f32.mrb[2].mxu1  ;;  %v1341_v29 = vadd.f32 %v1340_v19, %v771_v17  ;;  %v4915_v30 = vadd.f32 %v1383_v20, %v779_v18 }
 0x399   : > { %v1343_v25 = vadd.f32 %v1342_v21, %v767_v13  ;;  %v1386_v26 = vadd.f32 %v1385_v22, %v775_v14  ;;  %v1344_v27 = vpop.f32.mrb[3].mxu0  ;;  %v1387_v28 = vpop.f32.mrb[3].mxu1 }
 0x39a   : > { %v1345_v31 = vadd.f32 %v1344_v27, %v771_v17  ;;  %v4917_v32 = vadd.f32 %v1387_v28, %v779_v18 }
 0x39b   : > { %v1562_v33 = vpack.c.bf16 %v1343_v25, %v1339_v23  ;;  %v1564_v34 = vpack.c.bf16 %v1386_v26, %v1382_v24 }
 0x39c   : > { %v1563_v35 = vpack.c.bf16 %v1345_v31, %v1341_v29  ;;  %v1691_v36 = vpack.c.bf16 %v4917_v32, %v4915_v30 }
 0x39e   : > { %3340 = vmatpush3.bf16.xpose.msra.mxu0 %v1563_v35 }
 0x39f   : > { %3345 = vmatprep.subr.bf16.mxu0 %v4385_v3 }
 0x3a5   : > { %3342 = vmatmul.mubr.bf16.vlgmr.msra.gmra.mrb[12].mxu0 %v1562_v33 }
 0x3a6   : > { %3346 = vmatpush3.bf16.msra.mxu0 %v1564_v34  ;;  %3347 = vmatprep.mubr.msk.bf16.mxu0 %vm4386_vm0, %v4385_v3 }
 0x3a7   : > { %3351 = vmatprep.subr.bf16.mxu0 %v4385_v3 }
 0x3b6   : > { %v1424_v43 = vpop.f32.mrb[4].mxu0  ;;  %v1467_v45 = vpop.f32.mrb[4].mxu1 }
 0x3b7   : > { %v1426_v48 = vpop.f32.mrb[5].mxu0  ;;  %v1469_v49 = vpop.f32.mrb[5].mxu1  ;;  %v4925_v52 = vadd.f32 %v1424_v43, %v783_v41  ;;  %v4927_v53 = vadd.f32 %v1467_v45, %v791_v42 }
 0x3b8   : > { %v1428_v50 = vpop.f32.mrb[6].mxu0  ;;  %v1471_v51 = vpop.f32.mrb[6].mxu1  ;;  %v1427_v58 = vadd.f32 %v1426_v48, %v787_v46  ;;  %v4933_v59 = vadd.f32 %v1469_v49, %v795_v47 }
 0x3b9   : > { %v4929_v54 = vadd.f32 %v1428_v50, %v783_v41  ;;  %v4931_v55 = vadd.f32 %v1471_v51, %v791_v42  ;;  %v1430_v56 = vpop.f32.mrb[7].mxu0  ;;  %v1473_v57 = vpop.f32.mrb[7].mxu1 }
 0x3ba   : > { %v1431_v60 = vadd.f32 %v1430_v56, %v787_v46  ;;  %v4935_v61 = vadd.f32 %v1473_v57, %v795_v47 }
 0x3bb   : > { %v1692_v62 = vpack.c.bf16 %v4929_v54, %v4925_v52  ;;  %v1997_v63 = vpack.c.bf16 %v4931_v55, %v4927_v53 }
 0x3bc   : > { %v1693_v4 = vpack.c.bf16 %v1431_v60, %v1427_v58  ;;  %v1998_v5 = vpack.c.bf16 %v4935_v61, %v4933_v59 }
 0x3be   : > { %3358 = vmatpush3.bf16.msra.mxu1 %v1693_v4 }
 0x3bf   : > { %3383 = vmatprep.subr.bf16.mxu1 %v4385_v3 }
 0x3d6   : > { %v1510_v11 = vpop.f32.mrb[8].mxu0  ;;  %v1553_v13 = vpop.f32.mrb[8].mxu1 }
 0x3d7   : > { %v4949_v14 = vadd.f32 %v1553_v13, %v4904_v0  ;;  %v1512_v15 = vpop.f32.mrb[9].mxu0  ;;  %v1555_v16 = vpop.f32.mrb[9].mxu1  ;;  %v4956_v21 = vadd.f32 %v1510_v11, %v799_v8 }
 0x3d8   : > { %v4951_v17 = vadd.f32 %v1512_v15, %v803_v7  ;;  %v4954_v18 = vadd.f32 %v1555_v16, %v4907_v9  ;;  %v1514_v19 = vpop.f32.mrb[10].mxu0  ;;  %v1557_v20 = vpop.f32.mrb[10].mxu1 }
 0x3d9   : > { %v4958_v22 = vadd.f32 %v1514_v19, %v799_v8  ;;  %v4961_v6 = vadd.f32 %v1557_v20, %v4904_v0  ;;  %v1516_v23 = vpop.f32.mrb[11].mxu0  ;;  %v1559_v24 = vpop.f32.mrb[11].mxu1 }
 0x3da   : > { %v4963_v25 = vadd.f32 %v1516_v23, %v803_v7  ;;  %v4966_v26 = vadd.f32 %v1559_v24, %v4907_v9 }
 0x3db   : > { %v1999_v27 = vpack.c.bf16 %v4958_v22, %v4956_v21  ;;  %v2217_v28 = vpack.c.bf16 %v4961_v6, %v4949_v14  ;;  %v3810_v14 = vld [vmem:[#allocation11 + $0xb8] sm:$0xff]  }
 0x3dc   : > { %v2216_v29 = vpack.c.bf16 %v4963_v25, %v4951_v17  ;;  %v2218_v0 = vpack.c.bf16 %v4966_v26, %v4954_v18 }
 0x478   : > { %v1599_v31 = vpop.f32.mrb[12].mxu0 }
 0x479   : > { %v3343_v33 = vpop.f32.mrb[13].mxu0  ;;  %v1607_v34 = vsel %vm1606_vm1, %v1599_v31, -inf }
 0x47a   : > { %1608 = vmax.xlane.f32.xlu0 %v1607_v34  ;;  %v1602_v9 = vpop.f32.mrb[14].mxu0 }
 0x47b   : > { %v3344_v35 = vpop.f32.mrb[15].mxu0  ;;  %v1610_v37 = vsel %vm1606_vm1, %v1602_v9, -inf }
 0x47c   : > { %1611 = vmax.xlane.f32.xlu1 %v1610_v37  ;;  %v3795_v35 = vld [vmem:[#allocation11 + $0x40] sm:$0xff]   ;;  %v3796_v37 = vld [vmem:[#allocation11 + $0x48] sm:$0xff]  }
 0x507   : > { %v1609_v38 = vpop.xlane.xlu0 %1608 }
 0x508   : > { %v1613_v39 = vsub.f32 %v1599_v31, %v1609_v38  ;;  %v3797_v38 = vld [vmem:[#allocation11 + $0x50] sm:$0xff]  }
 0x509   : > { %v1612_v40 = vpop.xlane.xlu1 %1611 }
 0x50a   : > { %v1615_v41 = vmul.f32 1.442695, %v1613_v39  ;;  %v1614_v42 = vsub.f32 %v1602_v9, %v1612_v40  ;;  %v3798_v39 = vld [vmem:[#allocation11 + $0x58] sm:$0xff]   ;;  %v3799_v40 = vld [vmem:[#allocation11 + $0x60] sm:$0xff]  }
 0x50c   : > { %3863 = vpow2.f32 %v1615_v41  ;;  %v1617_v43 = vmul.f32 1.442695, %v1614_v42  ;;  %v3800_v41 = vld [vmem:[#allocation11 + $0x68] sm:$0xff]   ;;  %v3801_v42 = vld [vmem:[#allocation11 + $0x70] sm:$0xff]  }
 0x50e   : > { %3865 = vpow2.f32 %v1617_v43  ;;  %v3802_v43 = vld [vmem:[#allocation11 + $0x78] sm:$0xff]  }
 0x516   : > { %v3864_v45 = vpop.eup %3863 }
 0x517   : > { %v1619_v46 = vsel %vm1606_vm1, %v3864_v45, 0.0 }
 0x518   : > { %v3866_v47 = vpop.eup %3865  ;;  %1620 = vadd.xlane.f32.xlu0 %v1619_v46 }
 0x519   : > { %v1622_v48 = vsel %vm1606_vm1, %v3866_v47, 0.0 }
 0x51a   : > { %1623 = vadd.xlane.f32.xlu1 %v1622_v48 }
 0x5a5   : > { %v1621_v49 = vpop.xlane.xlu0 %1620 }
 0x5a6   : > { %3867 = vrcp.f32 %v1621_v49 }
 0x5a7   : > { %v1624_v50 = vpop.xlane.xlu1 %1623 }
 0x5a8   : > { %3869 = vrcp.f32 %v1624_v50 }
 0x5b0   : > { %v3868_v51 = vpop.eup %3867 }
 0x5b1   : > { %v1627_v54 = vmul.f32 %v3868_v51, %v3864_v45  ;;  %v3787_v51 = vld [vmem:[#allocation11] sm:$0xff]  }
 0x5b2   : > { %v3870_v52 = vpop.eup %3869 }
 0x5b3   : > { %v1628_v56 = vmul.f32 %v3870_v52, %v3866_v47 }
 0x5b5   : > { %v1629_v57 = vpack.c.bf16 %v1628_v56, %v1627_v54  ;;  %v3788_v54 = vld [vmem:[#allocation11 + $0x8] sm:$0xff]   ;;  %v3789_v56 = vld [vmem:[#allocation11 + $0x10] sm:$0xff]  }
 0x5b7   : > { %3348 = vmatmul.mubr.msk.bf16.vlgmr.msra.gmra.mrb[16].mxu0 %vm1606_vm1, %v1629_v57  ;;  %v3790_v57 = vld [vmem:[#allocation11 + $0x18] sm:$0xff]  }
 0x5b8   : > { %3352 = vmatpush3.bf16.xpose.msra.mxu0 %v1692_v62  ;;  %3353 = vmatprep.mubr.msk.bf16.mxu0 %vm4386_vm0, %v4385_v3 }
 0x5b9   : > { %3363 = vmatprep.subr.bf16.mxu0 %v4385_v3 }
 0x5bf   : > { %3354 = vmatmul.mubr.bf16.vlgmr.msra.gmra.mrb[20].mxu0 %v1691_v36 }
 0x5c0   : > { %3379 = vmatprep.mubr.msk.bf16.mxu0 %vm4386_vm0, %v4385_v3  ;;  %3364 = vmatpush3.bf16.msra.mxu0 %v3795_v35 }
 0x5c1   : > { %3365 = vmatprep.subr.bf16.mxu0 %v4385_v3 }
 0x5c4   : > { %3366 = vmatpush3.bf16.msra.mxu0 %v3796_v37 }
 0x5c5   : > { %3367 = vmatprep.subr.bf16.mxu0 %v4385_v3 }
 0x5c8   : > { %3368 = vmatpush3.bf16.msra.mxu0 %v3797_v38 }
 0x5c9   : > { %3369 = vmatprep.subr.bf16.mxu0 %v4385_v3 }
 0x5cc   : > { %3370 = vmatpush3.bf16.msra.mxu0 %v3798_v39 }
 0x5cd   : > { %3371 = vmatprep.subr.bf16.mxu0 %v4385_v3 }
 0x5d0   : > { %3372 = vmatpush3.bf16.msra.mxu0 %v3799_v40 }
 0x5d1   : > { %3373 = vmatprep.subr.bf16.mxu0 %v4385_v3 }
 0x5d4   : > { %3374 = vmatpush3.bf16.msra.mxu0 %v3800_v41  ;;  %v3803_v41 = vld [vmem:[#allocation11 + $0x80] sm:$0xff]  }
 0x5d5   : > { %3375 = vmatprep.subr.bf16.mxu0 %v4385_v3 }
 0x5d8   : > { %3376 = vmatpush3.bf16.msra.mxu0 %v3801_v42  ;;  %v3804_v42 = vld [vmem:[#allocation11 + $0x88] sm:$0xff]  }
 0x5d9   : > { %3377 = vmatprep.subr.bf16.mxu0 %v4385_v3 }
 0x5dc   : > { %3378 = vmatpush3.bf16.msra.mxu0 %v3802_v43  ;;  %v3805_v43 = vld [vmem:[#allocation11 + $0x90] sm:$0xff]  }
 0x5dd   : > { %3403 = vmatprep.subr.bf16.mxu0 %v4385_v3 }
 0x68a   : > { %v4989_v58 = vpop.f32.mrb[16].mxu0 }
 0x68b   : > { %v3349_v60 = vpop.f32.mrb[17].mxu0 }
 0x68c   : > { %v4991_v4 = vpop.f32.mrb[18].mxu0  ;;  %v3791_v60 = vld [vmem:[#allocation11 + $0x20] sm:$0xff]  }
 0x68d   : > { %v1674_v62 = vpack.c.bf16 %v4991_v4, %v4989_v58  ;;  %v3350_v7 = vpop.f32.mrb[19].mxu0 }
 0x68e   : > { %v3792_v7 = vld [vmem:[#allocation11 + $0x28] sm:$0xff]  }
 0x692   : > { %v1728_v8 = vpop.f32.mrb[20].mxu0 }
 0x693   : > { %v3355_v11 = vpop.f32.mrb[21].mxu0  ;;  %v1735_v13 = vsel %vm1606_vm1, %v1728_v8, -inf }
 0x694   : > { %1736 = vmax.xlane.f32.xlu0 %v1735_v13  ;;  %v1731_v15 = vpop.f32.mrb[22].mxu0  ;;  %v3794_v11 = vld [vmem:[#allocation11 + $0x38] sm:$0xff]  }
 0x695   : > { %v3356_v30 = vpop.f32.mrb[23].mxu0  ;;  %v1738_v32 = vsel %vm1606_vm1, %v1731_v15, -inf }
 0x696   : > { %1739 = vmax.xlane.f32.xlu1 %v1738_v32 }
 0x721   : > { %v1737_v36 = vpop.xlane.xlu0 %1736 }
 0x722   : > { %v1741_v16 = vsub.f32 %v1728_v8, %v1737_v36  ;;  %v3793_v8 = vld [vmem:[#allocation11 + $0x30] sm:$0xff]  }
 0x723   : > { %v1740_v19 = vpop.xlane.xlu1 %1739 }
 0x724   : > { %v1743_v20 = vmul.f32 1.442695, %v1741_v16  ;;  %v1742_v23 = vsub.f32 %v1731_v15, %v1740_v19 }
 0x726   : > { %3871 = vpow2.f32 %v1743_v20  ;;  %v1745_v24 = vmul.f32 1.442695, %v1742_v23 }
 0x728   : > { %3873 = vpow2.f32 %v1745_v24 }
 0x730   : > { %v3872_v31 = vpop.eup %3871 }
 0x731   : > { %v1747_v33 = vsel %vm1606_vm1, %v3872_v31, 0.0 }
 0x732   : > { %v3874_v34 = vpop.eup %3873  ;;  %1748 = vadd.xlane.f32.xlu0 %v1747_v33 }
 0x733   : > { %v1750_v9 = vsel %vm1606_vm1, %v3874_v34, 0.0 }
 0x734   : > { %1751 = vadd.xlane.f32.xlu1 %v1750_v9 }
 0x7bf   : > { %v1749_v45 = vpop.xlane.xlu0 %1748 }
 0x7c0   : > { %3875 = vrcp.f32 %v1749_v45  ;;  %v3806_v45 = vld [vmem:[#allocation11 + $0x98] sm:$0xff]  }
 0x7c1   : > { %v1752_v46 = vpop.xlane.xlu1 %1751 }
 0x7c2   : > { %3877 = vrcp.f32 %v1752_v46  ;;  %v3807_v46 = vld [vmem:[#allocation11 + $0xa0] sm:$0xff]  }
 0x7ca   : > { %v3876_v47 = vpop.eup %3875 }
 0x7cb   : > { %v1755_v49 = vmul.f32 %v3876_v47, %v3872_v31  ;;  %v3808_v47 = vld [vmem:[#allocation11 + $0xa8] sm:$0xff]  }
 0x7cc   : > { %v3878_v48 = vpop.eup %3877 }
 0x7cd   : > { %v1756_v50 = vmul.f32 %v3878_v48, %v3874_v34  ;;  %v3809_v48 = vld [vmem:[#allocation11 + $0xb0] sm:$0xff]  }
 0x7cf   : > { %v1757_v52 = vpack.c.bf16 %v1756_v50, %v1755_v49 }
 0x7d1   : > { %3360 = vmatmul.mubr.msk.bf16.vlgmr.msra.gmra.mrb[12].mxu1 %vm1606_vm1, %v1757_v52 }
 0x7d2   : > { %3384 = vmatpush3.bf16.msra.mxu1 %v3787_v51  ;;  %3399 = vmatprep.mubr.msk.bf16.mxu1 %vm4386_vm0, %v4385_v3 }
 0x7d3   : > { %3385 = vmatprep.subr.bf16.mxu1 %v4385_v3 }
 0x7d6   : > { %3386 = vmatpush3.bf16.msra.mxu1 %v3788_v54 }
 0x7d7   : > { %3387 = vmatprep.subr.bf16.mxu1 %v4385_v3 }
 0x7da   : > { %3388 = vmatpush3.bf16.msra.mxu1 %v3789_v56 }
 0x7db   : > { %3389 = vmatprep.subr.bf16.mxu1 %v4385_v3 }
 0x7de   : > { %3390 = vmatpush3.bf16.msra.mxu1 %v3790_v57 }
 0x7df   : > { %3391 = vmatprep.subr.bf16.mxu1 %v4385_v3 }
 0x7e2   : > { %3392 = vmatpush3.bf16.msra.mxu1 %v3791_v60 }
 0x7e3   : > { %3393 = vmatprep.subr.bf16.mxu1 %v4385_v3 }
 0x7e6   : > { %3394 = vmatpush3.bf16.msra.mxu1 %v3792_v7 }
 0x7e7   : > { %3395 = vmatprep.subr.bf16.mxu1 %v4385_v3 }
 0x7ea   : > { %3396 = vmatpush3.bf16.msra.mxu1 %v3793_v8 }
 0x7eb   : > { %3397 = vmatprep.subr.bf16.mxu1 %v4385_v3 }
 0x7ee   : > { %3398 = vmatpush3.bf16.msra.mxu1 %v3794_v11 }
 0x7ef   : > { %3409 = vmatprep.subr.bf16.mxu1 %v4385_v3 }
 0x7f1   : > { %3400 = vmatmul.mubr.bf16.vlgmr.msra.gmra.mrb[16].mxu1 %v1674_v62 }
 0x7f2   : > { %3410 = vmatpush3.bf16.msra.mxu1 %v1999_v27  ;;  %3411 = vmatprep.mubr.msk.bf16.mxu1 %vm4386_vm0, %v4385_v3 }
 0x7f3   : > { %3435 = vmatprep.subr.bf16.mxu1 %v4385_v3 }
 0x8a4   : > { %v1795_v13 = vpop.f32.mrb[12].mxu1 }
 0x8a5   : > { %v3361_v15 = vpop.f32.mrb[13].mxu1 }
 0x8a6   : > { %v1798_v30 = vpop.f32.mrb[14].mxu1 }
 0x8a7   : > { %v1802_v32 = vpack.c.bf16 %v1798_v30, %v1795_v13  ;;  %v3362_v36 = vpop.f32.mrb[15].mxu1 }
 0x8a9   : > { %3380 = vmatmul.mubr.bf16.vlgmr.msra.gmra.mrb[24].mxu0 %v1802_v32 }
 0x8aa   : > { %3404 = vmatpush3.bf16.xpose.msra.mxu0 %v1998_v5  ;;  %3405 = vmatprep.mubr.msk.bf16.mxu0 %vm4386_vm0, %v4385_v3 }
 0x8ab   : > { %3415 = vmatprep.subr.bf16.mxu0 %v4385_v3 }
 0x8b1   : > { %3406 = vmatmul.mubr.bf16.vlgmr.msra.gmra.mrb[28].mxu0 %v1997_v63 }
 0x8b2   : > { %3431 = vmatprep.mubr.msk.bf16.mxu0 %vm4386_vm0, %v4385_v3  ;;  %3416 = vmatpush3.bf16.msra.mxu0 %v3803_v41 }
 0x8b3   : > { %3417 = vmatprep.subr.bf16.mxu0 %v4385_v3 }
 0x8b6   : > { %3418 = vmatpush3.bf16.msra.mxu0 %v3804_v42 }
 0x8b7   : > { %3419 = vmatprep.subr.bf16.mxu0 %v4385_v3 }
 0x8ba   : > { %3420 = vmatpush3.bf16.msra.mxu0 %v3805_v43 }
 0x8bb   : > { %3421 = vmatprep.subr.bf16.mxu0 %v4385_v3 }
 0x8be   : > { %3422 = vmatpush3.bf16.msra.mxu0 %v3806_v45 }
 0x8bf   : > { %3423 = vmatprep.subr.bf16.mxu0 %v4385_v3 }
 0x8c2   : > { %3424 = vmatpush3.bf16.msra.mxu0 %v3807_v46 }
 0x8c3   : > { %3425 = vmatprep.subr.bf16.mxu0 %v4385_v3 }
 0x8c4   : > { %v1990_v21 = vpop.f32.mrb[16].mxu1 }
 0x8c5   : > { %v3401_v22 = vpop.f32.mrb[17].mxu1 }
 0x8c6   : > { %v1993_v27 = vpop.f32.mrb[18].mxu1  ;;  %3426 = vmatpush3.bf16.msra.mxu0 %v3808_v47 }
 0x8c7   : > { %v3402_v58 = vpop.f32.mrb[19].mxu1  ;;  %3427 = vmatprep.subr.bf16.mxu0 %v4385_v3 }
 0x8ca   : > { %3428 = vmatpush3.bf16.msra.mxu0 %v3809_v48 }
 0x8cb   : > { %3429 = vmatprep.subr.bf16.mxu0 %v4385_v3 }
 0x8ce   : > { %3430 = vmatpush3.bf16.msra.mxu0 %v3810_v14  ;;  %v3821_v14 = vld [vmem:[#allocation17 + $0x4] ss:$8 sps:$4 sm:$0xff]  }
 0x8cf   : > { %2595 = vmatprep.subr.bf16.mxu0 %v3821_v14 }
 0x97c   : > { %v1901_v4 = vpop.f32.mrb[24].mxu0 }
 0x97d   : > { %v5038_v62 = vadd.f32 %v1990_v21, %v1901_v4  ;;  %v3381_v59 = vpop.f32.mrb[25].mxu0 }
 0x97e   : > { %v1904_v61 = vpop.f32.mrb[26].mxu0 }
 0x97f   : > { %v5040_v5 = vadd.f32 %v1993_v27, %v1904_v61  ;;  %v3382_v16 = vpop.f32.mrb[27].mxu0 }
 0x984   : > { %v2034_v19 = vpop.f32.mrb[28].mxu0 }
 0x985   : > { %v3407_v20 = vpop.f32.mrb[29].mxu0  ;;  %v2041_v53 = vsel %vm1606_vm1, %v2034_v19, -inf }
 0x986   : > { %2042 = vmax.xlane.f32.xlu0 %v2041_v53  ;;  %v2037_v55 = vpop.f32.mrb[30].mxu0 }
 0x987   : > { %v3408_v63 = vpop.f32.mrb[31].mxu0  ;;  %v2044_v23 = vsel %vm1606_vm1, %v2037_v55, -inf }
 0x988   : > { %2045 = vmax.xlane.f32.xlu1 %v2044_v23 }
 0xa13   : > { %v2043_v24 = vpop.xlane.xlu0 %2042 }
 0xa14   : > { %v2047_v31 = vsub.f32 %v2034_v19, %v2043_v24 }
 0xa15   : > { %v2046_v33 = vpop.xlane.xlu1 %2045 }
 0xa16   : > { %v2049_v34 = vmul.f32 1.442695, %v2047_v31  ;;  %v2048_v9 = vsub.f32 %v2037_v55, %v2046_v33  ;;  %v3811_v31 = vld [vmem:[#allocation11 + $0xc0] sm:$0xff]  }
 0xa18   : > { %3879 = vpow2.f32 %v2049_v34  ;;  %v2051_v35 = vmul.f32 1.442695, %v2048_v9  ;;  %v3812_v34 = vld [vmem:[#allocation11 + $0xc8] sm:$0xff]   ;;  %v3815_v9 = vld [vmem:[#allocation11 + $0xe0] sm:$0xff]  }
 0xa1a   : > { %3881 = vpow2.f32 %v2051_v35  ;;  %v3816_v35 = vld [vmem:[#allocation11 + $0xe8] sm:$0xff]  }
 0xa22   : > { %v3880_v37 = vpop.eup %3879 }
 0xa23   : > { %v2053_v38 = vsel %vm1606_vm1, %v3880_v37, 0.0 }
 0xa24   : > { %v3882_v39 = vpop.eup %3881  ;;  %2054 = vadd.xlane.f32.xlu0 %v2053_v38  ;;  %v3818_v38 = vld [vmem:[#allocation11 + $0xf8] sm:$0xff]  }
 0xa25   : > { %v2056_v40 = vsel %vm1606_vm1, %v3882_v39, 0.0 }
 0xa26   : > { %2057 = vadd.xlane.f32.xlu1 %v2056_v40 }
 0xab1   : > { %v2055_v49 = vpop.xlane.xlu0 %2054 }
 0xab2   : > { %3883 = vrcp.f32 %v2055_v49  ;;  %v3221_v49 = vld [vmem:[#allocation13] ss:$0 sm:$0xff] }
 0xab3   : > { %v2058_v50 = vpop.xlane.xlu1 %2057 }
 0xab4   : > { %3885 = vrcp.f32 %v2058_v50 }
 0xabc   : > { %v3884_v51 = vpop.eup %3883 }
 0xabd   : > { %v2061_v54 = vmul.f32 %v3884_v51, %v3880_v37  ;;  %v3817_v37 = vld [vmem:[#allocation11 + $0xf0] sm:$0xff]  }
 0xabe   : > { %v3886_v52 = vpop.eup %3885 }
 0xabf   : > { %v2062_v56 = vmul.f32 %v3886_v52, %v3882_v39 }
 0xac1   : > { %v2063_v57 = vpack.c.bf16 %v2062_v56, %v2061_v54 }
 0xac3   : > { %3412 = vmatmul.mubr.msk.bf16.vlgmr.msra.gmra.mrb[20].mxu1 %vm1606_vm1, %v2063_v57  ;;  %v3819_v57 = vld [vmem:[#allocation17] ss:$8 sps:$4 sm:$0xff]  }
 0xac4   : > { %3436 = vmatpush3.bf16.xpose.msra.mxu1 %v2217_v28  ;;  %3437 = vmatprep.mubr.msk.bf16.mxu1 %vm4386_vm0, %v4385_v3 }
 0xac5   : > { %3441 = vmatprep.subr.bf16.mxu1 %v4385_v3 }
 0xacb   : > { %3438 = vmatmul.mubr.bf16.vlgmr.msra.gmra.mrb[24].mxu1 %v2216_v29 }
 0xacc   : > { %3442 = vmatpush3.bf16.msra.mxu1 %v2218_v0  ;;  %3443 = vmatprep.mubr.msk.bf16.mxu1 %vm4386_vm0, %v4385_v3 }
 0xacd   : > { %3447 = vmatprep.subr.bf16.mxu1 %v4385_v3 }
 0xb96   : > { %v2101_v6 = vpop.f32.mrb[20].mxu1 }
 0xb97   : > { %v3413_v28 = vpop.f32.mrb[21].mxu1 }
 0xb98   : > { %v2104_v60 = vpop.f32.mrb[22].mxu1  ;;  %v3822_v28 = vld [vmem:[#allocation17 + $0x10] ss:$8 sps:$4 sm:$0xff]  }
 0xb99   : > { %v2108_v7 = vpack.c.bf16 %v2104_v60, %v2101_v6  ;;  %v3414_v8 = vpop.f32.mrb[23].mxu1  ;;  %v3824_v6 = vld [vmem:[#allocation17 + $0x14] ss:$8 sps:$4 sm:$0xff]  }
 0xb9b   : > { %3432 = vmatmul.mubr.bf16.vlgmr.msra.gmra.mrb[32].mxu0 %v2108_v7 }
 0xb9c   : > { %2627 = vmatprep.mubr.bf16.mxu0 %v4384_v44  ;;  %2596 = vmatpush1.bf16.msra.mxu0 %v3819_v57 }
 0xb9d   : > { %2597 = vmatprep.subr.bf16.mxu0 %v3824_v6 }
 0xb9e   : > { %v2253_v17 = vpop.f32.mrb[24].mxu1 }
 0xb9f   : > { %v3439_v25 = vpop.f32.mrb[25].mxu1  ;;  %v2260_v18 = vsel %vm1606_vm1, %v2253_v17, -inf }
 0xba0   : > { %2261 = vmax.xlane.f32.xlu0 %v2260_v18  ;;  %v2256_v26 = vpop.f32.mrb[26].mxu1  ;;  %2598 = vmatpush1.bf16.msra.mxu0 %v3822_v28 }
 0xba1   : > { %v3440_v29 = vpop.f32.mrb[27].mxu1  ;;  %v2263_v0 = vsel %vm1606_vm1, %v2256_v26, -inf }
 0xba2   : > { %2264 = vmax.xlane.f32.xlu1 %v2263_v0  ;;  %v3825_v29 = vld [vmem:[#allocation17 + $0x20] ss:$8 sps:$4 sm:$0xff]   ;;  %v3830_v0 = vld [vmem:[#allocation17 + $0x34] ss:$8 sps:$4 sm:$0xff]  }
 0xc2d   : > { %v2262_v11 = vpop.xlane.xlu0 %2261 }
 0xc2e   : > { %v2266_v13 = vsub.f32 %v2253_v17, %v2262_v11  ;;  %v3828_v11 = vld [vmem:[#allocation17 + $0x30] ss:$8 sps:$4 sm:$0xff]  }
 0xc2f   : > { %v2265_v15 = vpop.xlane.xlu1 %2264 }
 0xc30   : > { %v2268_v30 = vmul.f32 1.442695, %v2266_v13  ;;  %v2267_v32 = vsub.f32 %v2256_v26, %v2265_v15  ;;  %v3827_v26 = vld [vmem:[#allocation17 + $0x24] ss:$8 sps:$4 sm:$0xff]   ;;  %v3831_v15 = vld [vmem:[#allocation17 + $0x40] ss:$8 sps:$4 sm:$0xff]  }
 0xc31   : > { %2599 = vmatprep.subr.bf16.mxu0 %v3827_v26  ;;  %v3833_v13 = vld [vmem:[#allocation17 + $0x44] ss:$8 sps:$4 sm:$0xff]  }
 0xc32   : > { %3887 = vpow2.f32 %v2268_v30  ;;  %v2270_v36 = vmul.f32 1.442695, %v2267_v32  ;;  %2600 = vmatpush1.bf16.msra.mxu0 %v3825_v29  ;;  %v3836_v30 = vld [vmem:[#allocation17 + $0x54] ss:$8 sps:$4 sm:$0xff]   ;;  %v3834_v32 = vld [vmem:[#allocation17 + $0x50] ss:$8 sps:$4 sm:$0xff]  }
 0xc33   : > { %2601 = vmatprep.subr.bf16.mxu0 %v3830_v0 }
 0xc34   : > { %3889 = vpow2.f32 %v2270_v36  ;;  %v3839_v36 = vld [vmem:[#allocation17 + $0x64] ss:$8 sps:$4 sm:$0xff]  }
 0xc36   : > { %2602 = vmatpush1.bf16.msra.mxu0 %v3828_v11 }
 0xc37   : > { %2603 = vmatprep.subr.bf16.mxu0 %v3833_v13 }
 0xc3a   : > { %2604 = vmatpush1.bf16.msra.mxu0 %v3831_v15 }
 0xc3b   : > { %2605 = vmatprep.subr.bf16.mxu0 %v3836_v30 }
 0xc3c   : > { %v3888_v21 = vpop.eup %3887 }
 0xc3d   : > { %v2272_v44 = vsel %vm1606_vm1, %v3888_v21, 0.0 }
 0xc3e   : > { %v3890_v22 = vpop.eup %3889  ;;  %2273 = vadd.xlane.f32.xlu0 %v2272_v44  ;;  %2606 = vmatpush1.bf16.msra.mxu0 %v3834_v32  ;;  %v3842_v44 = vld [vmem:[#allocation17 + $0x74] ss:$8 sps:$4 sm:$0xff]  }
 0xc3f   : > { %v2275_v27 = vsel %vm1606_vm1, %v3890_v22, 0.0  ;;  %2607 = vmatprep.subr.bf16.mxu0 %v3839_v36 }
 0xc40   : > { %2276 = vadd.xlane.f32.xlu1 %v2275_v27 }
 0xc6e   : > { %v2207_v58 = vpop.f32.mrb[32].mxu0 }
 0xc6f   : > { %v2214_v4 = vadd.f32 %v2207_v58, %v5038_v62  ;;  %v3433_v59 = vpop.f32.mrb[33].mxu0  ;;  %v3813_v62 = vld [vmem:[#allocation11 + $0xd0] sm:$0xff]  }
 0xc70   : > { %v2210_v61 = vpop.f32.mrb[34].mxu0 }
 0xc71   : > { %v2215_v16 = vadd.f32 %v2210_v61, %v5040_v5  ;;  %v3434_v19 = vpop.f32.mrb[35].mxu0  ;;  %v3814_v5 = vld [vmem:[#allocation11 + $0xd8] sm:$0xff]  }
 0xccb   : > { %v2274_v20 = vpop.xlane.xlu0 %2273 }
 0xccc   : > { %3891 = vrcp.f32 %v2274_v20  ;;  %v3222_v20 = vld [vmem:[#allocation14] ss:$0 sm:$0xff] }
 0xccd   : > { %v2277_v53 = vpop.xlane.xlu1 %2276 }
 0xcce   : > { %3893 = vrcp.f32 %v2277_v53 }
 0xcd6   : > { %v3892_v55 = vpop.eup %3891 }
 0xcd7   : > { %v2280_v23 = vmul.f32 %v3892_v55, %v3888_v21  ;;  %v3837_v21 = vld [vmem:[#allocation17 + $0x60] ss:$8 sps:$4 sm:$0xff]  }
 0xcd8   : > { %v3894_v63 = vpop.eup %3893  ;;  %2608 = vmatpush1.bf16.msra.mxu0 %v3837_v21 }
 0xcd9   : > { %v2281_v24 = vmul.f32 %v3894_v63, %v3890_v22  ;;  %v3840_v22 = vld [vmem:[#allocation17 + $0x70] ss:$8 sps:$4 sm:$0xff]   ;;  %2609 = vmatprep.subr.bf16.mxu0 %v3842_v44 }
 0xcdb   : > { %v2282_v33 = vpack.c.bf16 %v2281_v24, %v2280_v23  ;;  %v3223_v24 = vld [vmem:[#allocation16] ss:$0 sm:$0xff] }
 0xcdc   : > { %2610 = vmatpush1.bf16.msra.mxu0 %v3840_v22 }
 0xcdd   : > { %3444 = vmatmul.mubr.msk.bf16.vlgmr.msra.gmra.mrb[28].mxu1 %vm1606_vm1, %v2282_v33 }
 0xcde   : > { %3448 = vmatpush3.bf16.msra.mxu1 %v3811_v31  ;;  %3463 = vmatprep.mubr.msk.bf16.mxu1 %vm4386_vm0, %v4385_v3 }
 0xcdf   : > { %3449 = vmatprep.subr.bf16.mxu1 %v4385_v3 }
 0xce2   : > { %3450 = vmatpush3.bf16.msra.mxu1 %v3812_v34 }
 0xce3   : > { %3451 = vmatprep.subr.bf16.mxu1 %v4385_v3 }
 0xce6   : > { %3452 = vmatpush3.bf16.msra.mxu1 %v3813_v62 }
 0xce7   : > { %3453 = vmatprep.subr.bf16.mxu1 %v4385_v3 }
 0xcea   : > { %3454 = vmatpush3.bf16.msra.mxu1 %v3814_v5  ;;  %v3843_v5 = vld [vmem:[#allocation20 + $0x40] sm:$0xff]  }
 0xceb   : > { %3455 = vmatprep.subr.bf16.mxu1 %v4385_v3 }
 0xcee   : > { %3456 = vmatpush3.bf16.msra.mxu1 %v3815_v9  ;;  %v3844_v9 = vld [vmem:[#allocation20] sm:$0xff]  }
 0xcef   : > { %3457 = vmatprep.subr.bf16.mxu1 %v4385_v3 }
 0xcf2   : > { %3458 = vmatpush3.bf16.msra.mxu1 %v3816_v35  ;;  %v3845_v35 = vld [vmem:[#allocation20 + $0x48] sm:$0xff]  }
 0xcf3   : > { %3459 = vmatprep.subr.bf16.mxu1 %v4385_v3 }
 0xcf6   : > { %3460 = vmatpush3.bf16.msra.mxu1 %v3817_v37  ;;  %v3846_v37 = vld [vmem:[#allocation20 + $0x8] sm:$0xff]  }
 0xcf7   : > { %3461 = vmatprep.subr.bf16.mxu1 %v4385_v3 }
 0xcfa   : > { %3462 = vmatpush3.bf16.msra.mxu1 %v3818_v38  ;;  %v3847_v38 = vld [vmem:[#allocation20 + $0x50] sm:$0xff]  }
 0xcfb   : > { %3317 = vmatprep.subr.bf16.mxu1 %v3843_v5 }
 0xdb0   : > { %v2320_v39 = vpop.f32.mrb[28].mxu1 }
 0xdb1   : > { %v3445_v40 = vpop.f32.mrb[29].mxu1 }
 0xdb2   : > { %v2323_v41 = vpop.f32.mrb[30].mxu1  ;;  %v3849_v40 = vld [vmem:[#allocation20 + $0x58] sm:$0xff]  }
 0xdb3   : > { %v2327_v42 = vpack.c.bf16 %v2323_v41, %v2320_v39  ;;  %v3446_v43 = vpop.f32.mrb[31].mxu1  ;;  %v3848_v39 = vld [vmem:[#allocation20 + $0x10] sm:$0xff]   ;;  %v3850_v41 = vld [vmem:[#allocation20 + $0x18] sm:$0xff]  }
 0xdb4   : > { %v3852_v43 = vld [vmem:[#allocation20 + $0x20] sm:$0xff]  }
 0xdb5   : > { %3464 = vmatmul.mubr.bf16.vlgmr.msra.gmra.mrb[32].mxu1 %v2327_v42  ;;  %v3851_v42 = vld [vmem:[#allocation20 + $0x60] sm:$0xff]  }
 0xdb6   : > { %3318 = vmatpush3.bf16.msra.mxu1 %v3844_v9 }
 0xdb7   : > { %3319 = vmatprep.subr.bf16.mxu1 %v3845_v35 }
 0xdba   : > { %3320 = vmatpush3.bf16.msra.mxu1 %v3846_v37 }
 0xdbb   : > { %3321 = vmatprep.subr.bf16.mxu1 %v3847_v38  ;;  %v3240_v38 = vld [vmem:[#allocation22] ss:$0 sm:$0xff] }
 0xdbe   : > { %3322 = vmatpush3.bf16.msra.mxu1 %v3848_v39 }
 0xdbf   : > { %3323 = vmatprep.subr.bf16.mxu1 %v3849_v40 }
 0xdc2   : > { %3324 = vmatpush3.bf16.msra.mxu1 %v3850_v41 }
 0xdc3   : > { %3325 = vmatprep.subr.bf16.mxu1 %v3851_v42 }
 0xdc6   : > { %3326 = vmatpush3.bf16.msra.mxu1 %v3852_v43 }
 0xe88   : > { %v2426_v45 = vpop.f32.mrb[32].mxu1 }
 0xe89   : > { %v2433_v46 = vadd.f32 %v2426_v45, %v2214_v4  ;;  %v3465_v47 = vpop.f32.mrb[33].mxu1  ;;  %v3853_v45 = vld [vmem:[#allocation20 + $0x68] sm:$0xff]  }
 0xe8a   : > { %v2429_v48 = vpop.f32.mrb[34].mxu1  ;;  %3327 = vmatprep.subr.bf16.mxu1 %v3853_v45  ;;  %v3855_v47 = vld [vmem:[#allocation20 + $0x70] sm:$0xff]  }
 0xe8b   : > { %v2435_v50 = vadd.f32 %v4863_v1, %v2433_v46  ;;  %v2434_v51 = vadd.f32 %v2429_v48, %v2215_v16  ;;  %v3466_v52 = vpop.f32.mrb[35].mxu1  ;;  %v3854_v46 = vld [vmem:[#allocation20 + $0x28] sm:$0xff]   ;;  %v3856_v48 = vld [vmem:[#allocation20 + $0x30] sm:$0xff]  }
 0xe8c   : > { %3328 = vmatpush3.bf16.msra.mxu1 %v3854_v46 }
 0xe8d   : > { %v2436_v54 = vadd.f32 %v4866_v2, %v2434_v51  ;;  %v5088_v3 = vadd.f32 %v3221_v49, %v2435_v50  ;;  %3329 = vmatprep.subr.bf16.mxu1 %v3855_v47  ;;  %v3858_v50 = vld [vmem:[#allocation20 + $0x38] sm:$0xff]  }
 0xe8e   : > { %v2503_v51 = vld [vmem:[#allocation19] sm:$0x3] }
 0xe8f   : > { %2448 = vadd.xlane.f32.xlu0 %v5088_v3  ;;  %v5091_v56 = vadd.f32 %v3221_v49, %v2436_v54  ;;  %v3857_v49 = vld [vmem:[#allocation20 + $0x78] sm:$0xff]   ;;  %v2508_v52 = vrot.slane %v2503_v51, %v4909_v10  ;;  %v2512_v54 = vrot.slane %v2503_v51, %v4911_v12 }
 0xe90   : > { %3330 = vmatpush3.bf16.msra.mxu1 %v3856_v48 }
 0xe91   : > { %2450 = vadd.xlane.f32.xlu1 %v5091_v56  ;;  %3331 = vmatprep.subr.bf16.mxu1 %v3857_v49 }
 0xe94   : > { %3332 = vmatpush3.bf16.msra.mxu1 %v3858_v50 }
 0xf1c   : > { %v2449_v1 = vpop.xlane.xlu0 %2448 }
 0xf1d   : > { %v2452_v60 = vmul.f32 0.0078125, %v2449_v1 }
 0xf1e   : > { %v2451_v7 = vpop.xlane.xlu1 %2450 }
 0xf1f   : > { %v2454_v2 = vsub.f32 %v5088_v3, %v2452_v60  ;;  %v2453_v8 = vmul.f32 0.0078125, %v2451_v7 }
 0xf21   : > { %v2455_v17 = vsub.f32 %v5091_v56, %v2453_v8  ;;  %v2456_v25 = vmul.f32 %v2454_v2, %v2454_v2 }
 0xf23   : > { %2458 = vadd.xlane.f32.xlu0 %v2456_v25  ;;  %v2457_v18 = vmul.f32 %v2455_v17, %v2455_v17 }
 0xf25   : > { %2460 = vadd.xlane.f32.xlu1 %v2457_v18 }
 0xfb0   : > { %v2459_v27 = vpop.xlane.xlu0 %2458 }
 0xfb1   : > { %v2462_v58 = vmul.f32 0.0078125, %v2459_v27 }
 0xfb2   : > { %v2461_v4 = vpop.xlane.xlu1 %2460 }
 0xfb3   : > { %v2464_v59 = vadd.f32 1e-06, %v2462_v58  ;;  %v2463_v61 = vmul.f32 0.0078125, %v2461_v4 }
 0xfb5   : > { %3895 = vrsqrt.f32 %v2464_v59  ;;  %v2465_v16 = vadd.f32 1e-06, %v2463_v61 }
 0xfb7   : > { %3897 = vrsqrt.f32 %v2465_v16 }
 0xfbf   : > { %v3896_v19 = vpop.eup %3895 }
 0xfc0   : > { %v2468_v53 = vmul.f32 %v3896_v19, %v2454_v2 }
 0xfc1   : > { %v3898_v55 = vpop.eup %3897 }
 0xfc2   : > { %v2469_v63 = vmul.f32 %v3898_v55, %v2455_v17  ;;  %v2476_v23 = vmul.f32 %v3222_v20, %v2468_v53 }
 0xfc4   : > { %v2477_v31 = vmul.f32 %v3222_v20, %v2469_v63  ;;  %v2484_v33 = vadd.f32 %v3223_v24, %v2476_v23 }
 0xfc6   : > { %v2485_v34 = vadd.f32 %v3223_v24, %v2477_v31 }
 0xfc8   : > { %v2486_v62 = vpack.c.bf16 %v2485_v34, %v2484_v33 }
 0xfca   : > { %2628 = vmatmul.mubr.bf16.vlgmr.msra.gmra.mrb[36].mxu0 %v2486_v62 }
0x109d   : > { %v2629_v57 = vpop.f32.mrb[36].mxu0 }
0x109e   : > { %v2630_v14 = vadd.f32 %v2629_v57, %v2508_v52  ;;  %v2631_v6 = vpop.f32.mrb[37].mxu0 }
0x109f   : > { %v2632_v28 = vadd.f32 %v2631_v6, %v2512_v54  ;;  %v2633_v1 = vpop.f32.mrb[38].mxu0 }
0x10a0   : > { %v2638_v60 = vmul.f32 %v2630_v14, %v2630_v14  ;;  %v2634_v7 = vadd.f32 %v2633_v1, %v2508_v52  ;;  %v2635_v2 = vpop.f32.mrb[39].mxu0 }
0x10a1   : > { %v2639_v8 = vmul.f32 %v2632_v28, %v2632_v28  ;;  %v2636_v17 = vadd.f32 %v2635_v2, %v2512_v54 }
0x10a2   : > { %v2642_v25 = vmul.f32 %v2638_v60, %v2630_v14  ;;  %v2640_v18 = vmul.f32 %v2634_v7, %v2634_v7 }
0x10a3   : > { %v2643_v26 = vmul.f32 %v2639_v8, %v2632_v28  ;;  %v2641_v29 = vmul.f32 %v2636_v17, %v2636_v17 }
0x10a4   : > { %v2646_v0 = vmul.f32 0.044715, %v2642_v25  ;;  %v2644_v11 = vmul.f32 %v2640_v18, %v2634_v7 }
0x10a5   : > { %v2647_v13 = vmul.f32 0.044715, %v2643_v26  ;;  %v2645_v10 = vmul.f32 %v2641_v29, %v2636_v17 }
0x10a6   : > { %v2650_v15 = vadd.f32 %v2646_v0, %v2630_v14  ;;  %v2648_v12 = vmul.f32 0.044715, %v2644_v11 }
0x10a7   : > { %v2651_v30 = vadd.f32 %v2647_v13, %v2632_v28  ;;  %v2649_v32 = vmul.f32 0.044715, %v2645_v10 }
0x10a8   : > { %v2654_v36 = vmul.f32 0.7978846, %v2650_v15  ;;  %v2652_v21 = vadd.f32 %v2648_v12, %v2634_v7 }
0x10a9   : > { %v2655_v44 = vmul.f32 0.7978846, %v2651_v30  ;;  %v2653_v22 = vadd.f32 %v2649_v32, %v2636_v17 }
0x10aa   : > { %3899 = vtanh.f32 %v2654_v36  ;;  %v2656_v27 = vmul.f32 0.7978846, %v2652_v21 }
0x10ab   : > { %3901 = vtanh.f32 %v2655_v44  ;;  %v2657_v58 = vmul.f32 0.7978846, %v2653_v22 }
0x10ac   : > { %3903 = vtanh.f32 %v2656_v27 }
0x10ad   : > { %3905 = vtanh.f32 %v2657_v58 }
0x10b4   : > { %v3900_v4 = vpop.eup %3899 }
0x10b5   : > { %v3902_v59 = vpop.eup %3901  ;;  %v2662_v61 = vadd.f32 1.0, %v3900_v4 }
0x10b6   : > { %v3904_v16 = vpop.eup %3903  ;;  %v2663_v19 = vadd.f32 1.0, %v3902_v59 }
0x10b7   : > { %v3906_v20 = vpop.eup %3905  ;;  %v2666_v53 = vmul.f32 0.5, %v2662_v61  ;;  %v2664_v55 = vadd.f32 1.0, %v3904_v16 }
0x10b8   : > { %v2665_v63 = vadd.f32 1.0, %v3906_v20  ;;  %v2667_v23 = vmul.f32 0.5, %v2663_v19 }
0x10b9   : > { %v2668_v24 = vmul.f32 0.5, %v2664_v55  ;;  %v2670_v33 = vmul.f32 %v2666_v53, %v2630_v14 }
0x10ba   : > { %v2669_v31 = vmul.f32 0.5, %v2665_v63  ;;  %v2671_v62 = vmul.f32 %v2667_v23, %v2632_v28 }
0x10bb   : > { %v2672_v34 = vmul.f32 %v2668_v24, %v2634_v7 }
0x10bc   : > { %v2673_v5 = vmul.f32 %v2669_v31, %v2636_v17 }
0x10bd   : > { %v2674_v9 = vpack.c.bf16 %v2672_v34, %v2670_v33 }
0x10be   : > { %v2675_v35 = vpack.c.bf16 %v2673_v5, %v2671_v62 }
0x10c0   : > { %2843 = vmatprep.mubr.bf16.mxu1 %v2675_v35 }
0x10c1   : > { %2844 = vmatmul.mubr.bf16.vlgmr.msra.gmra.mrb[36].mxu1 %v2674_v9 }
0x1194   : > { %v3333_v37 = vpop.f32.mrb[36].mxu1 }
0x1195   : > { %v3334_v39 = vpop.f32.mrb[37].mxu1 }
0x1196   : > { %v3335_v40 = vadd.f32 %v3334_v39, %v3333_v37  ;;  %v3336_v41 = vpop.f32.mrb[38].mxu1 }
0x1197   : > { %v3337_v42 = vpop.f32.mrb[39].mxu1 }
0x1198   : > { %v2846_v43 = vadd.f32 %v3335_v40, %v3240_v38  ;;  %v3338_v45 = vadd.f32 %v3337_v42, %v3336_v41 }
0x119a   : > { %v2849_v46 = vadd.f32 %v3338_v45, %v3240_v38  ;;  %v2852_v47 = vadd.f32 %v2846_v43, %v5088_v3 }
0x119c   : > { %v2853_v48 = vadd.f32 %v2849_v46, %v5091_v56 }
0x119e   : > { %v2854_v49 = vadd.f32 %v2853_v48, %v2852_v47 }
0x11a0   : > { %v2855_v50 = vrot.slane %v2854_v49, 4 }
0x11a2   : > { %v2856_v51 = vadd.f32 %v2855_v50, %v2854_v49 }
0x11a4   : > { %v2857_v52 = vrot.slane %v2856_v51, 2 }
0x11a6   : > { %v2858_v54 = vadd.f32 %v2857_v52, %v2856_v51 }
0x11a8   : > { %v2859_v57 = vrot.slane %v2858_v54, 1 }
0x11aa   : > { %v2860_v14 = vadd.f32 %v2859_v57, %v2858_v54 }
0x11ac   : > { %2861 = vst [vmem:[%s615_s24] sm:$0x1] %v2860_v14 }
0x11ad   : > { %4286 = shalt.err (!%p4283_p7)
}
0x11ae   : > { %s4287_s14 = scalar_lea.hbm %s5105_s19, 16  ;;  %s4291_s23 = scalar_lea.hbm %s5217_s30, 32 }
0x11af   : > { %p4288_p6 = scmp.ne.s32.totalorder %s5105_s19, %s4287_s14  ;;  %p4292_p13 = scmp.lt.u32.totalorder %s5105_s19, %s5217_s30 }
0x11b0   : > { %p4293_p1 = scmp.lt.u32.totalorder %s4291_s23, %s4287_s14  ;;  %p4295_p2 = scmp.lt.u32.totalorder %s4287_s14, %s5105_s19 }
0x11b1   : > { %p4289_p9 = pnand %p4288_p6, %p5218_p8 }
0x11b2   : > { %p4294_p3 = por %p4293_p1, %p4292_p13 }
0x11b3   : > { %p4290_p4 = pneg %p4289_p9 }
0x11b4   : > { %p4296_p10 = por %p4295_p2, %p4294_p3 }
0x11b6   : > { %p4297_p11 = pnand %p4296_p10, %p4290_p4 }
0x11b8   : > { %4300 = shalt.err (!%p4297_p11)
}
0x11b9   : > { %3517 = dma.vmem_to_hbm [thread:$0]  (%p5218_p8), %s5107_s20, 16, %s5105_s19, %s2863_s1  }
0x11ba PF: > { %s5219_s3 = sld [smem:[#allocation32_spill]]  ;;  %p5220_p12 = scmp.ne.s32.totalorder %s5198_s22, 0 }
0x11bb   : > { %p5221_p0 = scmp.ge.s32.totalorder %s4363_s28, 2 }
0x11bd   : > { %p3561_p5 = pnand %p5221_p0, %p5220_p12 }
0x11c0   : > { %s2887_s29 = sand.u32 1, %s5219_s3  }
0x11c1   : > { %s2888_s15 = scalar_lea.sflag [#allocation4], %s2887_s29 }
0x11c2   : > { %4346 = dma.done.wait (!%p3561_p5), %s2888_s15, 16  }
0x11c3   : > { %4348 = vsyncadd (!%p3561_p5), %s2888_s15, 4294967280  ;;  %p32_p7 = scmp.ge.s32.totalorder %s4749_s18, 4   ;;  %s5222_s25 = smov %s4355_s26 }
0x11c4   : > { %s5223_s26 = smov %s4359_s27  ;;  %s5224_s27 = smov %s4760_s13 }
0x11c5   : > { %s5225_s28 = smov %s4749_s18  ;;  %34 = sbr.rel (!%p32_p7) target bundleno = 17 (0x11), region = 165 }
0x11cc   :  { %2892 = vsyncpa [#allocation3], 1 }
0x11cd   :  { %2894 = vsyncpa [#allocation3 + $0x1], 1 }
0x11ce   :  { %2895 = vsyncpa [#allocation6], 1 }
0x11cf   :  { %2896 = vsyncpa [#allocation9], 1 }
0x11d0   :  { %2897 = vsyncpa [#allocation12], 1 }
0x11d1   :  { %2898 = vsyncpa [#allocation15], 1 }
0x11d2   :  { %2899 = vsyncpa [#allocation18], 1 }
0x11d3   :  { %2900 = vsyncpa [#allocation21], 1 }
0x11d4   :  { %2901 = vsyncpa [#allocation4], 1 }
0x11d5   :  { %2903 = vsyncpa [#allocation4 + $0x1], 1 }

// kernel: videomae_classifier_forward.5
= control target key start
LH: loop header
LB: loop body
LE: loop exit
PB: predicated region body
PF: predicated region fallthrough
CT: control target
= control target key end

     0   :  { %s5183_s0 = inlined_call_operand.hbm [shape: bf16[32,128], index: 0, kind: input, shape index: {}]   ;;  %s5184_s1 = inlined_call_operand.hbm [shape: f32[1,128], index: 1, kind: input, shape index: {}]   ;;  %s5185_s2 = inlined_call_operand.hbm [shape: f32[1,128], index: 2, kind: input, shape index: {}]   ;;  %s5186_s3 = inlined_call_operand.hbm [shape: bf16[128,1536], index: 3, kind: input, shape index: {}]   ;;  %s5187_s4 = inlined_call_operand.hbm [shape: f32[1,1536], index: 4, kind: input, shape index: {}]   ;;  %s5188_s5 = inlined_call_operand.hbm [shape: bf16[512,128], index: 5, kind: input, shape index: {}]   ;;  %s5189_s6 = inlined_call_operand.hbm [shape: f32[1,128], index: 6, kind: input, shape index: {}]   ;;  %s5190_s7 = inlined_call_operand.hbm [shape: f32[1,128], index: 7, kind: input, shape index: {}]   ;;  %s5191_s8 = inlined_call_operand.hbm [shape: f32[1,128], index: 8, kind: input, shape index: {}]   ;;  %s5192_s9 = inlined_call_operand.hbm [shape: bf16[128,256], index: 9, kind: input, shape index: {}]   ;;  %s5193_s10 = inlined_call_operand.hbm [shape: f32[1,256], index: 10, kind: input, shape index: {}]   ;;  %s5194_s11 = inlined_call_operand.hbm [shape: bf16[256,128], index: 11, kind: input, shape index: {}]   ;;  %s5195_s12 = inlined_call_operand.hbm [shape: f32[1,128], index: 12, kind: input, shape index: {}]   ;;  %s5196_s13 = inlined_call_operand.hbm [shape: bf16[32,128], index: 13, kind: output, shape index: {}]  }
   0x1   :  { %5210 = sst [smem:[#allocation35_spill]] %s5183_s0 }
   0x2   :  { %5211 = sst [smem:[#allocation36_spill]] %s5184_s1 }
   0x3   :  { %5212 = sst [smem:[#allocation37_spill]] %s5185_s2 }
   0x4   :  { %5213 = sst [smem:[#allocation38_spill]] %s5186_s3 }
   0x5   :  { %5214 = sst [smem:[#allocation39_spill]] %s5196_s13 }
   0x6   :  { %18 = vsyncpa [#allocation3], 0 }
   0x7   :  { %20 = vsyncpa [#allocation3 + $0x1], 0 }
   0x8   :  { %21 = vsyncpa [#allocation6], 0 }
   0x9   :  { %22 = vsyncpa [#allocation9], 0 }
   0xa   :  { %23 = vsyncpa [#allocation12], 0 }
   0xb   :  { %24 = vsyncpa [#allocation15], 0 }
   0xc   :  { %25 = vsyncpa [#allocation18], 0 }
   0xd   :  { %26 = vsyncpa [#allocation21], 0 }
   0xe   :  { %27 = vsyncpa [#allocation4], 0 }
   0xf   :  { %29 = vsyncpa [#allocation4 + $0x1], 0  ;;  %s4487_s25 = smov 0   ;;  %s4489_s26 = smov 0  }
  0x10   :  { %s4491_s27 = smov 0   ;;  %s4493_s28 = smov 0  }
  0x11 LB: > { %5215 = sst [smem:[#allocation32_spill]] %s4378_s25  ;;  %s4392_s29 = smov [#allocation5]   ;;  %s4390_s28 = sphi %s4493_s28, %s5258_s28   ;;  %s4386_s27 = sphi %s4491_s27, %s5257_s27   ;;  %s4382_s26 = sphi %s4489_s26, %s5256_s26   ;;  %s4378_s25 = sphi %s4487_s25, %s5255_s25  }
  0x12   : > { %s357_s30 = sshll.u32 %s4392_s29, 4  ;;  %s4508_s14 = sadd.s32 4294967295, %s4390_s28   ;;  %s4513_s30 = int_to_ptr.vmem [resolvable:$true] %s357_s30 }
  0x13   : > { %5216 = sst [smem:[#allocation33_spill]] %s4508_s14  ;;  %p3068_p0 = scmp.ge.s32.totalorder %s4390_s28, 1 }
  0x14   : > { %p5203_p1 = scmp.eq.s32.totalorder %s4508_s14, 0  ;;  %p344_p2 = scmp.lt.s32.totalorder %s4390_s28, 3 }
  0x15   : > { %s4393_s16 = smov [#allocation8]   ;;  %s4394_s19 = smov [#allocation11]  }
  0x16   : > { %p4515_p3 = pnand %p3068_p0, %p344_p2  ;;  %s378_s17 = sshll.u32 %s4393_s16, 4  ;;  %s4522_s17 = int_to_ptr.vmem [resolvable:$true] %s378_s17 }
  0x17   : > { %s402_s20 = sshll.u32 %s4394_s19, 4  ;;  %s5220_s1 = sld [smem:[#allocation36_spill]]  ;;  %s4530_s20 = int_to_ptr.vmem [resolvable:$true] %s402_s20 }
  0x18   : > { %s5217_s15 = scalar_select %p4515_p3, 1, 0 }
  0x19   : > { %p3544_p5 = pneg %p4515_p3 }
  0x1a   : > { %5218 = sst [smem:[#allocation34_spill]] %s5217_s15 }
  0x1b   : > { %p4526_p6 = pnand %p3544_p5, %p5203_p1 }
  0x1d   : > { %s3934_s23 = scalar_lea.hbm %s5220_s1, 16  ;;  %p4540_p8 = pneg %p4526_p6 }
  0x1e   : > { %p3935_p7 = scmp.ne.s32.totalorder %s5220_s1, %s3934_s23  ;;  %p3941_p11 = scmp.lt.u32.totalorder %s3934_s23, %s5220_s1 }
  0x20   : > { %p3937_p9 = pnand %p4540_p8, %p3935_p7 }
  0x22   : > { %p3938_p10 = pneg %p3937_p9 }
  0x24   : > { %p3943_p12 = pnand %p3941_p11, %p3938_p10 }
  0x26   : > { %3946 = shalt.err (!%p3943_p12)
}
  0x27   : > { %s3947_s21 = scalar_lea.vmem %s4513_s30, 16  ;;  %s3954_s22 = scalar_lea.vmem %s4513_s30, 32 }
  0x28   : > { %p3948_p13 = scmp.ne.s32.totalorder %s4513_s30, %s3947_s21  ;;  %p3955_p5 = scmp.lt.s32.totalorder %s4513_s30, %s4513_s30 }
  0x29   : > { %p3956_p7 = scmp.lt.s32.totalorder %s3954_s22, %s3947_s21 }
  0x2a   : > { %p3950_p0 = pnand %p3948_p13, %p4540_p8 }
  0x2b   : > { %p3957_p9 = por %p3956_p7, %p3955_p5 }
  0x2c   : > { %p3951_p2 = pneg %p3950_p0 }
  0x2e   : > { %p3958_p4 = pnand %p3957_p9, %p3951_p2 }
  0x30   : > { %3961 = shalt.err (!%p3958_p4)
}
  0x31   : > { %3547 = dma.hbm_to_vmem [thread:$0]  (!%p4526_p6), %s5220_s1, 16, %s4513_s30, [#allocation6]  }
  0x32   : > { %s5222_s3 = sld [smem:[#allocation38_spill]] }
  0x38   : > { %s3962_s19 = scalar_lea.hbm %s5222_s3, 12288 }
  0x39   : > { %p3963_p10 = scmp.ne.s32.totalorder %s5222_s3, %s3962_s19  ;;  %p3969_p4 = scmp.lt.u32.totalorder %s3962_s19, %s5222_s3 }
  0x3b   : > { %p3965_p11 = pnand %p3963_p10, %p4540_p8 }
  0x3d   : > { %p3966_p12 = pneg %p3965_p11 }
  0x3f   : > { %p3971_p13 = pnand %p3969_p4, %p3966_p12 }
  0x41   : > { %3974 = shalt.err (!%p3971_p13)
}
  0x42   : > { %s3975_s30 = scalar_lea.vmem %s4522_s17, 12288  ;;  %p3983_p7 = scmp.lt.s32.totalorder %s4522_s17, %s4522_s17 }
  0x43   : > { %p3976_p0 = scmp.ne.s32.totalorder %s4522_s17, %s3975_s30  ;;  %p3984_p9 = scmp.lt.s32.totalorder %s3975_s30, %s3975_s30 }
  0x45   : > { %p3978_p2 = pnand %p3976_p0, %p4540_p8  ;;  %p3985_p10 = por %p3984_p9, %p3983_p7 }
  0x47   : > { %p3979_p5 = pneg %p3978_p2 }
  0x49   : > { %p3986_p11 = pnand %p3985_p10, %p3979_p5 }
  0x4b   : > { %3989 = shalt.err (!%p3986_p11)
}
  0x4c   : > { %s4395_s0 = smov 768   ;;  %s4396_s15 = smov 48  }
  0x4d   : > { %3553 = dma.hbm_to_vmem [thread:$0]  (!%p4526_p6), %s5222_s3, 12288, %s4522_s17, [#allocation9], %s4395_s0, %s4395_s0, %s4396_s15  }
  0x4e   : > { %s3990_s19 = scalar_lea.hbm %s5188_s5, 4096 }
  0x4f   : > { %p3991_p12 = scmp.ne.s32.totalorder %s5188_s5, %s3990_s19  ;;  %p3997_p0 = scmp.lt.u32.totalorder %s3990_s19, %s5188_s5 }
  0x51   : > { %p3993_p4 = pnand %p3991_p12, %p4540_p8 }
  0x53   : > { %p3994_p13 = pneg %p3993_p4 }
  0x55   : > { %p3999_p2 = pnand %p3997_p0, %p3994_p13 }
  0x57   : > { %4002 = shalt.err (!%p3999_p2)
}
  0x58   : > { %s4003_s17 = scalar_lea.vmem %s4530_s20, 4096  ;;  %p4011_p10 = scmp.lt.s32.totalorder %s4530_s20, %s4530_s20 }
  0x59   : > { %p4004_p5 = scmp.ne.s32.totalorder %s4530_s20, %s4003_s17  ;;  %p4012_p11 = scmp.lt.s32.totalorder %s4003_s17, %s4003_s17 }
  0x5b   : > { %p4006_p7 = pnand %p4004_p5, %p4540_p8  ;;  %p4013_p12 = por %p4012_p11, %p4011_p10 }
  0x5d   : > { %p4007_p9 = pneg %p4006_p7 }
  0x5f   : > { %p4014_p4 = pnand %p4013_p12, %p4007_p9 }
  0x61   : > { %4017 = shalt.err (!%p4014_p4)
}
  0x62   : > { %s5205_s0 = smov 64   ;;  %s5207_s1 = smov 4  }
  0x63   : > { %3559 = dma.hbm_to_vmem [thread:$0]  (!%p4526_p6), %s5188_s5, 4096, %s4530_s20, [#allocation12], %s5205_s0, %s5205_s0, %s5207_s1  }
  0x64   : > { %s4399_s23 = smov [#allocation14]   ;;  %s4400_s29 = smov [#allocation17]  }
  0x65   : > { %s427_s24 = sshll.u32 %s4399_s23, 4  ;;  %s448_s19 = sshll.u32 %s4400_s29, 4  ;;  %s428_s24 = int_to_ptr.vmem [resolvable:$true] %s427_s24  ;;  %s449_s19 = int_to_ptr.vmem [resolvable:$true] %s448_s19 }
  0x66   : > { %s4018_s30 = scalar_lea.hbm %s5190_s7, 16 }
  0x67   : > { %p4019_p13 = scmp.ne.s32.totalorder %s5190_s7, %s4018_s30  ;;  %p4025_p5 = scmp.lt.u32.totalorder %s4018_s30, %s5190_s7 }
  0x69   : > { %p4021_p0 = pnand %p4019_p13, %p4540_p8 }
  0x6b   : > { %p4022_p2 = pneg %p4021_p0 }
  0x6d   : > { %p4027_p7 = pnand %p4025_p5, %p4022_p2 }
  0x6f   : > { %4030 = shalt.err (!%p4027_p7)
}
  0x70   : > { %s4031_s20 = scalar_lea.vmem %s428_s24, 16  ;;  %s4038_s15 = scalar_lea.vmem %s428_s24, 32 }
  0x71   : > { %p4032_p9 = scmp.ne.s32.totalorder %s428_s24, %s4031_s20  ;;  %p4039_p12 = scmp.lt.s32.totalorder %s428_s24, %s428_s24 }
  0x72   : > { %p4040_p4 = scmp.lt.s32.totalorder %s4038_s15, %s4031_s20 }
  0x73   : > { %p4034_p10 = pnand %p4032_p9, %p4540_p8 }
  0x74   : > { %p4041_p1 = por %p4040_p4, %p4039_p12 }
  0x75   : > { %p4035_p11 = pneg %p4034_p10 }
  0x77   : > { %p4042_p3 = pnand %p4041_p1, %p4035_p11 }
  0x79   : > { %4045 = shalt.err (!%p4042_p3)
}
  0x7a   : > { %3565 = dma.hbm_to_vmem [thread:$0]  (!%p4526_p6), %s5190_s7, 16, %s428_s24, [#allocation15]  }
  0x7b   : > { %s4046_s23 = scalar_lea.hbm %s5192_s9, 2048 }
  0x7c   : > { %p4047_p13 = scmp.ne.s32.totalorder %s5192_s9, %s4046_s23  ;;  %p4053_p3 = scmp.lt.u32.totalorder %s4046_s23, %s5192_s9 }
  0x7e   : > { %p4049_p0 = pnand %p4047_p13, %p4540_p8 }
  0x80   : > { %p4050_p1 = pneg %p4049_p0 }
  0x82   : > { %p4055_p2 = pnand %p4053_p3, %p4050_p1 }
  0x84   : > { %4058 = shalt.err (!%p4055_p2)
}
  0x85   : > { %s4059_s17 = scalar_lea.vmem %s449_s19, 2048  ;;  %p4067_p10 = scmp.lt.s32.totalorder %s449_s19, %s449_s19 }
  0x86   : > { %p4060_p5 = scmp.ne.s32.totalorder %s449_s19, %s4059_s17  ;;  %p4068_p11 = scmp.lt.s32.totalorder %s4059_s17, %s4059_s17 }
  0x88   : > { %p4062_p7 = pnand %p4060_p5, %p4540_p8  ;;  %p4069_p12 = por %p4068_p11, %p4067_p10 }
  0x8a   : > { %p4063_p9 = pneg %p4062_p7 }
  0x8c   : > { %p4070_p4 = pnand %p4069_p12, %p4063_p9 }
  0x8e   : > { %4073 = shalt.err (!%p4070_p4)
}
  0x8f   : > { %s4401_s24 = smov 128   ;;  %s4402_s20 = smov 8  }
  0x90   : > { %3571 = dma.hbm_to_vmem [thread:$0]  (!%p4526_p6), %s5192_s9, 2048, %s449_s19, [#allocation18], %s4401_s24, %s4401_s24, %s4402_s20  }
  0x91   : > { %s4403_s13 = smov [#allocation20]   ;;  %s4404_s14 = smov [#allocation7]  }
  0x92   : > { %s472_s25 = sshll.u32 %s4403_s13, 4  ;;  %s368_s23 = sshll.u32 %s4404_s14, 4  ;;  %s473_s25 = int_to_ptr.vmem [resolvable:$true] %s472_s25  ;;  %s369_s23 = int_to_ptr.vmem [resolvable:$true] %s368_s23 }
  0x93   : > { %s4074_s22 = scalar_lea.hbm %s5194_s11, 2048 }
  0x94   : > { %p4075_p13 = scmp.ne.s32.totalorder %s5194_s11, %s4074_s22  ;;  %p4081_p3 = scmp.lt.u32.totalorder %s4074_s22, %s5194_s11 }
  0x96   : > { %p4077_p0 = pnand %p4075_p13, %p4540_p8 }
  0x98   : > { %p4078_p1 = pneg %p4077_p0 }
  0x9a   : > { %p4083_p2 = pnand %p4081_p3, %p4078_p1 }
  0x9c   : > { %4086 = shalt.err (!%p4083_p2)
}
  0x9d   : > { %s4087_s19 = scalar_lea.vmem %s473_s25, 2048  ;;  %p4095_p10 = scmp.lt.s32.totalorder %s473_s25, %s473_s25 }
  0x9e   : > { %p4088_p5 = scmp.ne.s32.totalorder %s473_s25, %s4087_s19  ;;  %p4096_p11 = scmp.lt.s32.totalorder %s4087_s19, %s4087_s19 }
  0xa0   : > { %p4090_p7 = pnand %p4088_p5, %p4540_p8  ;;  %p4097_p12 = por %p4096_p11, %p4095_p10 }
  0xa2   : > { %p4091_p9 = pneg %p4090_p7 }
  0xa4   : > { %p4098_p4 = pnand %p4097_p12, %p4091_p9 }
  0xa6   : > { %4101 = shalt.err (!%p4098_p4)
}
  0xa7   : > { %s5223_s24 = smov 4   ;;  %s5224_s20 = smov 64  }
  0xa8   : > { %3577 = dma.hbm_to_vmem [thread:$0]  (!%p4526_p6), %s5194_s11, 2048, %s473_s25, [#allocation21], %s5224_s20, %s5224_s20, %s5223_s24  }
  0xa9   : > { %s5225_s2 = sld [smem:[#allocation37_spill]] }
  0xaf   : > { %s4102_s13 = scalar_lea.hbm %s5225_s2, 16 }
  0xb0   : > { %p4103_p13 = scmp.ne.s32.totalorder %s5225_s2, %s4102_s13  ;;  %p4109_p3 = scmp.lt.u32.totalorder %s4102_s13, %s5225_s2 }
  0xb2   : > { %p4105_p0 = pnand %p4103_p13, %p4540_p8 }
  0xb4   : > { %p4106_p1 = pneg %p4105_p0 }
  0xb6   : > { %p4111_p2 = pnand %p4109_p3, %p4106_p1 }
  0xb8   : > { %4114 = shalt.err (!%p4111_p2)
}
  0xb9   : > { %s4115_s30 = scalar_lea.vmem %s369_s23, 16  ;;  %s4122_s25 = scalar_lea.vmem %s369_s23, 32 }
  0xba   : > { %p4116_p5 = scmp.ne.s32.totalorder %s369_s23, %s4115_s30  ;;  %p4123_p10 = scmp.lt.s32.totalorder %s369_s23, %s369_s23 }
  0xbb   : > { %p4124_p11 = scmp.lt.s32.totalorder %s4122_s25, %s4115_s30 }
  0xbc   : > { %p4118_p7 = pnand %p4116_p5, %p4540_p8 }
  0xbd   : > { %p4125_p12 = por %p4124_p11, %p4123_p10 }
  0xbe   : > { %p4119_p9 = pneg %p4118_p7 }
  0xc0   : > { %p4126_p4 = pnand %p4125_p12, %p4119_p9 }
  0xc2   : > { %4129 = shalt.err (!%p4126_p4)
}
  0xc3   : > { %3550 = dma.hbm_to_vmem [thread:$0]  (!%p4526_p6), %s5225_s2, 16, %s369_s23, [#allocation6]  }
  0xc4   : > { %s4405_s0 = smov [#allocation10]   ;;  %s4406_s15 = smov [#allocation13]  }
  0xc5   : > { %s392_s1 = sshll.u32 %s4405_s0, 4  ;;  %s416_s3 = sshll.u32 %s4406_s15, 4  ;;  %s393_s1 = int_to_ptr.vmem [resolvable:$true] %s392_s1  ;;  %s417_s3 = int_to_ptr.vmem [resolvable:$true] %s416_s3 }
  0xc6   : > { %s4130_s29 = scalar_lea.hbm %s5187_s4, 192 }
  0xc7   : > { %p4131_p13 = scmp.ne.s32.totalorder %s5187_s4, %s4130_s29  ;;  %p4137_p3 = scmp.lt.u32.totalorder %s4130_s29, %s5187_s4 }
  0xc9   : > { %p4133_p0 = pnand %p4131_p13, %p4540_p8 }
  0xcb   : > { %p4134_p1 = pneg %p4133_p0 }
  0xcd   : > { %p4139_p2 = pnand %p4137_p3, %p4134_p1 }
  0xcf   : > { %4142 = shalt.err (!%p4139_p2)
}
  0xd0   : > { %s4143_s23 = scalar_lea.vmem %s393_s1, 192  ;;  %p4151_p10 = scmp.lt.s32.totalorder %s393_s1, %s393_s1 }
  0xd1   : > { %p4144_p5 = scmp.ne.s32.totalorder %s393_s1, %s4143_s23  ;;  %p4152_p11 = scmp.lt.s32.totalorder %s4143_s23, %s4143_s23 }
  0xd3   : > { %p4146_p7 = pnand %p4144_p5, %p4540_p8  ;;  %p4153_p12 = por %p4152_p11, %p4151_p10 }
  0xd5   : > { %p4147_p9 = pneg %p4146_p7 }
  0xd7   : > { %p4154_p4 = pnand %p4153_p12, %p4147_p9 }
  0xd9   : > { %4157 = shalt.err (!%p4154_p4)
}
  0xda   : > { %3556 = dma.hbm_to_vmem [thread:$0]  (!%p4526_p6), %s5187_s4, 192, %s393_s1, [#allocation9]  }
  0xdb   : > { %s4158_s13 = scalar_lea.hbm %s5189_s6, 16 }
  0xdc   : > { %p4159_p13 = scmp.ne.s32.totalorder %s5189_s6, %s4158_s13  ;;  %p4165_p3 = scmp.lt.u32.totalorder %s4158_s13, %s5189_s6 }
  0xde   : > { %p4161_p0 = pnand %p4159_p13, %p4540_p8 }
  0xe0   : > { %p4162_p1 = pneg %p4161_p0 }
  0xe2   : > { %p4167_p2 = pnand %p4165_p3, %p4162_p1 }
  0xe4   : > { %4170 = shalt.err (!%p4167_p2)
}
  0xe5   : > { %s4171_s30 = scalar_lea.vmem %s417_s3, 16  ;;  %s4178_s1 = scalar_lea.vmem %s417_s3, 32 }
  0xe6   : > { %p4172_p5 = scmp.ne.s32.totalorder %s417_s3, %s4171_s30  ;;  %p4179_p10 = scmp.lt.s32.totalorder %s417_s3, %s417_s3 }
  0xe7   : > { %p4180_p11 = scmp.lt.s32.totalorder %s4178_s1, %s4171_s30 }
  0xe8   : > { %p4174_p7 = pnand %p4172_p5, %p4540_p8 }
  0xe9   : > { %p4181_p12 = por %p4180_p11, %p4179_p10 }
  0xea   : > { %p4175_p9 = pneg %p4174_p7 }
  0xec   : > { %p4182_p4 = pnand %p4181_p12, %p4175_p9 }
  0xee   : > { %4185 = shalt.err (!%p4182_p4)
}
  0xef   : > { %3562 = dma.hbm_to_vmem [thread:$0]  (!%p4526_p6), %s5189_s6, 16, %s417_s3, [#allocation12]  }
  0xf0   : > { %s4407_s17 = smov [#allocation16]   ;;  %s4408_s0 = smov [#allocation19]  }
  0xf1   : > { %s438_s19 = sshll.u32 %s4407_s17, 4  ;;  %s462_s15 = sshll.u32 %s4408_s0, 4  ;;  %s439_s19 = int_to_ptr.vmem [resolvable:$true] %s438_s19  ;;  %s463_s15 = int_to_ptr.vmem [resolvable:$true] %s462_s15 }
  0xf2   : > { %s4186_s29 = scalar_lea.hbm %s5191_s8, 16 }
  0xf3   : > { %p4187_p13 = scmp.ne.s32.totalorder %s5191_s8, %s4186_s29  ;;  %p4193_p3 = scmp.lt.u32.totalorder %s4186_s29, %s5191_s8 }
  0xf5   : > { %p4189_p0 = pnand %p4187_p13, %p4540_p8 }
  0xf7   : > { %p4190_p1 = pneg %p4189_p0 }
  0xf9   : > { %p4195_p2 = pnand %p4193_p3, %p4190_p1 }
  0xfb   : > { %4198 = shalt.err (!%p4195_p2)
}
  0xfc   : > { %s4199_s3 = scalar_lea.vmem %s439_s19, 16  ;;  %s4206_s25 = scalar_lea.vmem %s439_s19, 32 }
  0xfd   : > { %p4200_p5 = scmp.ne.s32.totalorder %s439_s19, %s4199_s3  ;;  %p4207_p10 = scmp.lt.s32.totalorder %s439_s19, %s439_s19 }
  0xfe   : > { %p4208_p11 = scmp.lt.s32.totalorder %s4206_s25, %s4199_s3 }
  0xff   : > { %p4202_p7 = pnand %p4200_p5, %p4540_p8 }
 0x100   : > { %p4209_p12 = por %p4208_p11, %p4207_p10 }
 0x101   : > { %p4203_p9 = pneg %p4202_p7 }
 0x103   : > { %p4210_p4 = pnand %p4209_p12, %p4203_p9 }
 0x105   : > { %4213 = shalt.err (!%p4210_p4)
}
 0x106   : > { %3568 = dma.hbm_to_vmem [thread:$0]  (!%p4526_p6), %s5191_s8, 16, %s439_s19, [#allocation15]  }
 0x107   : > { %s4214_s14 = scalar_lea.hbm %s5193_s10, 32 }
 0x108   : > { %p4215_p13 = scmp.ne.s32.totalorder %s5193_s10, %s4214_s14  ;;  %p4221_p3 = scmp.lt.u32.totalorder %s4214_s14, %s5193_s10 }
 0x10a   : > { %p4217_p0 = pnand %p4215_p13, %p4540_p8 }
 0x10c   : > { %p4218_p1 = pneg %p4217_p0 }
 0x10e   : > { %p4223_p2 = pnand %p4221_p3, %p4218_p1 }
 0x110   : > { %4226 = shalt.err (!%p4223_p2)
}
 0x111   : > { %s4227_s1 = scalar_lea.vmem %s463_s15, 32  ;;  %p4235_p10 = scmp.lt.s32.totalorder %s463_s15, %s463_s15 }
 0x112   : > { %p4228_p5 = scmp.ne.s32.totalorder %s463_s15, %s4227_s1  ;;  %p4236_p11 = scmp.lt.s32.totalorder %s4227_s1, %s4227_s1 }
 0x114   : > { %p4230_p7 = pnand %p4228_p5, %p4540_p8  ;;  %p4237_p12 = por %p4236_p11, %p4235_p10 }
 0x116   : > { %p4231_p9 = pneg %p4230_p7 }
 0x118   : > { %p4238_p4 = pnand %p4237_p12, %p4231_p9 }
 0x11a   : > { %4241 = shalt.err (!%p4238_p4)
}
 0x11b   : > { %3574 = dma.hbm_to_vmem [thread:$0]  (!%p4526_p6), %s5193_s10, 32, %s463_s15, [#allocation18]  }
 0x11c   : > { %s4409_s25 = smov [#allocation22]   ;;  %s4242_s13 = scalar_lea.hbm %s5195_s12, 16 }
 0x11d   : > { %s486_s23 = sshll.u32 %s4409_s25, 4  ;;  %p4243_p13 = scmp.ne.s32.totalorder %s5195_s12, %s4242_s13  ;;  %s487_s23 = int_to_ptr.vmem [resolvable:$true] %s486_s23 }
 0x11e   : > { %p4249_p3 = scmp.lt.u32.totalorder %s4242_s13, %s5195_s12 }
 0x11f   : > { %p4245_p0 = pnand %p4243_p13, %p4540_p8 }
 0x121   : > { %p4246_p1 = pneg %p4245_p0 }
 0x123   : > { %p4251_p2 = pnand %p4249_p3, %p4246_p1 }
 0x125   : > { %4254 = shalt.err (!%p4251_p2)
}
 0x126   : > { %s4255_s15 = scalar_lea.vmem %s487_s23, 16  ;;  %s4262_s30 = scalar_lea.vmem %s487_s23, 32 }
 0x127   : > { %p4256_p5 = scmp.ne.s32.totalorder %s487_s23, %s4255_s15  ;;  %p4263_p10 = scmp.lt.s32.totalorder %s487_s23, %s487_s23 }
 0x128   : > { %p4264_p11 = scmp.lt.s32.totalorder %s4262_s30, %s4255_s15 }
 0x129   : > { %p4258_p7 = pnand %p4256_p5, %p4540_p8 }
 0x12a   : > { %p4265_p12 = por %p4264_p11, %p4263_p10 }
 0x12b   : > { %p4259_p9 = pneg %p4258_p7 }
 0x12d   : > { %p4266_p4 = pnand %p4265_p12, %p4259_p9 }
 0x12f   : > { %4269 = shalt.err (!%p4266_p4)
}
 0x130   : > { %s5226_s16 = sld [smem:[#allocation32_spill]]  ;;  %s5227_s3 = sld [smem:[#allocation33_spill]] }
 0x131   : > { %3580 = dma.hbm_to_vmem [thread:$0]  (!%p4526_p6), %s5195_s12, 16, %s487_s23, [#allocation21]  }
 0x132   : > { %s3067_s25 = sadd.s32 4294967294, %s4390_s28   ;;  %s4778_s18 = sadd.s32 1, %s4390_s28  }
 0x133   : > { %s39_s17 = ssub.s32 %s4390_s28, %s4778_s18  ;;  %s42_s0 = sadd.s32 1, %s4386_s27 }
 0x134   : > { %p40_p8 = scmp.eq.s32.totalorder %s39_s17, 0  ;;  %p49_p13 = scmp.ne.s32.totalorder %s4386_s27, %s4382_s26 }
 0x135   : > { %p50_p0 = scmp.eq.s32.totalorder %s4390_s28, 0  ;;  %p337_p7 = scmp.eq.s32.totalorder %s3067_s25, 1 }
 0x136   : > { %p55_p1 = scmp.ne.s32.totalorder %s4382_s26, %s5226_s16  ;;  %p5229_p2 = scmp.eq.s32.totalorder %s5227_s3, 0 }
 0x137   : > { %s4789_s13 = scalar_select %p40_p8, %s4386_s27, %s42_s0  }
 0x138   : > { %p4791_p3 = por %p50_p0, %p49_p13  ;;  %p4797_p6 = por %p5229_p2, %p55_p1 }
 0x139   : > { %p331_p5 = scmp.eq.s32.totalorder %s5227_s3, 1  ;;  %p3601_p9 = scmp.lt.s32.totalorder %s4390_s28, 2 }
 0x13a   : > { %s497_s29 = sand.u32 1, %s4386_s27   ;;  %p4808_p11 = por %p337_p7, %p55_p1 }
 0x13b   : > { %p4804_p10 = por %p331_p5, %p49_p13  ;;  %s3082_s15 = sshll.u32 %s497_s29, 3 }
 0x13c   : > { %s5232_s22 = scalar_select %p4808_p11, 1, 0 }
 0x13d   : > { %s5231_s21 = scalar_select %p4804_p10, 1, 0 }
 0x13e   : > { %s3277_s30 = sshll.u32 %s4390_s28, 7  ;;  %s5233_s16 = sld [smem:[#allocation35_spill]] }
 0x13f   : > { %s501_s3 = scalar_lea.vmem [#allocation2], %s3082_s15  ;;  %p4822_p12 = pnand %p3601_p9, %p4791_p3 }
 0x140   : > { %s508_s25 = sshll.u32 %s501_s3, 4  ;;  %s4826_s2 = scalar_lea.sflag [#allocation3], %s497_s29  ;;  %s4818_s25 = int_to_ptr.vmem [resolvable:$true] %s508_s25 }
 0x141   : > { %p4272_p8 = pneg %p4822_p12 }
 0x144   : > { %s4816_s17 = scalar_lea.hbm %s5233_s16, %s3277_s30  ;;  %s4275_s14 = scalar_lea.hbm %s5233_s16, 256 }
 0x145   : > { %s4270_s1 = scalar_lea.hbm %s4816_s17, 128  ;;  %p4276_p1 = scmp.lt.u32.totalorder %s4816_s17, %s5233_s16 }
 0x146   : > { %p4271_p4 = scmp.ne.s32.totalorder %s4816_s17, %s4270_s1  ;;  %p4277_p3 = scmp.lt.u32.totalorder %s4275_s14, %s4270_s1 }
 0x147   : > { %p4279_p5 = scmp.lt.u32.totalorder %s4270_s1, %s4816_s17 }
 0x148   : > { %p4273_p13 = pnand %p4272_p8, %p4271_p4  ;;  %p4278_p2 = por %p4277_p3, %p4276_p1 }
 0x14a   : > { %p4274_p0 = pneg %p4273_p13  ;;  %p4280_p7 = por %p4279_p5, %p4278_p2 }
 0x14c   : > { %p4281_p9 = pnand %p4280_p7, %p4274_p0 }
 0x14e   : > { %4284 = shalt.err (!%p4281_p9)
}
 0x14f   : > { %s4285_s29 = scalar_lea.vmem %s4818_s25, 128  ;;  %s4410_s15 = smov [#allocation2]  }
 0x150   : > { %p4286_p4 = scmp.ne.s32.totalorder %s4818_s25, %s4285_s29  ;;  %s4290_s30 = sshll.u32 %s4410_s15, 4  ;;  %s4291_s30 = int_to_ptr.vmem [resolvable:$false] %s4290_s30 }
 0x151   : > { %s4292_s19 = scalar_lea.vmem %s4291_s30, 256  ;;  %p4293_p10 = scmp.lt.s32.totalorder %s4818_s25, %s4291_s30 }
 0x152   : > { %p4288_p13 = pnand %p4286_p4, %p4272_p8  ;;  %p4294_p1 = scmp.lt.s32.totalorder %s4292_s19, %s4285_s29 }
 0x154   : > { %p4289_p11 = pneg %p4288_p13  ;;  %p4295_p3 = por %p4294_p1, %p4293_p10 }
 0x156   : > { %p4296_p2 = pnand %p4295_p3, %p4289_p11 }
 0x158   : > { %4299 = shalt.err (!%p4296_p2)
}
 0x159   : > { %3584 = dma.hbm_to_vmem [thread:$0]  (!%p4822_p12), %s4816_s17, 128, %s4818_s25, %s4826_s2, %s5224_s20, %s5224_s20, %s5223_s24  }
 0x15a   : > { %s5235_s1 = sld [smem:[#allocation34_spill]] }
 0x160   : > { %p5236_p8 = scmp.ne.s32.totalorder %s5235_s1, 0 }
 0x161   : > { %s4860_s14 = sand.u32 (!%p5236_p8), 1, %s4382_s26  }
 0x162   : > { %520 = sbr.rel (%p5236_p8) target bundleno = 4527 (0x11af), region = 72  ;;  %s3086_s3 = sshll.u32 (!%p5236_p8), %s4860_s14, 3 }
 0x163   : > { %s523_s29 = scalar_lea.sflag (!%p5236_p8), [#allocation3], %s4860_s14  ;;  %s526_s0 = scalar_lea.vmem (!%p5236_p8), [#allocation2], %s3086_s3 }
 0x169   : > { %4345 = dma.done.wait (%p4797_p6), %s523_s29, 128  }
 0x16a   : > { %4347 = vsyncadd (%p4797_p6), %s523_s29, 4294967168  ;;  %s5237_s2 = sld [smem:[#allocation33_spill]] }
 0x170   : > { %p5238_p10 = scmp.eq.s32.totalorder %s5237_s2, 0 }
 0x172   : > { %4349 = dma.done.wait (%p5238_p10), [#allocation6], 32   ;;  %p5239_p11 = pmov %p5238_p10 }
 0x173   : > { %p5240_p12 = pmov %p5238_p10 }
 0x174   : > { %4351 = vsyncadd (%p5239_p11), [#allocation6], 4294967264 }
 0x175   : > { %4353 = dma.done.wait (%p5240_p12), [#allocation9], 12480   ;;  %p5241_p0 = pmov %p5238_p10 }
 0x177   : > { %4355 = vsyncadd (%p5241_p0), [#allocation9], 4294954816  ;;  %p5242_p5 = pmov %p5241_p0 }
 0x178   : > { %p5243_p7 = pmov %p5241_p0 }
 0x179   : > { %4357 = dma.done.wait (%p5242_p5), [#allocation12], 4112  }
 0x17a   : > { %4359 = vsyncadd (%p5243_p7), [#allocation12], 4294963184  ;;  %p5244_p6 = pmov %p5241_p0 }
 0x17b   : > { %p5245_p9 = pmov %p5241_p0 }
 0x17c   : > { %4361 = dma.done.wait (%p5244_p6), [#allocation15], 32  }
 0x17d   : > { %4363 = vsyncadd (%p5245_p9), [#allocation15], 4294967264  ;;  %p5246_p4 = pmov %p5241_p0 }
 0x17e   : > { %p5247_p13 = pmov %p5241_p0 }
 0x17f   : > { %4365 = dma.done.wait (%p5246_p4), [#allocation18], 2080  }
 0x180   : > { %4367 = vsyncadd (%p5247_p13), [#allocation18], 4294965216  ;;  %p5248_p1 = pmov %p5241_p0 }
 0x181   : > { %p5249_p3 = pmov %p5241_p0 }
 0x182   : > { %4369 = dma.done.wait (%p5248_p1), [#allocation21], 2064  }
 0x183   : > { %4371 = vsyncadd (%p5249_p3), [#allocation21], 4294965232  ;;  %v3282_v0 = vld [vmem:[%s526_s0] sm:$0xff]   ;;  %v4411_v44 = vmov 0   ;;  %v3100_v54 = vld [vmem:[#allocation5] ss:$0 sm:$0xff] }
 0x184   : > { %v4894_v1 = vunpack.c.l.bf16 %v3282_v0  ;;  %v4897_v2 = vunpack.c.h.bf16 %v3282_v0  ;;  %v3670_v3 = vld [vmem:[#allocation8 + $0x4] ss:$48 sps:$4 sm:$0xff]   ;;  %v3672_v4 = vld [vmem:[#allocation8 + $0xc] ss:$48 sps:$4 sm:$0xff]   ;;  %v3674_v5 = vld [vmem:[#allocation8] ss:$48 sps:$4 sm:$0xff]   ;;  %1338 = vmatprep.mubr.bf16.mxu0 %v4411_v44  ;;  %1381 = vmatprep.mubr.bf16.mxu1 %v4411_v44 }
 0x185   : > { %v3675_v6 = vld [vmem:[#allocation8 + $0x8] ss:$48 sps:$4 sm:$0xff]   ;;  %v3676_v7 = vld [vmem:[#allocation8 + $0x64] ss:$48 sps:$4 sm:$0xff]   ;;  %v3678_v8 = vld [vmem:[#allocation8 + $0x6c] ss:$48 sps:$4 sm:$0xff]   ;;  %1306 = vmatprep.subr.bf16.mxu0 %v3670_v3  ;;  %1349 = vmatprep.subr.bf16.mxu1 %v3672_v4 }
 0x186   : > { %626 = vadd.xlane.f32.xlu0 %v4894_v1  ;;  %v3680_v9 = vld [vmem:[#allocation8 + $0x60] ss:$48 sps:$4 sm:$0xff]   ;;  %1307 = vmatpush1.bf16.msra.mxu0 %v3674_v5  ;;  %v3681_v10 = vld [vmem:[#allocation8 + $0x68] ss:$48 sps:$4 sm:$0xff]   ;;  %v3682_v19 = vld [vmem:[#allocation8 + $0xc4] ss:$48 sps:$4 sm:$0xff]  }
 0x187   : > { %1350 = vmatpush1.bf16.msra.mxu1 %v3675_v6  ;;  %1308 = vmatprep.subr.bf16.mxu0 %v3676_v7  ;;  %v3684_v20 = vld [vmem:[#allocation8 + $0xcc] ss:$48 sps:$4 sm:$0xff]   ;;  %v3686_v21 = vld [vmem:[#allocation8 + $0xc0] ss:$48 sps:$4 sm:$0xff]   ;;  %v3687_v22 = vld [vmem:[#allocation8 + $0xc8] ss:$48 sps:$4 sm:$0xff]  }
 0x188   : > { %1351 = vmatprep.subr.bf16.mxu1 %v3678_v8  ;;  %v3688_v23 = vld [vmem:[#allocation8 + $0x124] ss:$48 sps:$4 sm:$0xff]   ;;  %v3690_v24 = vld [vmem:[#allocation8 + $0x12c] ss:$48 sps:$4 sm:$0xff]   ;;  %v3692_v25 = vld [vmem:[#allocation8 + $0x120] ss:$48 sps:$4 sm:$0xff]  }
 0x189   : > { %v3693_v26 = vld [vmem:[#allocation8 + $0x128] ss:$48 sps:$4 sm:$0xff]   ;;  %v3694_v27 = vld [vmem:[#allocation8 + $0x184] ss:$48 sps:$4 sm:$0xff]   ;;  %v3696_v28 = vld [vmem:[#allocation8 + $0x18c] ss:$48 sps:$4 sm:$0xff]  }
 0x18a   : > { %628 = vadd.xlane.f32.xlu0 %v4897_v2  ;;  %1309 = vmatpush1.bf16.msra.mxu0 %v3680_v9  ;;  %v3698_v29 = vld [vmem:[#allocation8 + $0x180] ss:$48 sps:$4 sm:$0xff]   ;;  %v3699_v30 = vld [vmem:[#allocation8 + $0x188] ss:$48 sps:$4 sm:$0xff]   ;;  %v3700_v31 = vld [vmem:[#allocation8 + $0x1e4] ss:$48 sps:$4 sm:$0xff]  }
 0x18b   : > { %1352 = vmatpush1.bf16.msra.mxu1 %v3681_v10  ;;  %1310 = vmatprep.subr.bf16.mxu0 %v3682_v19  ;;  %v3702_v32 = vld [vmem:[#allocation8 + $0x1ec] ss:$48 sps:$4 sm:$0xff]   ;;  %v3704_v33 = vld [vmem:[#allocation8 + $0x1e0] ss:$48 sps:$4 sm:$0xff]   ;;  %v3705_v34 = vld [vmem:[#allocation8 + $0x1e8] ss:$48 sps:$4 sm:$0xff]  }
 0x18c   : > { %1353 = vmatprep.subr.bf16.mxu1 %v3684_v20  ;;  %v3706_v35 = vld [vmem:[#allocation8 + $0x244] ss:$48 sps:$4 sm:$0xff]   ;;  %v3708_v36 = vld [vmem:[#allocation8 + $0x24c] ss:$48 sps:$4 sm:$0xff]   ;;  %v3710_v37 = vld [vmem:[#allocation8 + $0x240] ss:$48 sps:$4 sm:$0xff]  }
 0x18d   : > { %v3711_v38 = vld [vmem:[#allocation8 + $0x248] ss:$48 sps:$4 sm:$0xff]   ;;  %v3712_v39 = vld [vmem:[#allocation8 + $0x2a4] ss:$48 sps:$4 sm:$0xff]   ;;  %v3714_v40 = vld [vmem:[#allocation8 + $0x2ac] ss:$48 sps:$4 sm:$0xff]  }
 0x18e   : > { %1311 = vmatpush1.bf16.msra.mxu0 %v3686_v21  ;;  %v3716_v41 = vld [vmem:[#allocation8 + $0x2a0] ss:$48 sps:$4 sm:$0xff]   ;;  %v3717_v42 = vld [vmem:[#allocation8 + $0x2a8] ss:$48 sps:$4 sm:$0xff]   ;;  %v3720_v43 = vld [vmem:[#allocation8 + $0x14] ss:$48 sps:$4 sm:$0xff]  }
 0x18f   : > { %1354 = vmatpush1.bf16.msra.mxu1 %v3687_v22  ;;  %1312 = vmatprep.subr.bf16.mxu0 %v3688_v23  ;;  %v3723_v45 = vld [vmem:[#allocation8 + $0x1c] ss:$48 sps:$4 sm:$0xff]   ;;  %v3718_v62 = vld [vmem:[#allocation8 + $0x10] ss:$48 sps:$4 sm:$0xff]   ;;  %v3721_v63 = vld [vmem:[#allocation8 + $0x18] ss:$48 sps:$4 sm:$0xff]  }
 0x190   : > { %1355 = vmatprep.subr.bf16.mxu1 %v3690_v24  ;;  %v3101_v58 = vld [vmem:[#allocation7] ss:$0 sm:$0xff]  ;;  %v3726_v3 = vld [vmem:[#allocation8 + $0x74] ss:$48 sps:$4 sm:$0xff]   ;;  %v3724_v5 = vld [vmem:[#allocation8 + $0x70] ss:$48 sps:$4 sm:$0xff]  }
 0x191   : > { %v3729_v4 = vld [vmem:[#allocation8 + $0x7c] ss:$48 sps:$4 sm:$0xff]   ;;  %v3727_v6 = vld [vmem:[#allocation8 + $0x78] ss:$48 sps:$4 sm:$0xff]   ;;  %v3732_v7 = vld [vmem:[#allocation8 + $0xd4] ss:$48 sps:$4 sm:$0xff]  }
 0x192   : > { %1313 = vmatpush1.bf16.msra.mxu0 %v3692_v25  ;;  %v3735_v8 = vld [vmem:[#allocation8 + $0xdc] ss:$48 sps:$4 sm:$0xff]   ;;  %v3730_v9 = vld [vmem:[#allocation8 + $0xd0] ss:$48 sps:$4 sm:$0xff]   ;;  %v3733_v10 = vld [vmem:[#allocation8 + $0xd8] ss:$48 sps:$4 sm:$0xff]  }
 0x193   : > { %1356 = vmatpush1.bf16.msra.mxu1 %v3693_v26  ;;  %1314 = vmatprep.subr.bf16.mxu0 %v3694_v27  ;;  %v3750_v19 = vld [vmem:[#allocation8 + $0x1f4] ss:$48 sps:$4 sm:$0xff]   ;;  %v3753_v20 = vld [vmem:[#allocation8 + $0x1fc] ss:$48 sps:$4 sm:$0xff]   ;;  %v3748_v21 = vld [vmem:[#allocation8 + $0x1f0] ss:$48 sps:$4 sm:$0xff]  }
 0x194   : > { %1357 = vmatprep.subr.bf16.mxu1 %v3696_v28  ;;  %v3751_v22 = vld [vmem:[#allocation8 + $0x1f8] ss:$48 sps:$4 sm:$0xff]   ;;  %v3756_v23 = vld [vmem:[#allocation8 + $0x254] ss:$48 sps:$4 sm:$0xff]   ;;  %v3759_v24 = vld [vmem:[#allocation8 + $0x25c] ss:$48 sps:$4 sm:$0xff]  }
 0x195   : > { %v3754_v25 = vld [vmem:[#allocation8 + $0x250] ss:$48 sps:$4 sm:$0xff]   ;;  %v3757_v26 = vld [vmem:[#allocation8 + $0x258] ss:$48 sps:$4 sm:$0xff]   ;;  %v3762_v27 = vld [vmem:[#allocation8 + $0x2b4] ss:$48 sps:$4 sm:$0xff]  }
 0x196   : > { %1315 = vmatpush1.bf16.msra.mxu0 %v3698_v29  ;;  %v3765_v28 = vld [vmem:[#allocation8 + $0x2bc] ss:$48 sps:$4 sm:$0xff]   ;;  %v3760_v29 = vld [vmem:[#allocation8 + $0x2b0] ss:$48 sps:$4 sm:$0xff]   ;;  %vm4413_vm0 = vmmov 0   ;;  %vm1608_vm1 = vcmask 130048  }
 0x197   : > { %1358 = vmatpush1.bf16.msra.mxu1 %v3699_v30  ;;  %1316 = vmatprep.subr.bf16.mxu0 %v3700_v31  ;;  %v3763_v30 = vld [vmem:[#allocation8 + $0x2b8] ss:$48 sps:$4 sm:$0xff]   ;;  %v3768_v31 = vld [vmem:[#allocation8 + $0x24] ss:$48 sps:$4 sm:$0xff]   ;;  %s3280_s24 = sshll.u32 %s5237_s2, 7  ;;  %s616_s20 = scalar_lea.vmem [#allocation23], %s3086_s3 }
 0x198   : > { %1359 = vmatprep.subr.bf16.mxu1 %v3702_v32  ;;  %v3771_v32 = vld [vmem:[#allocation8 + $0x2c] ss:$48 sps:$4 sm:$0xff]   ;;  %s2880_s23 = sshll.u32 %s616_s20, 4  ;;  %s5250_s15 = sld [smem:[#allocation39_spill]]  ;;  %s5139_s23 = int_to_ptr.vmem [resolvable:$true] %s2880_s23 }
 0x199   : > { %s2867_s19 = scalar_lea.sflag [#allocation4], %s4860_s14  ;;  %s4300_s1 = scalar_lea.vmem %s5139_s23, 128 }
 0x19a   : > { %1317 = vmatpush1.bf16.msra.mxu0 %v3704_v33  ;;  %v3766_v33 = vld [vmem:[#allocation8 + $0x20] ss:$48 sps:$4 sm:$0xff]   ;;  %p4301_p2 = scmp.ne.s32.totalorder %s5139_s23, %s4300_s1  ;;  %p5251_p8 = scmp.ne.s32.totalorder %s5231_s21, 0 }
 0x19b   : > { %1360 = vmatpush1.bf16.msra.mxu1 %v3705_v34  ;;  %1318 = vmatprep.subr.bf16.mxu0 %v3706_v35  ;;  %v3769_v34 = vld [vmem:[#allocation8 + $0x28] ss:$48 sps:$4 sm:$0xff]   ;;  %v3774_v35 = vld [vmem:[#allocation8 + $0x84] ss:$48 sps:$4 sm:$0xff]   ;;  %s4414_s3 = smov [#allocation23]  }
 0x19c   : > { %1361 = vmatprep.subr.bf16.mxu1 %v3708_v36  ;;  %v3777_v36 = vld [vmem:[#allocation8 + $0x8c] ss:$48 sps:$4 sm:$0xff]   ;;  %p4302_p10 = pnand %p4301_p2, %p5251_p8  ;;  %s4304_s29 = sshll.u32 %s4414_s3, 4  ;;  %s4305_s29 = int_to_ptr.vmem [resolvable:$false] %s4304_s29 }
 0x19d   : > { %s4306_s0 = scalar_lea.vmem %s4305_s29, 256  ;;  %p4307_p12 = scmp.lt.s32.totalorder %s5139_s23, %s4305_s29 }
 0x19e   : > { %1319 = vmatpush1.bf16.msra.mxu0 %v3710_v37  ;;  %v3772_v37 = vld [vmem:[#allocation8 + $0x80] ss:$48 sps:$4 sm:$0xff]   ;;  %s5137_s30 = scalar_lea.hbm %s5250_s15, %s3280_s24  ;;  %p4303_p11 = pneg %p4302_p10 }
 0x19f   : > { %1362 = vmatpush1.bf16.msra.mxu1 %v3711_v38  ;;  %1320 = vmatprep.subr.bf16.mxu0 %v3712_v39  ;;  %v3775_v38 = vld [vmem:[#allocation8 + $0x88] ss:$48 sps:$4 sm:$0xff]   ;;  %v3780_v39 = vld [vmem:[#allocation8 + $0xe4] ss:$48 sps:$4 sm:$0xff]   ;;  %p4308_p0 = scmp.lt.s32.totalorder %s4306_s0, %s4300_s1 }
 0x1a0   : > { %1363 = vmatprep.subr.bf16.mxu1 %v3714_v40  ;;  %v3783_v40 = vld [vmem:[#allocation8 + $0xec] ss:$48 sps:$4 sm:$0xff]  }
 0x1a1   : > { %p4309_p5 = por %p4308_p0, %p4307_p12 }
 0x1a2   : > { %1321 = vmatpush1.bf16.msra.mxu0 %v3716_v41  ;;  %v3778_v41 = vld [vmem:[#allocation8 + $0xe0] ss:$48 sps:$4 sm:$0xff]  }
 0x1a3   : > { %1364 = vmatpush1.bf16.msra.mxu1 %v3717_v42  ;;  %1392 = vmatprep.subr.bf16.mxu0 %v3720_v43  ;;  %v3781_v42 = vld [vmem:[#allocation8 + $0xe8] ss:$48 sps:$4 sm:$0xff]   ;;  %v3786_v43 = vld [vmem:[#allocation8 + $0x144] ss:$48 sps:$4 sm:$0xff]   ;;  %p4310_p7 = pnand %p4309_p5, %p4303_p11 }
 0x1a4   : > { %1435 = vmatprep.subr.bf16.mxu1 %v3723_v45  ;;  %v3789_v45 = vld [vmem:[#allocation8 + $0x14c] ss:$48 sps:$4 sm:$0xff]  }
 0x213   : > { %v627_v11 = vpop.xlane.xlu0 %626 }
 0x214   : > { %v631_v12 = vmul.f32 0.0078125, %v627_v11  ;;  %v3738_v11 = vld [vmem:[#allocation8 + $0x134] ss:$48 sps:$4 sm:$0xff]  }
 0x216   : > { %v4901_v13 = vsub.f32 %v4894_v1, %v631_v12  ;;  %v3741_v12 = vld [vmem:[#allocation8 + $0x13c] ss:$48 sps:$4 sm:$0xff]  }
 0x217   : > { %v629_v14 = vpop.xlane.xlu0 %628 }
 0x218   : > { %v632_v15 = vmul.f32 0.0078125, %v629_v14  ;;  %v635_v16 = vmul.f32 %v4901_v13, %v4901_v13  ;;  %v3739_v14 = vld [vmem:[#allocation8 + $0x138] ss:$48 sps:$4 sm:$0xff]  }
 0x21a   : > { %v4906_v17 = vsub.f32 %v4897_v2, %v632_v15  ;;  %637 = vadd.xlane.f32.xlu1 %v635_v16  ;;  %v3744_v15 = vld [vmem:[#allocation8 + $0x194] ss:$48 sps:$4 sm:$0xff]   ;;  %v3747_v16 = vld [vmem:[#allocation8 + $0x19c] ss:$48 sps:$4 sm:$0xff]  }
 0x21c   : > { %v636_v18 = vmul.f32 %v4906_v17, %v4906_v17 }
 0x21e   : > { %639 = vadd.xlane.f32.xlu1 %v636_v18  ;;  %v3745_v18 = vld [vmem:[#allocation8 + $0x198] ss:$48 sps:$4 sm:$0xff]  }
 0x2a7   : > { %v638_v46 = vpop.xlane.xlu1 %637 }
 0x2a8   : > { %v641_v47 = vmul.f32 0.0078125, %v638_v46  ;;  %v3784_v46 = vld [vmem:[#allocation8 + $0x140] ss:$48 sps:$4 sm:$0xff]  }
 0x2aa   : > { %v643_v48 = vadd.f32 1e-06, %v641_v47  ;;  %v3787_v47 = vld [vmem:[#allocation8 + $0x148] ss:$48 sps:$4 sm:$0xff]  }
 0x2ab   : > { %v640_v49 = vpop.xlane.xlu1 %639 }
 0x2ac   : > { %3886 = vrsqrt.f32 %v643_v48  ;;  %v642_v50 = vmul.f32 0.0078125, %v640_v49  ;;  %v3792_v48 = vld [vmem:[#allocation8 + $0x1a4] ss:$48 sps:$4 sm:$0xff]   ;;  %v3795_v49 = vld [vmem:[#allocation8 + $0x1ac] ss:$48 sps:$4 sm:$0xff]  }
 0x2ae   : > { %v644_v51 = vadd.f32 1e-06, %v642_v50  ;;  %v3790_v50 = vld [vmem:[#allocation8 + $0x1a0] ss:$48 sps:$4 sm:$0xff]  }
 0x2b0   : > { %3888 = vrsqrt.f32 %v644_v51  ;;  %v3793_v51 = vld [vmem:[#allocation8 + $0x1a8] ss:$48 sps:$4 sm:$0xff]  }
 0x2b6   : > { %v3887_v52 = vpop.eup %3886 }
 0x2b7   : > { %v647_v53 = vmul.f32 %v3887_v52, %v4901_v13  ;;  %v3736_v13 = vld [vmem:[#allocation8 + $0x130] ss:$48 sps:$4 sm:$0xff]   ;;  %v3798_v52 = vld [vmem:[#allocation8 + $0x204] ss:$48 sps:$4 sm:$0xff]  }
 0x2b9   : > { %v655_v56 = vmul.f32 %v3100_v54, %v647_v53  ;;  %v3801_v53 = vld [vmem:[#allocation8 + $0x20c] ss:$48 sps:$4 sm:$0xff]  }
 0x2ba   : > { %v3889_v55 = vpop.eup %3888 }
 0x2bb   : > { %v648_v57 = vmul.f32 %v3889_v55, %v4906_v17  ;;  %v663_v60 = vadd.f32 %v3101_v58, %v655_v56  ;;  %v3742_v17 = vld [vmem:[#allocation8 + $0x190] ss:$48 sps:$4 sm:$0xff]   ;;  %v3799_v55 = vld [vmem:[#allocation8 + $0x208] ss:$48 sps:$4 sm:$0xff]   ;;  %v3804_v56 = vld [vmem:[#allocation8 + $0x264] ss:$48 sps:$4 sm:$0xff]  }
 0x2bd   : > { %v656_v59 = vmul.f32 %v3100_v54, %v648_v57  ;;  %v3796_v54 = vld [vmem:[#allocation8 + $0x200] ss:$48 sps:$4 sm:$0xff]   ;;  %v3807_v57 = vld [vmem:[#allocation8 + $0x26c] ss:$48 sps:$4 sm:$0xff]  }
 0x2bf   : > { %v664_v61 = vadd.f32 %v3101_v58, %v656_v59  ;;  %v3802_v58 = vld [vmem:[#allocation8 + $0x260] ss:$48 sps:$4 sm:$0xff]   ;;  %v3805_v59 = vld [vmem:[#allocation8 + $0x268] ss:$48 sps:$4 sm:$0xff]  }
 0x2c1   : > { %v4914_v0 = vpack.c.bf16 %v664_v61, %v663_v60  ;;  %v3810_v60 = vld [vmem:[#allocation8 + $0x2c4] ss:$48 sps:$4 sm:$0xff]   ;;  %v3813_v61 = vld [vmem:[#allocation8 + $0x2cc] ss:$48 sps:$4 sm:$0xff]  }
 0x2c3   : > { %1339 = vmatmul.mubr.bf16.vlgmr.msra.gmra.mrb[0].mxu0 %v4914_v0  ;;  %1382 = vmatmul.mubr.bf16.vlgmr.msra.gmra.mrb[0].mxu1 %v4914_v0 }
 0x2c4   : > { %1393 = vmatpush1.bf16.msra.mxu0 %v3718_v62  ;;  %1436 = vmatpush1.bf16.msra.mxu1 %v3721_v63  ;;  %v3808_v62 = vld [vmem:[#allocation8 + $0x2c0] ss:$48 sps:$4 sm:$0xff]   ;;  %v3811_v63 = vld [vmem:[#allocation8 + $0x2c8] ss:$48 sps:$4 sm:$0xff]  }
 0x2c5   : > { %1394 = vmatprep.subr.bf16.mxu0 %v3726_v3  ;;  %1437 = vmatprep.subr.bf16.mxu1 %v3729_v4  ;;  %v4412_v3 = vmov 0.0   ;;  %v766_v4 = vlaneseq }
 0x2c6   : > { %1424 = vmatprep.mubr.bf16.mxu0 %v4411_v44  ;;  %1467 = vmatprep.mubr.bf16.mxu1 %v4411_v44 }
 0x2c8   : > { %1395 = vmatpush1.bf16.msra.mxu0 %v3724_v5  ;;  %1438 = vmatpush1.bf16.msra.mxu1 %v3727_v6  ;;  %v767_v5 = vshrl.u32 %v766_v4, 7  ;;  %v4932_v6 = vld [vmem:[#allocation10 + $0x8] sm:$0xf] }
 0x2c9   : > { %1396 = vmatprep.subr.bf16.mxu0 %v3732_v7  ;;  %1439 = vmatprep.subr.bf16.mxu1 %v3735_v8 }
 0x2ca   : > { %v776_v7 = vsub.s32 2, %v767_v5  ;;  %v780_v8 = vsub.s32 3, %v767_v5 }
 0x2cc   : > { %1397 = vmatpush1.bf16.msra.mxu0 %v3730_v9  ;;  %1440 = vmatpush1.bf16.msra.mxu1 %v3733_v10  ;;  %v4938_v9 = vrot.slane %v4932_v6, %v780_v8  ;;  %v4940_v10 = vsub.s32 0, %v767_v5 }
 0x2cd   : > { %1398 = vmatprep.subr.bf16.mxu0 %v3738_v11  ;;  %1441 = vmatprep.subr.bf16.mxu1 %v3741_v12  ;;  %v762_v11 = vld [vmem:[#allocation10] sm:$0xff]  ;;  %v4942_v12 = vsub.s32 1, %v767_v5 }
 0x2d0   : > { %1399 = vmatpush1.bf16.msra.mxu0 %v3736_v13  ;;  %1442 = vmatpush1.bf16.msra.mxu1 %v3739_v14  ;;  %v769_v13 = vrot.slane %v762_v11, %v4940_v10  ;;  %v777_v14 = vrot.slane %v762_v11, %v776_v7 }
 0x2d1   : > { %1400 = vmatprep.subr.bf16.mxu0 %v3744_v15  ;;  %1443 = vmatprep.subr.bf16.mxu1 %v3747_v16 }
 0x2d4   : > { %1401 = vmatpush1.bf16.msra.mxu0 %v3742_v17  ;;  %1444 = vmatpush1.bf16.msra.mxu1 %v3745_v18  ;;  %v773_v17 = vrot.slane %v762_v11, %v4942_v12  ;;  %v781_v18 = vrot.slane %v762_v11, %v780_v8  ;;  %v801_v8 = vrot.slane %v4932_v6, %v4940_v10 }
 0x2d5   : > { %1402 = vmatprep.subr.bf16.mxu0 %v3750_v19  ;;  %1445 = vmatprep.subr.bf16.mxu1 %v3753_v20 }
 0x2d8   : > { %1403 = vmatpush1.bf16.msra.mxu0 %v3748_v21  ;;  %1446 = vmatpush1.bf16.msra.mxu1 %v3751_v22 }
 0x2d9   : > { %1404 = vmatprep.subr.bf16.mxu0 %v3756_v23  ;;  %1447 = vmatprep.subr.bf16.mxu1 %v3759_v24 }
 0x2dc   : > { %1405 = vmatpush1.bf16.msra.mxu0 %v3754_v25  ;;  %1448 = vmatpush1.bf16.msra.mxu1 %v3757_v26 }
 0x2dd   : > { %1406 = vmatprep.subr.bf16.mxu0 %v3762_v27  ;;  %1449 = vmatprep.subr.bf16.mxu1 %v3765_v28 }
 0x2e0   : > { %1407 = vmatpush1.bf16.msra.mxu0 %v3760_v29  ;;  %1450 = vmatpush1.bf16.msra.mxu1 %v3763_v30 }
 0x2e1   : > { %1478 = vmatprep.subr.bf16.mxu0 %v3768_v31  ;;  %1521 = vmatprep.subr.bf16.mxu1 %v3771_v32 }
 0x2e3   : > { %1425 = vmatmul.mubr.bf16.vlgmr.msra.gmra.mrb[4].mxu0 %v4914_v0  ;;  %1468 = vmatmul.mubr.bf16.vlgmr.msra.gmra.mrb[4].mxu1 %v4914_v0 }
 0x2e4   : > { %1479 = vmatpush1.bf16.msra.mxu0 %v3766_v33  ;;  %1522 = vmatpush1.bf16.msra.mxu1 %v3769_v34 }
 0x2e5   : > { %1480 = vmatprep.subr.bf16.mxu0 %v3774_v35  ;;  %1523 = vmatprep.subr.bf16.mxu1 %v3777_v36 }
 0x2e6   : > { %1510 = vmatprep.mubr.bf16.mxu0 %v4411_v44  ;;  %1553 = vmatprep.mubr.bf16.mxu1 %v4411_v44 }
 0x2e8   : > { %1481 = vmatpush1.bf16.msra.mxu0 %v3772_v37  ;;  %1524 = vmatpush1.bf16.msra.mxu1 %v3775_v38  ;;  %v784_v37 = vsub.s32 4, %v767_v5  ;;  %v792_v38 = vsub.s32 6, %v767_v5 }
 0x2e9   : > { %1482 = vmatprep.subr.bf16.mxu0 %v3780_v39  ;;  %1525 = vmatprep.subr.bf16.mxu1 %v3783_v40  ;;  %v788_v39 = vsub.s32 5, %v767_v5  ;;  %v796_v40 = vsub.s32 7, %v767_v5 }
 0x2ec   : > { %1483 = vmatpush1.bf16.msra.mxu0 %v3778_v41  ;;  %1526 = vmatpush1.bf16.msra.mxu1 %v3781_v42  ;;  %v785_v41 = vrot.slane %v762_v11, %v784_v37  ;;  %v793_v42 = vrot.slane %v762_v11, %v792_v38 }
 0x2ed   : > { %1484 = vmatprep.subr.bf16.mxu0 %v3786_v43  ;;  %1527 = vmatprep.subr.bf16.mxu1 %v3789_v45 }
 0x2f0   : > { %1485 = vmatpush1.bf16.msra.mxu0 %v3784_v46  ;;  %1528 = vmatpush1.bf16.msra.mxu1 %v3787_v47  ;;  %v789_v46 = vrot.slane %v762_v11, %v788_v39  ;;  %v797_v47 = vrot.slane %v762_v11, %v796_v40 }
 0x2f1   : > { %1486 = vmatprep.subr.bf16.mxu0 %v3792_v48  ;;  %1529 = vmatprep.subr.bf16.mxu1 %v3795_v49 }
 0x2f4   : > { %1487 = vmatpush1.bf16.msra.mxu0 %v3790_v50  ;;  %1530 = vmatpush1.bf16.msra.mxu1 %v3793_v51 }
 0x2f5   : > { %1488 = vmatprep.subr.bf16.mxu0 %v3798_v52  ;;  %1531 = vmatprep.subr.bf16.mxu1 %v3801_v53 }
 0x2f8   : > { %1489 = vmatpush1.bf16.msra.mxu0 %v3796_v54  ;;  %1532 = vmatpush1.bf16.msra.mxu1 %v3799_v55 }
 0x2f9   : > { %1490 = vmatprep.subr.bf16.mxu0 %v3804_v56  ;;  %1533 = vmatprep.subr.bf16.mxu1 %v3807_v57 }
 0x2fc   : > { %1491 = vmatpush1.bf16.msra.mxu0 %v3802_v58  ;;  %1534 = vmatpush1.bf16.msra.mxu1 %v3805_v59 }
 0x2fd   : > { %1492 = vmatprep.subr.bf16.mxu0 %v3810_v60  ;;  %1535 = vmatprep.subr.bf16.mxu1 %v3813_v61 }
 0x300   : > { %1493 = vmatpush1.bf16.msra.mxu0 %v3808_v62  ;;  %1536 = vmatpush1.bf16.msra.mxu1 %v3811_v63 }
 0x301   : > { %3364 = vmatprep.subr.bf16.mxu0 %v4412_v3  ;;  %3382 = vmatprep.subr.bf16.mxu1 %v4412_v3 }
 0x303   : > { %1511 = vmatmul.mubr.bf16.vlgmr.msra.gmra.mrb[8].mxu0 %v4914_v0  ;;  %1554 = vmatmul.mubr.bf16.vlgmr.msra.gmra.mrb[8].mxu1 %v4914_v0  ;;  %v4935_v0 = vrot.slane %v4932_v6, %v776_v7  ;;  %v805_v7 = vrot.slane %v4932_v6, %v4942_v12 }
 0x304   : > { %3366 = vmatprep.mubr.msk.bf16.mxu0 %vm4413_vm0, %v4412_v3  ;;  %3384 = vmatprep.mubr.msk.bf16.mxu1 %vm4413_vm0, %v4412_v3 }
 0x396   : > { %v1340_v15 = vpop.f32.mrb[0].mxu0  ;;  %v1383_v16 = vpop.f32.mrb[0].mxu1 }
 0x397   : > { %v1342_v19 = vpop.f32.mrb[1].mxu0  ;;  %v1385_v20 = vpop.f32.mrb[1].mxu1  ;;  %v1341_v23 = vadd.f32 %v1340_v15, %v769_v13  ;;  %v1384_v24 = vadd.f32 %v1383_v16, %v777_v14 }
 0x398   : > { %v1344_v21 = vpop.f32.mrb[2].mxu0  ;;  %v1387_v22 = vpop.f32.mrb[2].mxu1  ;;  %v1343_v29 = vadd.f32 %v1342_v19, %v773_v17  ;;  %v4946_v30 = vadd.f32 %v1385_v20, %v781_v18 }
 0x399   : > { %v1345_v25 = vadd.f32 %v1344_v21, %v769_v13  ;;  %v1388_v26 = vadd.f32 %v1387_v22, %v777_v14  ;;  %v1346_v27 = vpop.f32.mrb[3].mxu0  ;;  %v1389_v28 = vpop.f32.mrb[3].mxu1 }
 0x39a   : > { %v1347_v31 = vadd.f32 %v1346_v27, %v773_v17  ;;  %v4948_v32 = vadd.f32 %v1389_v28, %v781_v18 }
 0x39b   : > { %v1564_v33 = vpack.c.bf16 %v1345_v25, %v1341_v23  ;;  %v1566_v34 = vpack.c.bf16 %v1388_v26, %v1384_v24 }
 0x39c   : > { %v1565_v35 = vpack.c.bf16 %v1347_v31, %v1343_v29  ;;  %v1693_v36 = vpack.c.bf16 %v4948_v32, %v4946_v30 }
 0x39e   : > { %3365 = vmatpush3.bf16.xpose.msra.mxu0 %v1565_v35 }
 0x39f   : > { %3370 = vmatprep.subr.bf16.mxu0 %v4412_v3 }
 0x3a5   : > { %3367 = vmatmul.mubr.bf16.vlgmr.msra.gmra.mrb[12].mxu0 %v1564_v33 }
 0x3a6   : > { %3371 = vmatpush3.bf16.msra.mxu0 %v1566_v34  ;;  %3372 = vmatprep.mubr.msk.bf16.mxu0 %vm4413_vm0, %v4412_v3 }
 0x3a7   : > { %3376 = vmatprep.subr.bf16.mxu0 %v4412_v3 }
 0x3b6   : > { %v1426_v43 = vpop.f32.mrb[4].mxu0  ;;  %v1469_v45 = vpop.f32.mrb[4].mxu1 }
 0x3b7   : > { %v1428_v48 = vpop.f32.mrb[5].mxu0  ;;  %v1471_v49 = vpop.f32.mrb[5].mxu1  ;;  %v4956_v52 = vadd.f32 %v1426_v43, %v785_v41  ;;  %v4958_v53 = vadd.f32 %v1469_v45, %v793_v42 }
 0x3b8   : > { %v1430_v50 = vpop.f32.mrb[6].mxu0  ;;  %v1473_v51 = vpop.f32.mrb[6].mxu1  ;;  %v1429_v58 = vadd.f32 %v1428_v48, %v789_v46  ;;  %v4964_v59 = vadd.f32 %v1471_v49, %v797_v47 }
 0x3b9   : > { %v4960_v54 = vadd.f32 %v1430_v50, %v785_v41  ;;  %v4962_v55 = vadd.f32 %v1473_v51, %v793_v42  ;;  %v1432_v56 = vpop.f32.mrb[7].mxu0  ;;  %v1475_v57 = vpop.f32.mrb[7].mxu1 }
 0x3ba   : > { %v1433_v60 = vadd.f32 %v1432_v56, %v789_v46  ;;  %v4966_v61 = vadd.f32 %v1475_v57, %v797_v47 }
 0x3bb   : > { %v1694_v62 = vpack.c.bf16 %v4960_v54, %v4956_v52  ;;  %v1999_v63 = vpack.c.bf16 %v4962_v55, %v4958_v53 }
 0x3bc   : > { %v1695_v4 = vpack.c.bf16 %v1433_v60, %v1429_v58  ;;  %v2000_v5 = vpack.c.bf16 %v4966_v61, %v4964_v59 }
 0x3be   : > { %3383 = vmatpush3.bf16.msra.mxu1 %v1695_v4 }
 0x3bf   : > { %3408 = vmatprep.subr.bf16.mxu1 %v4412_v3 }
 0x3d6   : > { %v1512_v11 = vpop.f32.mrb[8].mxu0  ;;  %v1555_v13 = vpop.f32.mrb[8].mxu1 }
 0x3d7   : > { %v4980_v14 = vadd.f32 %v1555_v13, %v4935_v0  ;;  %v1514_v15 = vpop.f32.mrb[9].mxu0  ;;  %v1557_v16 = vpop.f32.mrb[9].mxu1  ;;  %v4987_v21 = vadd.f32 %v1512_v11, %v801_v8 }
 0x3d8   : > { %v4982_v17 = vadd.f32 %v1514_v15, %v805_v7  ;;  %v4985_v18 = vadd.f32 %v1557_v16, %v4938_v9  ;;  %v1516_v19 = vpop.f32.mrb[10].mxu0  ;;  %v1559_v20 = vpop.f32.mrb[10].mxu1 }
 0x3d9   : > { %v4989_v22 = vadd.f32 %v1516_v19, %v801_v8  ;;  %v4992_v6 = vadd.f32 %v1559_v20, %v4935_v0  ;;  %v1518_v23 = vpop.f32.mrb[11].mxu0  ;;  %v1561_v24 = vpop.f32.mrb[11].mxu1 }
 0x3da   : > { %v4994_v25 = vadd.f32 %v1518_v23, %v805_v7  ;;  %v4997_v26 = vadd.f32 %v1561_v24, %v4938_v9 }
 0x3db   : > { %v2001_v27 = vpack.c.bf16 %v4989_v22, %v4987_v21  ;;  %v2219_v28 = vpack.c.bf16 %v4992_v6, %v4980_v14  ;;  %v3837_v14 = vld [vmem:[#allocation11 + $0xb8] sm:$0xff]  }
 0x3dc   : > { %v2218_v29 = vpack.c.bf16 %v4994_v25, %v4982_v17  ;;  %v2220_v0 = vpack.c.bf16 %v4997_v26, %v4985_v18 }
 0x478   : > { %v1601_v31 = vpop.f32.mrb[12].mxu0 }
 0x479   : > { %v3368_v33 = vpop.f32.mrb[13].mxu0  ;;  %v1609_v34 = vsel %vm1608_vm1, %v1601_v31, -inf }
 0x47a   : > { %1610 = vmax.xlane.f32.xlu0 %v1609_v34  ;;  %v1604_v9 = vpop.f32.mrb[14].mxu0 }
 0x47b   : > { %v3369_v35 = vpop.f32.mrb[15].mxu0  ;;  %v1612_v37 = vsel %vm1608_vm1, %v1604_v9, -inf }
 0x47c   : > { %1613 = vmax.xlane.f32.xlu1 %v1612_v37  ;;  %v3822_v35 = vld [vmem:[#allocation11 + $0x40] sm:$0xff]   ;;  %v3823_v37 = vld [vmem:[#allocation11 + $0x48] sm:$0xff]  }
 0x507   : > { %v1611_v38 = vpop.xlane.xlu0 %1610 }
 0x508   : > { %v1615_v39 = vsub.f32 %v1601_v31, %v1611_v38  ;;  %v3824_v38 = vld [vmem:[#allocation11 + $0x50] sm:$0xff]  }
 0x509   : > { %v1614_v40 = vpop.xlane.xlu1 %1613 }
 0x50a   : > { %v1617_v41 = vmul.f32 1.442695, %v1615_v39  ;;  %v1616_v42 = vsub.f32 %v1604_v9, %v1614_v40  ;;  %v3825_v39 = vld [vmem:[#allocation11 + $0x58] sm:$0xff]   ;;  %v3826_v40 = vld [vmem:[#allocation11 + $0x60] sm:$0xff]  }
 0x50c   : > { %3890 = vpow2.f32 %v1617_v41  ;;  %v1619_v43 = vmul.f32 1.442695, %v1616_v42  ;;  %v3827_v41 = vld [vmem:[#allocation11 + $0x68] sm:$0xff]   ;;  %v3828_v42 = vld [vmem:[#allocation11 + $0x70] sm:$0xff]  }
 0x50e   : > { %3892 = vpow2.f32 %v1619_v43  ;;  %v3829_v43 = vld [vmem:[#allocation11 + $0x78] sm:$0xff]  }
 0x516   : > { %v3891_v45 = vpop.eup %3890 }
 0x517   : > { %v1621_v46 = vsel %vm1608_vm1, %v3891_v45, 0.0 }
 0x518   : > { %v3893_v47 = vpop.eup %3892  ;;  %1622 = vadd.xlane.f32.xlu0 %v1621_v46 }
 0x519   : > { %v1624_v48 = vsel %vm1608_vm1, %v3893_v47, 0.0 }
 0x51a   : > { %1625 = vadd.xlane.f32.xlu1 %v1624_v48 }
 0x5a5   : > { %v1623_v49 = vpop.xlane.xlu0 %1622 }
 0x5a6   : > { %3894 = vrcp.f32 %v1623_v49 }
 0x5a7   : > { %v1626_v50 = vpop.xlane.xlu1 %1625 }
 0x5a8   : > { %3896 = vrcp.f32 %v1626_v50 }
 0x5b0   : > { %v3895_v51 = vpop.eup %3894 }
 0x5b1   : > { %v1629_v54 = vmul.f32 %v3895_v51, %v3891_v45  ;;  %v3814_v51 = vld [vmem:[#allocation11] sm:$0xff]  }
 0x5b2   : > { %v3897_v52 = vpop.eup %3896 }
 0x5b3   : > { %v1630_v56 = vmul.f32 %v3897_v52, %v3893_v47 }
 0x5b5   : > { %v1631_v57 = vpack.c.bf16 %v1630_v56, %v1629_v54  ;;  %v3815_v54 = vld [vmem:[#allocation11 + $0x8] sm:$0xff]   ;;  %v3816_v56 = vld [vmem:[#allocation11 + $0x10] sm:$0xff]  }
 0x5b7   : > { %3373 = vmatmul.mubr.msk.bf16.vlgmr.msra.gmra.mrb[16].mxu0 %vm1608_vm1, %v1631_v57  ;;  %v3817_v57 = vld [vmem:[#allocation11 + $0x18] sm:$0xff]  }
 0x5b8   : > { %3377 = vmatpush3.bf16.xpose.msra.mxu0 %v1694_v62  ;;  %3378 = vmatprep.mubr.msk.bf16.mxu0 %vm4413_vm0, %v4412_v3 }
 0x5b9   : > { %3388 = vmatprep.subr.bf16.mxu0 %v4412_v3 }
 0x5bf   : > { %3379 = vmatmul.mubr.bf16.vlgmr.msra.gmra.mrb[20].mxu0 %v1693_v36 }
 0x5c0   : > { %3404 = vmatprep.mubr.msk.bf16.mxu0 %vm4413_vm0, %v4412_v3  ;;  %3389 = vmatpush3.bf16.msra.mxu0 %v3822_v35 }
 0x5c1   : > { %3390 = vmatprep.subr.bf16.mxu0 %v4412_v3 }
 0x5c4   : > { %3391 = vmatpush3.bf16.msra.mxu0 %v3823_v37 }
 0x5c5   : > { %3392 = vmatprep.subr.bf16.mxu0 %v4412_v3 }
 0x5c8   : > { %3393 = vmatpush3.bf16.msra.mxu0 %v3824_v38 }
 0x5c9   : > { %3394 = vmatprep.subr.bf16.mxu0 %v4412_v3 }
 0x5cc   : > { %3395 = vmatpush3.bf16.msra.mxu0 %v3825_v39 }
 0x5cd   : > { %3396 = vmatprep.subr.bf16.mxu0 %v4412_v3 }
 0x5d0   : > { %3397 = vmatpush3.bf16.msra.mxu0 %v3826_v40 }
 0x5d1   : > { %3398 = vmatprep.subr.bf16.mxu0 %v4412_v3 }
 0x5d4   : > { %3399 = vmatpush3.bf16.msra.mxu0 %v3827_v41  ;;  %v3830_v41 = vld [vmem:[#allocation11 + $0x80] sm:$0xff]  }
 0x5d5   : > { %3400 = vmatprep.subr.bf16.mxu0 %v4412_v3 }
 0x5d8   : > { %3401 = vmatpush3.bf16.msra.mxu0 %v3828_v42  ;;  %v3831_v42 = vld [vmem:[#allocation11 + $0x88] sm:$0xff]  }
 0x5d9   : > { %3402 = vmatprep.subr.bf16.mxu0 %v4412_v3 }
 0x5dc   : > { %3403 = vmatpush3.bf16.msra.mxu0 %v3829_v43  ;;  %v3832_v43 = vld [vmem:[#allocation11 + $0x90] sm:$0xff]  }
 0x5dd   : > { %3428 = vmatprep.subr.bf16.mxu0 %v4412_v3 }
 0x68a   : > { %v5020_v58 = vpop.f32.mrb[16].mxu0 }
 0x68b   : > { %v3374_v60 = vpop.f32.mrb[17].mxu0 }
 0x68c   : > { %v5022_v4 = vpop.f32.mrb[18].mxu0  ;;  %v3818_v60 = vld [vmem:[#allocation11 + $0x20] sm:$0xff]  }
 0x68d   : > { %v1676_v62 = vpack.c.bf16 %v5022_v4, %v5020_v58  ;;  %v3375_v7 = vpop.f32.mrb[19].mxu0 }
 0x68e   : > { %v3819_v7 = vld [vmem:[#allocation11 + $0x28] sm:$0xff]  }
 0x692   : > { %v1730_v8 = vpop.f32.mrb[20].mxu0 }
 0x693   : > { %v3380_v11 = vpop.f32.mrb[21].mxu0  ;;  %v1737_v13 = vsel %vm1608_vm1, %v1730_v8, -inf }
 0x694   : > { %1738 = vmax.xlane.f32.xlu0 %v1737_v13  ;;  %v1733_v15 = vpop.f32.mrb[22].mxu0  ;;  %v3821_v11 = vld [vmem:[#allocation11 + $0x38] sm:$0xff]  }
 0x695   : > { %v3381_v30 = vpop.f32.mrb[23].mxu0  ;;  %v1740_v32 = vsel %vm1608_vm1, %v1733_v15, -inf }
 0x696   : > { %1741 = vmax.xlane.f32.xlu1 %v1740_v32 }
 0x721   : > { %v1739_v36 = vpop.xlane.xlu0 %1738 }
 0x722   : > { %v1743_v16 = vsub.f32 %v1730_v8, %v1739_v36  ;;  %v3820_v8 = vld [vmem:[#allocation11 + $0x30] sm:$0xff]  }
 0x723   : > { %v1742_v19 = vpop.xlane.xlu1 %1741 }
 0x724   : > { %v1745_v20 = vmul.f32 1.442695, %v1743_v16  ;;  %v1744_v23 = vsub.f32 %v1733_v15, %v1742_v19 }
 0x726   : > { %3898 = vpow2.f32 %v1745_v20  ;;  %v1747_v24 = vmul.f32 1.442695, %v1744_v23 }
 0x728   : > { %3900 = vpow2.f32 %v1747_v24 }
 0x730   : > { %v3899_v31 = vpop.eup %3898 }
 0x731   : > { %v1749_v33 = vsel %vm1608_vm1, %v3899_v31, 0.0 }
 0x732   : > { %v3901_v34 = vpop.eup %3900  ;;  %1750 = vadd.xlane.f32.xlu0 %v1749_v33 }
 0x733   : > { %v1752_v9 = vsel %vm1608_vm1, %v3901_v34, 0.0 }
 0x734   : > { %1753 = vadd.xlane.f32.xlu1 %v1752_v9 }
 0x7bf   : > { %v1751_v45 = vpop.xlane.xlu0 %1750 }
 0x7c0   : > { %3902 = vrcp.f32 %v1751_v45  ;;  %v3833_v45 = vld [vmem:[#allocation11 + $0x98] sm:$0xff]  }
 0x7c1   : > { %v1754_v46 = vpop.xlane.xlu1 %1753 }
 0x7c2   : > { %3904 = vrcp.f32 %v1754_v46  ;;  %v3834_v46 = vld [vmem:[#allocation11 + $0xa0] sm:$0xff]  }
 0x7ca   : > { %v3903_v47 = vpop.eup %3902 }
 0x7cb   : > { %v1757_v49 = vmul.f32 %v3903_v47, %v3899_v31  ;;  %v3835_v47 = vld [vmem:[#allocation11 + $0xa8] sm:$0xff]  }
 0x7cc   : > { %v3905_v48 = vpop.eup %3904 }
 0x7cd   : > { %v1758_v50 = vmul.f32 %v3905_v48, %v3901_v34  ;;  %v3836_v48 = vld [vmem:[#allocation11 + $0xb0] sm:$0xff]  }
 0x7cf   : > { %v1759_v52 = vpack.c.bf16 %v1758_v50, %v1757_v49 }
 0x7d1   : > { %3385 = vmatmul.mubr.msk.bf16.vlgmr.msra.gmra.mrb[12].mxu1 %vm1608_vm1, %v1759_v52 }
 0x7d2   : > { %3409 = vmatpush3.bf16.msra.mxu1 %v3814_v51  ;;  %3424 = vmatprep.mubr.msk.bf16.mxu1 %vm4413_vm0, %v4412_v3 }
 0x7d3   : > { %3410 = vmatprep.subr.bf16.mxu1 %v4412_v3 }
 0x7d6   : > { %3411 = vmatpush3.bf16.msra.mxu1 %v3815_v54 }
 0x7d7   : > { %3412 = vmatprep.subr.bf16.mxu1 %v4412_v3 }
 0x7da   : > { %3413 = vmatpush3.bf16.msra.mxu1 %v3816_v56 }
 0x7db   : > { %3414 = vmatprep.subr.bf16.mxu1 %v4412_v3 }
 0x7de   : > { %3415 = vmatpush3.bf16.msra.mxu1 %v3817_v57 }
 0x7df   : > { %3416 = vmatprep.subr.bf16.mxu1 %v4412_v3 }
 0x7e2   : > { %3417 = vmatpush3.bf16.msra.mxu1 %v3818_v60 }
 0x7e3   : > { %3418 = vmatprep.subr.bf16.mxu1 %v4412_v3 }
 0x7e6   : > { %3419 = vmatpush3.bf16.msra.mxu1 %v3819_v7 }
 0x7e7   : > { %3420 = vmatprep.subr.bf16.mxu1 %v4412_v3 }
 0x7ea   : > { %3421 = vmatpush3.bf16.msra.mxu1 %v3820_v8 }
 0x7eb   : > { %3422 = vmatprep.subr.bf16.mxu1 %v4412_v3 }
 0x7ee   : > { %3423 = vmatpush3.bf16.msra.mxu1 %v3821_v11 }
 0x7ef   : > { %3434 = vmatprep.subr.bf16.mxu1 %v4412_v3 }
 0x7f1   : > { %3425 = vmatmul.mubr.bf16.vlgmr.msra.gmra.mrb[16].mxu1 %v1676_v62 }
 0x7f2   : > { %3435 = vmatpush3.bf16.msra.mxu1 %v2001_v27  ;;  %3436 = vmatprep.mubr.msk.bf16.mxu1 %vm4413_vm0, %v4412_v3 }
 0x7f3   : > { %3460 = vmatprep.subr.bf16.mxu1 %v4412_v3 }
 0x8a4   : > { %v1797_v13 = vpop.f32.mrb[12].mxu1 }
 0x8a5   : > { %v3386_v15 = vpop.f32.mrb[13].mxu1 }
 0x8a6   : > { %v1800_v30 = vpop.f32.mrb[14].mxu1 }
 0x8a7   : > { %v1804_v32 = vpack.c.bf16 %v1800_v30, %v1797_v13  ;;  %v3387_v36 = vpop.f32.mrb[15].mxu1 }
 0x8a9   : > { %3405 = vmatmul.mubr.bf16.vlgmr.msra.gmra.mrb[24].mxu0 %v1804_v32 }
 0x8aa   : > { %3429 = vmatpush3.bf16.xpose.msra.mxu0 %v2000_v5  ;;  %3430 = vmatprep.mubr.msk.bf16.mxu0 %vm4413_vm0, %v4412_v3 }
 0x8ab   : > { %3440 = vmatprep.subr.bf16.mxu0 %v4412_v3 }
 0x8b1   : > { %3431 = vmatmul.mubr.bf16.vlgmr.msra.gmra.mrb[28].mxu0 %v1999_v63 }
 0x8b2   : > { %3456 = vmatprep.mubr.msk.bf16.mxu0 %vm4413_vm0, %v4412_v3  ;;  %3441 = vmatpush3.bf16.msra.mxu0 %v3830_v41 }
 0x8b3   : > { %3442 = vmatprep.subr.bf16.mxu0 %v4412_v3 }
 0x8b6   : > { %3443 = vmatpush3.bf16.msra.mxu0 %v3831_v42 }
 0x8b7   : > { %3444 = vmatprep.subr.bf16.mxu0 %v4412_v3 }
 0x8ba   : > { %3445 = vmatpush3.bf16.msra.mxu0 %v3832_v43 }
 0x8bb   : > { %3446 = vmatprep.subr.bf16.mxu0 %v4412_v3 }
 0x8be   : > { %3447 = vmatpush3.bf16.msra.mxu0 %v3833_v45 }
 0x8bf   : > { %3448 = vmatprep.subr.bf16.mxu0 %v4412_v3 }
 0x8c2   : > { %3449 = vmatpush3.bf16.msra.mxu0 %v3834_v46 }
 0x8c3   : > { %3450 = vmatprep.subr.bf16.mxu0 %v4412_v3 }
 0x8c4   : > { %v1992_v21 = vpop.f32.mrb[16].mxu1 }
 0x8c5   : > { %v3426_v22 = vpop.f32.mrb[17].mxu1 }
 0x8c6   : > { %v1995_v27 = vpop.f32.mrb[18].mxu1  ;;  %3451 = vmatpush3.bf16.msra.mxu0 %v3835_v47 }
 0x8c7   : > { %v3427_v58 = vpop.f32.mrb[19].mxu1  ;;  %3452 = vmatprep.subr.bf16.mxu0 %v4412_v3 }
 0x8ca   : > { %3453 = vmatpush3.bf16.msra.mxu0 %v3836_v48 }
 0x8cb   : > { %3454 = vmatprep.subr.bf16.mxu0 %v4412_v3 }
 0x8ce   : > { %3455 = vmatpush3.bf16.msra.mxu0 %v3837_v14  ;;  %v3848_v14 = vld [vmem:[#allocation17 + $0x4] ss:$8 sps:$4 sm:$0xff]  }
 0x8cf   : > { %2597 = vmatprep.subr.bf16.mxu0 %v3848_v14 }
 0x97c   : > { %v1903_v4 = vpop.f32.mrb[24].mxu0 }
 0x97d   : > { %v5069_v62 = vadd.f32 %v1992_v21, %v1903_v4  ;;  %v3406_v59 = vpop.f32.mrb[25].mxu0 }
 0x97e   : > { %v1906_v61 = vpop.f32.mrb[26].mxu0 }
 0x97f   : > { %v5071_v5 = vadd.f32 %v1995_v27, %v1906_v61  ;;  %v3407_v16 = vpop.f32.mrb[27].mxu0 }
 0x984   : > { %v2036_v19 = vpop.f32.mrb[28].mxu0 }
 0x985   : > { %v3432_v20 = vpop.f32.mrb[29].mxu0  ;;  %v2043_v53 = vsel %vm1608_vm1, %v2036_v19, -inf }
 0x986   : > { %2044 = vmax.xlane.f32.xlu0 %v2043_v53  ;;  %v2039_v55 = vpop.f32.mrb[30].mxu0 }
 0x987   : > { %v3433_v63 = vpop.f32.mrb[31].mxu0  ;;  %v2046_v23 = vsel %vm1608_vm1, %v2039_v55, -inf }
 0x988   : > { %2047 = vmax.xlane.f32.xlu1 %v2046_v23 }
 0xa13   : > { %v2045_v24 = vpop.xlane.xlu0 %2044 }
 0xa14   : > { %v2049_v31 = vsub.f32 %v2036_v19, %v2045_v24 }
 0xa15   : > { %v2048_v33 = vpop.xlane.xlu1 %2047 }
 0xa16   : > { %v2051_v34 = vmul.f32 1.442695, %v2049_v31  ;;  %v2050_v9 = vsub.f32 %v2039_v55, %v2048_v33  ;;  %v3838_v31 = vld [vmem:[#allocation11 + $0xc0] sm:$0xff]  }
 0xa18   : > { %3906 = vpow2.f32 %v2051_v34  ;;  %v2053_v35 = vmul.f32 1.442695, %v2050_v9  ;;  %v3839_v34 = vld [vmem:[#allocation11 + $0xc8] sm:$0xff]   ;;  %v3842_v9 = vld [vmem:[#allocation11 + $0xe0] sm:$0xff]  }
 0xa1a   : > { %3908 = vpow2.f32 %v2053_v35  ;;  %v3843_v35 = vld [vmem:[#allocation11 + $0xe8] sm:$0xff]  }
 0xa22   : > { %v3907_v37 = vpop.eup %3906 }
 0xa23   : > { %v2055_v38 = vsel %vm1608_vm1, %v3907_v37, 0.0 }
 0xa24   : > { %v3909_v39 = vpop.eup %3908  ;;  %2056 = vadd.xlane.f32.xlu0 %v2055_v38  ;;  %v3845_v38 = vld [vmem:[#allocation11 + $0xf8] sm:$0xff]  }
 0xa25   : > { %v2058_v40 = vsel %vm1608_vm1, %v3909_v39, 0.0 }
 0xa26   : > { %2059 = vadd.xlane.f32.xlu1 %v2058_v40 }
 0xab1   : > { %v2057_v49 = vpop.xlane.xlu0 %2056 }
 0xab2   : > { %3910 = vrcp.f32 %v2057_v49  ;;  %v3234_v49 = vld [vmem:[#allocation13] ss:$0 sm:$0xff] }
 0xab3   : > { %v2060_v50 = vpop.xlane.xlu1 %2059 }
 0xab4   : > { %3912 = vrcp.f32 %v2060_v50 }
 0xabc   : > { %v3911_v51 = vpop.eup %3910 }
 0xabd   : > { %v2063_v54 = vmul.f32 %v3911_v51, %v3907_v37  ;;  %v3844_v37 = vld [vmem:[#allocation11 + $0xf0] sm:$0xff]  }
 0xabe   : > { %v3913_v52 = vpop.eup %3912 }
 0xabf   : > { %v2064_v56 = vmul.f32 %v3913_v52, %v3909_v39 }
 0xac1   : > { %v2065_v57 = vpack.c.bf16 %v2064_v56, %v2063_v54 }
 0xac3   : > { %3437 = vmatmul.mubr.msk.bf16.vlgmr.msra.gmra.mrb[20].mxu1 %vm1608_vm1, %v2065_v57  ;;  %v3846_v57 = vld [vmem:[#allocation17] ss:$8 sps:$4 sm:$0xff]  }
 0xac4   : > { %3461 = vmatpush3.bf16.xpose.msra.mxu1 %v2219_v28  ;;  %3462 = vmatprep.mubr.msk.bf16.mxu1 %vm4413_vm0, %v4412_v3 }
 0xac5   : > { %3466 = vmatprep.subr.bf16.mxu1 %v4412_v3 }
 0xacb   : > { %3463 = vmatmul.mubr.bf16.vlgmr.msra.gmra.mrb[24].mxu1 %v2218_v29 }
 0xacc   : > { %3467 = vmatpush3.bf16.msra.mxu1 %v2220_v0  ;;  %3468 = vmatprep.mubr.msk.bf16.mxu1 %vm4413_vm0, %v4412_v3 }
 0xacd   : > { %3472 = vmatprep.subr.bf16.mxu1 %v4412_v3 }
 0xb96   : > { %v2103_v6 = vpop.f32.mrb[20].mxu1 }
 0xb97   : > { %v3438_v28 = vpop.f32.mrb[21].mxu1 }
 0xb98   : > { %v2106_v60 = vpop.f32.mrb[22].mxu1  ;;  %v3849_v28 = vld [vmem:[#allocation17 + $0x10] ss:$8 sps:$4 sm:$0xff]  }
 0xb99   : > { %v2110_v7 = vpack.c.bf16 %v2106_v60, %v2103_v6  ;;  %v3439_v8 = vpop.f32.mrb[23].mxu1  ;;  %v3851_v6 = vld [vmem:[#allocation17 + $0x14] ss:$8 sps:$4 sm:$0xff]  }
 0xb9b   : > { %3457 = vmatmul.mubr.bf16.vlgmr.msra.gmra.mrb[32].mxu0 %v2110_v7 }
 0xb9c   : > { %2629 = vmatprep.mubr.bf16.mxu0 %v4411_v44  ;;  %2598 = vmatpush1.bf16.msra.mxu0 %v3846_v57 }
 0xb9d   : > { %2599 = vmatprep.subr.bf16.mxu0 %v3851_v6 }
 0xb9e   : > { %v2255_v17 = vpop.f32.mrb[24].mxu1 }
 0xb9f   : > { %v3464_v25 = vpop.f32.mrb[25].mxu1  ;;  %v2262_v18 = vsel %vm1608_vm1, %v2255_v17, -inf }
 0xba0   : > { %2263 = vmax.xlane.f32.xlu0 %v2262_v18  ;;  %v2258_v26 = vpop.f32.mrb[26].mxu1  ;;  %2600 = vmatpush1.bf16.msra.mxu0 %v3849_v28 }
 0xba1   : > { %v3465_v29 = vpop.f32.mrb[27].mxu1  ;;  %v2265_v0 = vsel %vm1608_vm1, %v2258_v26, -inf }
 0xba2   : > { %2266 = vmax.xlane.f32.xlu1 %v2265_v0  ;;  %v3852_v29 = vld [vmem:[#allocation17 + $0x20] ss:$8 sps:$4 sm:$0xff]   ;;  %v3857_v0 = vld [vmem:[#allocation17 + $0x34] ss:$8 sps:$4 sm:$0xff]  }
 0xc2d   : > { %v2264_v11 = vpop.xlane.xlu0 %2263 }
 0xc2e   : > { %v2268_v13 = vsub.f32 %v2255_v17, %v2264_v11  ;;  %v3855_v11 = vld [vmem:[#allocation17 + $0x30] ss:$8 sps:$4 sm:$0xff]  }
 0xc2f   : > { %v2267_v15 = vpop.xlane.xlu1 %2266 }
 0xc30   : > { %v2270_v30 = vmul.f32 1.442695, %v2268_v13  ;;  %v2269_v32 = vsub.f32 %v2258_v26, %v2267_v15  ;;  %v3854_v26 = vld [vmem:[#allocation17 + $0x24] ss:$8 sps:$4 sm:$0xff]   ;;  %v3858_v15 = vld [vmem:[#allocation17 + $0x40] ss:$8 sps:$4 sm:$0xff]  }
 0xc31   : > { %2601 = vmatprep.subr.bf16.mxu0 %v3854_v26  ;;  %v3860_v13 = vld [vmem:[#allocation17 + $0x44] ss:$8 sps:$4 sm:$0xff]  }
 0xc32   : > { %3914 = vpow2.f32 %v2270_v30  ;;  %v2272_v36 = vmul.f32 1.442695, %v2269_v32  ;;  %2602 = vmatpush1.bf16.msra.mxu0 %v3852_v29  ;;  %v3863_v30 = vld [vmem:[#allocation17 + $0x54] ss:$8 sps:$4 sm:$0xff]   ;;  %v3861_v32 = vld [vmem:[#allocation17 + $0x50] ss:$8 sps:$4 sm:$0xff]  }
 0xc33   : > { %2603 = vmatprep.subr.bf16.mxu0 %v3857_v0 }
 0xc34   : > { %3916 = vpow2.f32 %v2272_v36  ;;  %v3866_v36 = vld [vmem:[#allocation17 + $0x64] ss:$8 sps:$4 sm:$0xff]  }
 0xc36   : > { %2604 = vmatpush1.bf16.msra.mxu0 %v3855_v11 }
 0xc37   : > { %2605 = vmatprep.subr.bf16.mxu0 %v3860_v13 }
 0xc3a   : > { %2606 = vmatpush1.bf16.msra.mxu0 %v3858_v15 }
 0xc3b   : > { %2607 = vmatprep.subr.bf16.mxu0 %v3863_v30 }
 0xc3c   : > { %v3915_v21 = vpop.eup %3914 }
 0xc3d   : > { %v2274_v44 = vsel %vm1608_vm1, %v3915_v21, 0.0 }
 0xc3e   : > { %v3917_v22 = vpop.eup %3916  ;;  %2275 = vadd.xlane.f32.xlu0 %v2274_v44  ;;  %2608 = vmatpush1.bf16.msra.mxu0 %v3861_v32  ;;  %v3869_v44 = vld [vmem:[#allocation17 + $0x74] ss:$8 sps:$4 sm:$0xff]  }
 0xc3f   : > { %v2277_v27 = vsel %vm1608_vm1, %v3917_v22, 0.0  ;;  %2609 = vmatprep.subr.bf16.mxu0 %v3866_v36 }
 0xc40   : > { %2278 = vadd.xlane.f32.xlu1 %v2277_v27 }
 0xc6e   : > { %v2209_v58 = vpop.f32.mrb[32].mxu0 }
 0xc6f   : > { %v2216_v4 = vadd.f32 %v2209_v58, %v5069_v62  ;;  %v3458_v59 = vpop.f32.mrb[33].mxu0  ;;  %v3840_v62 = vld [vmem:[#allocation11 + $0xd0] sm:$0xff]  }
 0xc70   : > { %v2212_v61 = vpop.f32.mrb[34].mxu0 }
 0xc71   : > { %v2217_v16 = vadd.f32 %v2212_v61, %v5071_v5  ;;  %v3459_v19 = vpop.f32.mrb[35].mxu0  ;;  %v3841_v5 = vld [vmem:[#allocation11 + $0xd8] sm:$0xff]  }
 0xccb   : > { %v2276_v20 = vpop.xlane.xlu0 %2275 }
 0xccc   : > { %3918 = vrcp.f32 %v2276_v20  ;;  %v3235_v20 = vld [vmem:[#allocation14] ss:$0 sm:$0xff] }
 0xccd   : > { %v2279_v53 = vpop.xlane.xlu1 %2278 }
 0xcce   : > { %3920 = vrcp.f32 %v2279_v53 }
 0xcd6   : > { %v3919_v55 = vpop.eup %3918 }
 0xcd7   : > { %v2282_v23 = vmul.f32 %v3919_v55, %v3915_v21  ;;  %v3864_v21 = vld [vmem:[#allocation17 + $0x60] ss:$8 sps:$4 sm:$0xff]  }
 0xcd8   : > { %v3921_v63 = vpop.eup %3920  ;;  %2610 = vmatpush1.bf16.msra.mxu0 %v3864_v21 }
 0xcd9   : > { %v2283_v24 = vmul.f32 %v3921_v63, %v3917_v22  ;;  %v3867_v22 = vld [vmem:[#allocation17 + $0x70] ss:$8 sps:$4 sm:$0xff]   ;;  %2611 = vmatprep.subr.bf16.mxu0 %v3869_v44 }
 0xcdb   : > { %v2284_v33 = vpack.c.bf16 %v2283_v24, %v2282_v23  ;;  %v3236_v24 = vld [vmem:[#allocation16] ss:$0 sm:$0xff] }
 0xcdc   : > { %2612 = vmatpush1.bf16.msra.mxu0 %v3867_v22 }
 0xcdd   : > { %3469 = vmatmul.mubr.msk.bf16.vlgmr.msra.gmra.mrb[28].mxu1 %vm1608_vm1, %v2284_v33 }
 0xcde   : > { %3473 = vmatpush3.bf16.msra.mxu1 %v3838_v31  ;;  %3488 = vmatprep.mubr.msk.bf16.mxu1 %vm4413_vm0, %v4412_v3 }
 0xcdf   : > { %3474 = vmatprep.subr.bf16.mxu1 %v4412_v3 }
 0xce2   : > { %3475 = vmatpush3.bf16.msra.mxu1 %v3839_v34 }
 0xce3   : > { %3476 = vmatprep.subr.bf16.mxu1 %v4412_v3 }
 0xce6   : > { %3477 = vmatpush3.bf16.msra.mxu1 %v3840_v62 }
 0xce7   : > { %3478 = vmatprep.subr.bf16.mxu1 %v4412_v3 }
 0xcea   : > { %3479 = vmatpush3.bf16.msra.mxu1 %v3841_v5  ;;  %v3870_v5 = vld [vmem:[#allocation20 + $0x40] sm:$0xff]  }
 0xceb   : > { %3480 = vmatprep.subr.bf16.mxu1 %v4412_v3 }
 0xcee   : > { %3481 = vmatpush3.bf16.msra.mxu1 %v3842_v9  ;;  %v3871_v9 = vld [vmem:[#allocation20] sm:$0xff]  }
 0xcef   : > { %3482 = vmatprep.subr.bf16.mxu1 %v4412_v3 }
 0xcf2   : > { %3483 = vmatpush3.bf16.msra.mxu1 %v3843_v35  ;;  %v3872_v35 = vld [vmem:[#allocation20 + $0x48] sm:$0xff]  }
 0xcf3   : > { %3484 = vmatprep.subr.bf16.mxu1 %v4412_v3 }
 0xcf6   : > { %3485 = vmatpush3.bf16.msra.mxu1 %v3844_v37  ;;  %v3873_v37 = vld [vmem:[#allocation20 + $0x8] sm:$0xff]  }
 0xcf7   : > { %3486 = vmatprep.subr.bf16.mxu1 %v4412_v3 }
 0xcfa   : > { %3487 = vmatpush3.bf16.msra.mxu1 %v3845_v38  ;;  %v3874_v38 = vld [vmem:[#allocation20 + $0x50] sm:$0xff]  }
 0xcfb   : > { %3342 = vmatprep.subr.bf16.mxu1 %v3870_v5 }
 0xdb0   : > { %v2322_v39 = vpop.f32.mrb[28].mxu1 }
 0xdb1   : > { %v3470_v40 = vpop.f32.mrb[29].mxu1 }
 0xdb2   : > { %v2325_v41 = vpop.f32.mrb[30].mxu1  ;;  %v3876_v40 = vld [vmem:[#allocation20 + $0x58] sm:$0xff]  }
 0xdb3   : > { %v2329_v42 = vpack.c.bf16 %v2325_v41, %v2322_v39  ;;  %v3471_v43 = vpop.f32.mrb[31].mxu1  ;;  %v3875_v39 = vld [vmem:[#allocation20 + $0x10] sm:$0xff]   ;;  %v3877_v41 = vld [vmem:[#allocation20 + $0x18] sm:$0xff]  }
 0xdb4   : > { %v3879_v43 = vld [vmem:[#allocation20 + $0x20] sm:$0xff]  }
 0xdb5   : > { %3489 = vmatmul.mubr.bf16.vlgmr.msra.gmra.mrb[32].mxu1 %v2329_v42  ;;  %v3878_v42 = vld [vmem:[#allocation20 + $0x60] sm:$0xff]  }
 0xdb6   : > { %3343 = vmatpush3.bf16.msra.mxu1 %v3871_v9 }
 0xdb7   : > { %3344 = vmatprep.subr.bf16.mxu1 %v3872_v35 }
 0xdba   : > { %3345 = vmatpush3.bf16.msra.mxu1 %v3873_v37 }
 0xdbb   : > { %3346 = vmatprep.subr.bf16.mxu1 %v3874_v38  ;;  %v3253_v38 = vld [vmem:[#allocation22] ss:$0 sm:$0xff] }
 0xdbe   : > { %3347 = vmatpush3.bf16.msra.mxu1 %v3875_v39 }
 0xdbf   : > { %3348 = vmatprep.subr.bf16.mxu1 %v3876_v40 }
 0xdc2   : > { %3349 = vmatpush3.bf16.msra.mxu1 %v3877_v41 }
 0xdc3   : > { %3350 = vmatprep.subr.bf16.mxu1 %v3878_v42 }
 0xdc6   : > { %3351 = vmatpush3.bf16.msra.mxu1 %v3879_v43 }
 0xe88   : > { %v2428_v45 = vpop.f32.mrb[32].mxu1 }
 0xe89   : > { %v2435_v46 = vadd.f32 %v2428_v45, %v2216_v4  ;;  %v3490_v47 = vpop.f32.mrb[33].mxu1  ;;  %v3880_v45 = vld [vmem:[#allocation20 + $0x68] sm:$0xff]  }
 0xe8a   : > { %v2431_v48 = vpop.f32.mrb[34].mxu1  ;;  %3352 = vmatprep.subr.bf16.mxu1 %v3880_v45  ;;  %v3882_v47 = vld [vmem:[#allocation20 + $0x70] sm:$0xff]  }
 0xe8b   : > { %v2437_v50 = vadd.f32 %v4894_v1, %v2435_v46  ;;  %v2436_v51 = vadd.f32 %v2431_v48, %v2217_v16  ;;  %v3491_v52 = vpop.f32.mrb[35].mxu1  ;;  %v3881_v46 = vld [vmem:[#allocation20 + $0x28] sm:$0xff]   ;;  %v3883_v48 = vld [vmem:[#allocation20 + $0x30] sm:$0xff]  }
 0xe8c   : > { %3353 = vmatpush3.bf16.msra.mxu1 %v3881_v46 }
 0xe8d   : > { %v2438_v54 = vadd.f32 %v4897_v2, %v2436_v51  ;;  %v5119_v3 = vadd.f32 %v3234_v49, %v2437_v50  ;;  %3354 = vmatprep.subr.bf16.mxu1 %v3882_v47  ;;  %v3885_v50 = vld [vmem:[#allocation20 + $0x38] sm:$0xff]  }
 0xe8e   : > { %v2505_v51 = vld [vmem:[#allocation19] sm:$0x3] }
 0xe8f   : > { %2450 = vadd.xlane.f32.xlu0 %v5119_v3  ;;  %v5122_v56 = vadd.f32 %v3234_v49, %v2438_v54  ;;  %v3884_v49 = vld [vmem:[#allocation20 + $0x78] sm:$0xff]   ;;  %v2510_v52 = vrot.slane %v2505_v51, %v4940_v10  ;;  %v2514_v54 = vrot.slane %v2505_v51, %v4942_v12 }
 0xe90   : > { %3355 = vmatpush3.bf16.msra.mxu1 %v3883_v48 }
 0xe91   : > { %2452 = vadd.xlane.f32.xlu1 %v5122_v56  ;;  %3356 = vmatprep.subr.bf16.mxu1 %v3884_v49 }
 0xe94   : > { %3357 = vmatpush3.bf16.msra.mxu1 %v3885_v50 }
 0xf1c   : > { %v2451_v1 = vpop.xlane.xlu0 %2450 }
 0xf1d   : > { %v2454_v60 = vmul.f32 0.0078125, %v2451_v1 }
 0xf1e   : > { %v2453_v7 = vpop.xlane.xlu1 %2452 }
 0xf1f   : > { %v2456_v2 = vsub.f32 %v5119_v3, %v2454_v60  ;;  %v2455_v8 = vmul.f32 0.0078125, %v2453_v7 }
 0xf21   : > { %v2457_v17 = vsub.f32 %v5122_v56, %v2455_v8  ;;  %v2458_v25 = vmul.f32 %v2456_v2, %v2456_v2 }
 0xf23   : > { %2460 = vadd.xlane.f32.xlu0 %v2458_v25  ;;  %v2459_v18 = vmul.f32 %v2457_v17, %v2457_v17 }
 0xf25   : > { %2462 = vadd.xlane.f32.xlu1 %v2459_v18 }
 0xfb0   : > { %v2461_v27 = vpop.xlane.xlu0 %2460 }
 0xfb1   : > { %v2464_v58 = vmul.f32 0.0078125, %v2461_v27 }
 0xfb2   : > { %v2463_v4 = vpop.xlane.xlu1 %2462 }
 0xfb3   : > { %v2466_v59 = vadd.f32 1e-06, %v2464_v58  ;;  %v2465_v61 = vmul.f32 0.0078125, %v2463_v4 }
 0xfb5   : > { %3922 = vrsqrt.f32 %v2466_v59  ;;  %v2467_v16 = vadd.f32 1e-06, %v2465_v61 }
 0xfb7   : > { %3924 = vrsqrt.f32 %v2467_v16 }
 0xfbf   : > { %v3923_v19 = vpop.eup %3922 }
 0xfc0   : > { %v2470_v53 = vmul.f32 %v3923_v19, %v2456_v2 }
 0xfc1   : > { %v3925_v55 = vpop.eup %3924 }
 0xfc2   : > { %v2471_v63 = vmul.f32 %v3925_v55, %v2457_v17  ;;  %v2478_v23 = vmul.f32 %v3235_v20, %v2470_v53 }
 0xfc4   : > { %v2479_v31 = vmul.f32 %v3235_v20, %v2471_v63  ;;  %v2486_v33 = vadd.f32 %v3236_v24, %v2478_v23 }
 0xfc6   : > { %v2487_v34 = vadd.f32 %v3236_v24, %v2479_v31 }
 0xfc8   : > { %v2488_v62 = vpack.c.bf16 %v2487_v34, %v2486_v33 }
 0xfca   : > { %2630 = vmatmul.mubr.bf16.vlgmr.msra.gmra.mrb[36].mxu0 %v2488_v62 }
0x109d   : > { %v2631_v57 = vpop.f32.mrb[36].mxu0 }
0x109e   : > { %v2632_v14 = vadd.f32 %v2631_v57, %v2510_v52  ;;  %v2633_v6 = vpop.f32.mrb[37].mxu0 }
0x109f   : > { %v2634_v28 = vadd.f32 %v2633_v6, %v2514_v54  ;;  %v2635_v1 = vpop.f32.mrb[38].mxu0 }
0x10a0   : > { %v2640_v60 = vmul.f32 %v2632_v14, %v2632_v14  ;;  %v2636_v7 = vadd.f32 %v2635_v1, %v2510_v52  ;;  %v2637_v2 = vpop.f32.mrb[39].mxu0 }
0x10a1   : > { %v2641_v8 = vmul.f32 %v2634_v28, %v2634_v28  ;;  %v2638_v17 = vadd.f32 %v2637_v2, %v2514_v54 }
0x10a2   : > { %v2644_v25 = vmul.f32 %v2640_v60, %v2632_v14  ;;  %v2642_v18 = vmul.f32 %v2636_v7, %v2636_v7 }
0x10a3   : > { %v2645_v26 = vmul.f32 %v2641_v8, %v2634_v28  ;;  %v2643_v29 = vmul.f32 %v2638_v17, %v2638_v17 }
0x10a4   : > { %v2648_v0 = vmul.f32 0.044715, %v2644_v25  ;;  %v2646_v11 = vmul.f32 %v2642_v18, %v2636_v7 }
0x10a5   : > { %v2649_v13 = vmul.f32 0.044715, %v2645_v26  ;;  %v2647_v10 = vmul.f32 %v2643_v29, %v2638_v17 }
0x10a6   : > { %v2652_v15 = vadd.f32 %v2648_v0, %v2632_v14  ;;  %v2650_v12 = vmul.f32 0.044715, %v2646_v11 }
0x10a7   : > { %v2653_v30 = vadd.f32 %v2649_v13, %v2634_v28  ;;  %v2651_v32 = vmul.f32 0.044715, %v2647_v10 }
0x10a8   : > { %v2656_v36 = vmul.f32 0.7978846, %v2652_v15  ;;  %v2654_v21 = vadd.f32 %v2650_v12, %v2636_v7 }
0x10a9   : > { %v2657_v44 = vmul.f32 0.7978846, %v2653_v30  ;;  %v2655_v22 = vadd.f32 %v2651_v32, %v2638_v17 }
0x10aa   : > { %3926 = vtanh.f32 %v2656_v36  ;;  %v2658_v27 = vmul.f32 0.7978846, %v2654_v21 }
0x10ab   : > { %3928 = vtanh.f32 %v2657_v44  ;;  %v2659_v58 = vmul.f32 0.7978846, %v2655_v22 }
0x10ac   : > { %3930 = vtanh.f32 %v2658_v27 }
0x10ad   : > { %3932 = vtanh.f32 %v2659_v58 }
0x10b4   : > { %v3927_v4 = vpop.eup %3926 }
0x10b5   : > { %v3929_v59 = vpop.eup %3928  ;;  %v2664_v61 = vadd.f32 1.0, %v3927_v4 }
0x10b6   : > { %v3931_v16 = vpop.eup %3930  ;;  %v2665_v19 = vadd.f32 1.0, %v3929_v59 }
0x10b7   : > { %v3933_v20 = vpop.eup %3932  ;;  %v2668_v53 = vmul.f32 0.5, %v2664_v61  ;;  %v2666_v55 = vadd.f32 1.0, %v3931_v16 }
0x10b8   : > { %v2667_v63 = vadd.f32 1.0, %v3933_v20  ;;  %v2669_v23 = vmul.f32 0.5, %v2665_v19 }
0x10b9   : > { %v2670_v24 = vmul.f32 0.5, %v2666_v55  ;;  %v2672_v33 = vmul.f32 %v2668_v53, %v2632_v14 }
0x10ba   : > { %v2671_v31 = vmul.f32 0.5, %v2667_v63  ;;  %v2673_v62 = vmul.f32 %v2669_v23, %v2634_v28 }
0x10bb   : > { %v2674_v34 = vmul.f32 %v2670_v24, %v2636_v7 }
0x10bc   : > { %v2675_v5 = vmul.f32 %v2671_v31, %v2638_v17 }
0x10bd   : > { %v2676_v9 = vpack.c.bf16 %v2674_v34, %v2672_v33 }
0x10be   : > { %v2677_v35 = vpack.c.bf16 %v2675_v5, %v2673_v62 }
0x10c0   : > { %2845 = vmatprep.mubr.bf16.mxu1 %v2677_v35 }
0x10c1   : > { %2846 = vmatmul.mubr.bf16.vlgmr.msra.gmra.mrb[36].mxu1 %v2676_v9 }
0x1194   : > { %v3358_v37 = vpop.f32.mrb[36].mxu1 }
0x1195   : > { %v3359_v39 = vpop.f32.mrb[37].mxu1 }
0x1196   : > { %v3360_v40 = vadd.f32 %v3359_v39, %v3358_v37  ;;  %v3361_v41 = vpop.f32.mrb[38].mxu1 }
0x1197   : > { %v3362_v42 = vpop.f32.mrb[39].mxu1 }
0x1198   : > { %v2848_v43 = vadd.f32 %v3360_v40, %v3253_v38  ;;  %v3363_v45 = vadd.f32 %v3362_v42, %v3361_v41 }
0x119a   : > { %v2851_v46 = vadd.f32 %v3363_v45, %v3253_v38  ;;  %v2854_v47 = vadd.f32 %v2848_v43, %v5119_v3 }
0x119c   : > { %v2855_v48 = vadd.f32 %v2851_v46, %v5122_v56 }
0x119e   : > { %v3288_v49 = vpack.c.bf16 %v2855_v48, %v2854_v47 }
0x11a0   : > { %3289 = vst [vmem:[%s616_s20] sm:$0xff] %v3288_v49  }
0x11a1   : > { %4313 = shalt.err (!%p4310_p7)
}
0x11a2   : > { %s4314_s2 = scalar_lea.hbm %s5137_s30, 128  ;;  %s4318_s17 = scalar_lea.hbm %s5250_s15, 256 }
0x11a3   : > { %p4315_p6 = scmp.ne.s32.totalorder %s5137_s30, %s4314_s2  ;;  %p4319_p13 = scmp.lt.u32.totalorder %s5137_s30, %s5250_s15 }
0x11a4   : > { %p4320_p1 = scmp.lt.u32.totalorder %s4318_s17, %s4314_s2  ;;  %p4322_p2 = scmp.lt.u32.totalorder %s4314_s2, %s5137_s30 }
0x11a5   : > { %p4316_p9 = pnand %p4315_p6, %p5251_p8 }
0x11a6   : > { %p4321_p3 = por %p4320_p1, %p4319_p13 }
0x11a7   : > { %p4317_p4 = pneg %p4316_p9 }
0x11a8   : > { %p4323_p10 = por %p4322_p2, %p4321_p3 }
0x11aa   : > { %p4324_p11 = pnand %p4323_p10, %p4317_p4 }
0x11ac   : > { %4327 = shalt.err (!%p4324_p11)
}
0x11ad   : > { %s4415_s1 = smov 64   ;;  %s4416_s29 = smov 4  }
0x11ae   : > { %3542 = dma.vmem_to_hbm [thread:$0]  (%p5251_p8), %s5139_s23, 128, %s5137_s30, %s2867_s19, %s4415_s1, %s4415_s1, %s4416_s29  }
0x11af PF: > { %s5252_s0 = sld [smem:[#allocation32_spill]]  ;;  %p5253_p12 = scmp.ne.s32.totalorder %s5232_s22, 0 }
0x11b0   : > { %p5254_p0 = scmp.ge.s32.totalorder %s4390_s28, 2 }
0x11b2   : > { %p3586_p5 = pnand %p5254_p0, %p5253_p12 }
0x11b5   : > { %s2895_s24 = sand.u32 1, %s5252_s0  }
0x11b6   : > { %s2896_s2 = scalar_lea.sflag [#allocation4], %s2895_s24 }
0x11b7   : > { %4373 = dma.done.wait (!%p3586_p5), %s2896_s2, 128  }
0x11b8   : > { %4375 = vsyncadd (!%p3586_p5), %s2896_s2, 4294967168  ;;  %p32_p7 = scmp.ge.s32.totalorder %s4778_s18, 4   ;;  %s5255_s25 = smov %s4382_s26 }
0x11b9   : > { %s5256_s26 = smov %s4386_s27  ;;  %s5257_s27 = smov %s4789_s13 }
0x11ba   : > { %s5258_s28 = smov %s4778_s18  ;;  %34 = sbr.rel (!%p32_p7) target bundleno = 17 (0x11), region = 165 }
0x11c1   :  { %2901 = vsyncpa [#allocation3], 1 }
0x11c2   :  { %2903 = vsyncpa [#allocation3 + $0x1], 1 }
0x11c3   :  { %2904 = vsyncpa [#allocation6], 1 }
0x11c4   :  { %2905 = vsyncpa [#allocation9], 1 }
0x11c5   :  { %2906 = vsyncpa [#allocation12], 1 }
0x11c6   :  { %2907 = vsyncpa [#allocation15], 1 }
0x11c7   :  { %2908 = vsyncpa [#allocation18], 1 }
0x11c8   :  { %2909 = vsyncpa [#allocation21], 1 }
0x11c9   :  { %2910 = vsyncpa [#allocation4], 1 }
0x11ca   :  { %2912 = vsyncpa [#allocation4 + $0x1], 1 }

</bundles_post_ra>
